<compile_context>
chip_gen: v7x
topology: tpu7x:2x2x1
jax: 0.10.0
libtpu: 0.0.40
codegen_flags: <defaults>
</compile_context>

<pallas_src>
import functools
import math

import jax
import jax.numpy as jnp
from jax.experimental import pallas as pl
from jax.experimental.pallas import tpu as pltpu

LANE = 128
_VMEM_LIMIT = 32 * 1024 * 1024


def _round_up(x, m):
    return ((x + m - 1) // m) * m


# --------------------------------------------------------------------------
# Pallas kernels
# --------------------------------------------------------------------------
def _gemm_bias_act_kernel(a_ref, b_ref, bias_ref, o_ref, *, act):
    acc = jnp.dot(a_ref[...], b_ref[...], preferred_element_type=jnp.float32)
    acc = acc + bias_ref[...]            # (1, N) broadcast; f32 epilogue
    if act == "relu":
        acc = jnp.maximum(acc, 0.0)
    elif act == "tanh":
        acc = jnp.tanh(acc)
    o_ref[...] = acc.astype(o_ref.dtype)


def gemm_bias_act(a, b, bias, act="none"):
    """act((M,K) @ (K,N) + bias). N must be a multiple of 128 (lane dense).

    A and B are fed to the MXU as bf16 (halves DMA bytes); accumulation and
    the bias/activation epilogue stay in f32.
    """
    M, K = a.shape
    Kb, N = b.shape
    assert Kb == K and N % LANE == 0
    # One resident block for small M; cap at 256 so the largest GEMM (M=512)
    # still exposes 2 parallel M-blocks (keeps both TensorCores busy on v7x).
    tm = M if M <= 256 else 256
    grid_m = pl.cdiv(M, tm)
    cost = pl.CostEstimate(
        flops=2 * M * K * N,
        transcendentals=(M * N if act == "tanh" else 0),
        bytes_accessed=M * K * 2 + K * N * 2 + N * 4 + M * N * 4)
    return pl.pallas_call(
        functools.partial(_gemm_bias_act_kernel, act=act),
        out_shape=jax.ShapeDtypeStruct((M, N), jnp.float32),
        grid=(grid_m,),
        in_specs=[
            pl.BlockSpec((tm, K), lambda i: (i, 0)),
            pl.BlockSpec((K, N), lambda i: (0, 0)),
            pl.BlockSpec((1, N), lambda i: (0, 0)),
        ],
        out_specs=pl.BlockSpec((tm, N), lambda i: (i, 0)),
        compiler_params=pltpu.CompilerParams(
            dimension_semantics=("parallel",),
            vmem_limit_bytes=_VMEM_LIMIT),
        cost_estimate=cost,
    )(a.astype(jnp.bfloat16), b.astype(jnp.bfloat16),
      bias.reshape(1, N).astype(jnp.float32))


def _maxpool2_kernel(x_ref, o_ref):
    # x_ref: (B*H/2, 2, W/2, 2*C).  The (w % 2) pair was packed into the lane
    # axis by a free XLA reshape, so all four loads are contiguous,
    # 128-aligned lane slices and the store is lane dense.
    c = o_ref.shape[-1]
    p00 = x_ref[:, 0, :, 0:c]
    p01 = x_ref[:, 0, :, c:2 * c]
    p10 = x_ref[:, 1, :, 0:c]
    p11 = x_ref[:, 1, :, c:2 * c]
    o_ref[...] = jnp.maximum(jnp.maximum(p00, p01), jnp.maximum(p10, p11))


def maxpool2_nhwc(x):
    """MaxPool2d(kernel=2, stride=2), reading the activation exactly once."""
    B, H, W, C = x.shape
    x4 = x.reshape(B * H // 2, 2, W // 2, 2 * C)          # free reshape
    out = pl.pallas_call(
        _maxpool2_kernel,
        out_shape=jax.ShapeDtypeStruct((B * H // 2, W // 2, C), x.dtype),
        compiler_params=pltpu.CompilerParams(vmem_limit_bytes=_VMEM_LIMIT),
    )(x4)
    return out.reshape(B, H // 2, W // 2, C)


def _vq_kernel(flat_ref, cb_ref, q_ref, loss_ref, *, loss_scale):
    i = pl.program_id(0)

    @pl.when(i == 0)
    def _():
        loss_ref[...] = jnp.zeros_like(loss_ref)

    f = flat_ref[...]                                    # (tm, Dp) f32
    cb = cb_ref[...]                                     # (K,  Dp) f32
    f_sq = jnp.sum(f * f, axis=1, keepdims=True)         # (tm, 1)
    cb_sq = jnp.sum(cb * cb, axis=1, keepdims=True)      # (K, 1)
    cross = jax.lax.dot_general(                         # (tm, K) on the MXU
        f, cb, (((1,), (1,)), ((), ())),
        preferred_element_type=jnp.float32)
    dists = f_sq + jnp.transpose(cb_sq) - 2.0 * cross    # (tm, K) lane-dense
    idx = jnp.argmin(dists, axis=1, keepdims=True)       # first-min, as torch
    onehot = (jax.lax.broadcasted_iota(jnp.int32, dists.shape, 1)
              == idx).astype(jnp.float32)
    q = jnp.dot(onehot, cb, preferred_element_type=jnp.float32)  # gather
    q_ref[...] = q.astype(q_ref.dtype)
    diff = q - f
    # codebook_loss + commitment_cost * commitment_loss; detach() only affects
    # gradients, both terms share this forward value.
    loss_ref[...] += jnp.sum(diff * diff) * loss_scale


def vector_quantize(flat, codebook, commitment_cost):
    M, D = flat.shape
    Kc = codebook.shape[0]
    Dp = _round_up(D, LANE)                # lane-dense quantized output
    flat_p = jnp.pad(flat.astype(jnp.float32), ((0, 0), (0, Dp - D)))
    cb_p = jnp.pad(codebook.astype(jnp.float32), ((0, 0), (0, Dp - D)))
    loss_scale = (1.0 + commitment_cost) / float(M * D)
    tm = M if M <= 512 else 256
    assert M % tm == 0                     # keep loss accumulation exact
    cost = pl.CostEstimate(
        flops=4 * M * Kc * Dp, transcendentals=0,
        bytes_accessed=(M * Dp + Kc * Dp + M * Dp) * 4 + 4)
    q, loss = pl.pallas_call(
        functools.partial(_vq_kernel, loss_scale=loss_scale),
        out_shape=(jax.ShapeDtypeStruct((M, Dp), jnp.float32),
                   jax.ShapeDtypeStruct((1, 1), jnp.float32)),
        grid=(M // tm,),
        in_specs=[
            pl.BlockSpec((tm, Dp), lambda i: (i, 0)),
            pl.BlockSpec((Kc, Dp), lambda i: (0, 0)),      # codebook resident
        ],
        out_specs=(pl.BlockSpec((tm, Dp), lambda i: (i, 0)),
                   pl.BlockSpec((1, 1), lambda i: (0, 0))),  # revisited accum
        compiler_params=pltpu.CompilerParams(
            dimension_semantics=("arbitrary",),
            vmem_limit_bytes=_VMEM_LIMIT),
        cost_estimate=cost,
    )(flat_p, cb_p)
    return q[:, :D], loss[0, 0]


# --------------------------------------------------------------------------
# XLA-side glue: patch extraction and GEMM-ready weight layouts
# --------------------------------------------------------------------------
# TODO(synk): the 3x3 window extraction is still XLA glue (9 shifted slices +
# concat); folding it into the GEMM kernel via an in-kernel sliding window
# would remove the patch-matrix HBM round trip entirely.
def _im2col_3x3(x):
    """3x3, stride 1, pad 1 patches.  Columns ordered (ki, kj, channel)."""
    B, H, W, C = x.shape
    xp = jnp.pad(x, ((0, 0), (1, 1), (1, 1), (0, 0)))
    cols = [xp[:, a:a + H, b:b + W, :] for a in range(3) for b in range(3)]
    patches = jnp.concatenate(cols, axis=-1)
    return patches.reshape(B * H * W, 9 * C), (B, H, W)


def _pad_bias(bias, n):
    return jnp.pad(bias, (0, n - bias.shape[0]))


def _conv3x3_wmat(w_oihw, cin_pad, cout_pad):
    """PyTorch Conv2d weight (cout, cin, 3, 3) -> (9*cin_pad, cout_pad)."""
    cout, cin, kh, kw = w_oihw.shape
    wt = jnp.transpose(w_oihw, (2, 3, 1, 0))                  # (3,3,cin,cout)
    wt = jnp.pad(wt, ((0, 0), (0, 0), (0, cin_pad - cin), (0, cout_pad - cout)))
    return wt.reshape(kh * kw * cin_pad, cout_pad)


def _convT4x4_subpixel_wmat(w_iohw, cout_pad):
    """ConvTranspose2d weight (cin, cout, 4, 4), stride 2, pad 1, rewritten as
    a 3x3/stride-1 conv whose N axis packs the four output phases:
      column ((r*2 + s)*cout_pad + co), row ((ki*3 + kj)*cin + ci),
      phase (r, s) at tap (ki, kj) uses W[:, :, r+3-2ki, s+3-2kj]."""
    cin, cout, _, _ = w_iohw.shape
    zero = jnp.zeros((cin, cout_pad), w_iohw.dtype)
    rows = []
    for ki in range(3):
        for kj in range(3):
            phase_blocks = []
            for r in range(2):
                for s in range(2):
                    a = r + 3 - 2 * ki
                    b = s + 3 - 2 * kj
                    if 0 <= a <= 3 and 0 <= b <= 3:
                        blk = jnp.pad(w_iohw[:, :, a, b],
                                      ((0, 0), (0, cout_pad - cout)))
                    else:
                        blk = zero
                    phase_blocks.append(blk)
            rows.append(jnp.concatenate(phase_blocks, axis=1))
    return jnp.concatenate(rows, axis=0)          # (9*cin, 4*cout_pad)


def _convT4x4_subpixel_bias(bias, cout_pad):
    return jnp.tile(_pad_bias(bias, cout_pad), 4)


def conv3x3_block(x, w, b, act, cout_pad):
    """Conv2d(k=3, s=1, p=1) + bias + activation; output channels padded to
    cout_pad (multiple of 128) so every Pallas store is lane dense."""
    patches, (B, H, W) = _im2col_3x3(x)
    wm = _conv3x3_wmat(w, cin_pad=x.shape[-1], cout_pad=cout_pad)
    out = gemm_bias_act(patches, wm, _pad_bias(b, cout_pad), act=act)
    return out.reshape(B, H, W, cout_pad)


def conv_transpose4x4_block(x, w, b, act, cout_pad):
    """ConvTranspose2d(k=4, s=2, p=1) + bias + activation via the sub-pixel
    decomposition (single GEMM on the undilated input, no zero insertion)."""
    B, H, W, _ = x.shape
    patches, _ = _im2col_3x3(x)
    wm = _convT4x4_subpixel_wmat(w, cout_pad)
    out = gemm_bias_act(patches, wm, _convT4x4_subpixel_bias(b, cout_pad),
                        act=act)
    out = out.reshape(B, H, W, 2, 2, cout_pad)
    out = jnp.transpose(out, (0, 1, 3, 2, 4, 5))          # interleave phases
    return out.reshape(B, 2 * H, 2 * W, cout_pad)


# --------------------------------------------------------------------------
# Parameter init (deterministic, PyTorch-like shapes)
# --------------------------------------------------------------------------
def _init_conv(key, cout, cin, k):
    kw_, kb_ = jax.random.split(key)
    bound = 1.0 / math.sqrt(cin * k * k)
    w = jax.random.uniform(kw_, (cout, cin, k, k), jnp.float32, -bound, bound)
    b = jax.random.uniform(kb_, (cout,), jnp.float32, -bound, bound)
    return w, b


def _init_convT(key, cin, cout, k):
    kw_, kb_ = jax.random.split(key)
    bound = 1.0 / math.sqrt(cout * k * k)
    w = jax.random.uniform(kw_, (cin, cout, k, k), jnp.float32, -bound, bound)
    b = jax.random.uniform(kb_, (cout,), jnp.float32, -bound, bound)
    return w, b


def init_vqvae_params(key, num_embeddings=128, embedding_dim=64):
    keys = jax.random.split(key, 7)
    p = {}
    p["enc1_w"], p["enc1_b"] = _init_conv(keys[0], 32, 3, 3)
    p["enc2_w"], p["enc2_b"] = _init_conv(keys[1], 64, 32, 3)
    p["enc3_w"], p["enc3_b"] = _init_conv(keys[2], embedding_dim, 64, 3)
    p["dec1_w"], p["dec1_b"] = _init_convT(keys[3], embedding_dim, 64, 4)
    p["dec2_w"], p["dec2_b"] = _init_convT(keys[4], 64, 32, 4)
    p["dec3_w"], p["dec3_b"] = _init_convT(keys[5], 32, 3, 4)
    lim = 1.0 / num_embeddings
    p["codebook"] = jax.random.uniform(
        keys[6], (num_embeddings, embedding_dim), jnp.float32, -lim, lim)
    return p


# --------------------------------------------------------------------------
# Forward pass (matches VQVAE.forward semantics)
# --------------------------------------------------------------------------
def vqvae_forward(params, x_nchw, embedding_dim=64, commitment_cost=0.25):
    CP = LANE                                            # padded channel width
    x = jnp.transpose(x_nchw, (0, 2, 3, 1))              # NCHW -> NHWC

    # encoder (activations carry CP=128 channels; the padded extras are zero)
    h = conv3x3_block(x, params["enc1_w"], params["enc1_b"], "relu", CP)
    h = maxpool2_nhwc(h)
    h = conv3x3_block(h, params["enc2_w"], params["enc2_b"], "relu", CP)
    h = maxpool2_nhwc(h)
    h = conv3x3_block(h, params["enc3_w"], params["enc3_b"], "none", CP)
    h = maxpool2_nhwc(h)                                  # (B, 2, 2, 128)

    # vector quantizer: reproduce PyTorch's .view(-1, D) on the NCHW latent
    # (channel-major flatten -- faithful to the reference model).
    z = h[..., :embedding_dim]                            # drop padded chans
    z_nchw = jnp.transpose(z, (0, 3, 1, 2))
    flat = z_nchw.reshape(-1, embedding_dim)
    q_flat, vq_loss = vector_quantize(flat, params["codebook"],
                                      commitment_cost)
    # TODO(synk): straight-through (inputs + (q - inputs).detach()) only
    # changes autograd; the forward value is exactly the quantized tensor.
    q = jnp.transpose(q_flat.reshape(z_nchw.shape), (0, 2, 3, 1))  # NHWC

    # decoder (sub-pixel transposed convolutions)
    d = conv_transpose4x4_block(q, params["dec1_w"], params["dec1_b"],
                                "relu", cout_pad=64)      # (B, 4, 4, 64)
    d = conv_transpose4x4_block(d, params["dec2_w"], params["dec2_b"],
                                "relu", cout_pad=32)      # (B, 8, 8, 32)
    d = conv_transpose4x4_block(d, params["dec3_w"], params["dec3_b"],
                                "tanh", cout_pad=32)      # (B,16,16,32), 3 real
    x_recon = jnp.transpose(d[..., :3], (0, 3, 1, 2))     # NHWC -> NCHW
    return x_recon, vq_loss


# --------------------------------------------------------------------------
if __name__ == "__main__":
    key = jax.random.PRNGKey(0)
    k_params, k_x = jax.random.split(key)
    params = init_vqvae_params(k_params, num_embeddings=128, embedding_dim=64)
    x = jax.random.normal(k_x, (2, 3, 16, 16), jnp.float32)   # NCHW input

    fwd = jax.jit(functools.partial(vqvae_forward,
                                    embedding_dim=64, commitment_cost=0.25))
    x_recon, vq_loss = fwd(params, x)
    jax.block_until_ready((x_recon, vq_loss))

    assert x_recon.shape == (2, 3, 16, 16)
    assert x_recon.dtype == jnp.float32
    assert vq_loss.shape == ()
    assert bool(jnp.isfinite(vq_loss))
    assert bool(jnp.all(jnp.isfinite(x_recon)))
    print("KERNEL_OK")
</pallas_src>

<mosaic_0001>
module attributes {stable_mosaic.version = 11 : i64} {
  func.func @_gemm_bias_act_kernel(%arg0: i32, %arg1: memref<256x27xbf16, #tpu.memory_space<vmem>>, %arg2: memref<27x128xbf16, #tpu.memory_space<vmem>>, %arg3: memref<1x128xf32, #tpu.memory_space<vmem>>, %arg4: memref<256x128xf32, #tpu.memory_space<vmem>>) attributes {dimension_semantics = [#tpu.dimension_semantics<parallel>], iteration_bounds = array<i64: 2>, scalar_prefetch = 0 : i64, scratch_operands = 0 : i64, tpu.core_type = #tpu.core_type<tc>, window_params = [{transform_indices = @transform_0, window_bounds = array<i64: 256, 27>}, {pipeline_mode = #tpu.pipeline_mode<synchronous>, transform_indices = @transform_1, window_bounds = array<i64: 27, 128>}, {pipeline_mode = #tpu.pipeline_mode<synchronous>, transform_indices = @transform_2, window_bounds = array<i64: 1, 128>}, {transform_indices = @transform_3, window_bounds = array<i64: 256, 128>}]} {
    %c0 = arith.constant 0 : index
    %c0_0 = arith.constant 0 : index
    %0 = vector.load %arg1[%c0, %c0_0] : memref<256x27xbf16, #tpu.memory_space<vmem>>, vector<256x27xbf16>
    %c0_1 = arith.constant 0 : index
    %c0_2 = arith.constant 0 : index
    %1 = vector.load %arg2[%c0_1, %c0_2] : memref<27x128xbf16, #tpu.memory_space<vmem>>, vector<27x128xbf16>
    %cst = arith.constant dense<0.000000e+00> : vector<256x128xf32>
    %2 = tpu.matmul %0, %1, %cst {dimension_numbers = #tpu.dot_dimension_numbers<[1], [0], [0], [1], [0, 0, 1, 1], [], []>} : vector<256x27xbf16>, vector<27x128xbf16>, vector<256x128xf32> -> vector<256x128xf32>
    %c0_3 = arith.constant 0 : index
    %c0_4 = arith.constant 0 : index
    %3 = vector.load %arg3[%c0_3, %c0_4] : memref<1x128xf32, #tpu.memory_space<vmem>>, vector<1x128xf32>
    %4 = vector.broadcast %3 : vector<1x128xf32> to vector<256x128xf32>
    %5 = arith.addf %2, %4 : vector<256x128xf32>
    %cst_5 = arith.constant 0.000000e+00 : f32
    %6 = vector.broadcast %cst_5 : f32 to vector<256x128xf32>
    %7 = arith.maximumf %5, %6 : vector<256x128xf32>
    %c0_6 = arith.constant 0 : index
    %c0_7 = arith.constant 0 : index
    %8 = vector.load %arg4[%c0_6, %c0_7] : memref<256x128xf32, #tpu.memory_space<vmem>>, vector<256x128xf32>
    tpu.vector_store %arg4[%c0_6, %c0_7], %7 {strides = array<i32>} : memref<256x128xf32, #tpu.memory_space<vmem>>, vector<256x128xf32>,
    return
  }
  func.func @transform_0(%arg0: i32) -> (i32, i32) {
    %c0_i32 = arith.constant 0 : i32
    %c0_i32_0 = arith.constant 0 : i32
    return %arg0, %c0_i32 : i32, i32
  }
  func.func @transform_1(%arg0: i32) -> (i32, i32) {
    %c0_i32 = arith.constant 0 : i32
    %c0_i32_0 = arith.constant 0 : i32
    %c0_i32_1 = arith.constant 0 : i32
    return %c0_i32, %c0_i32_0 : i32, i32
  }
  func.func @transform_2(%arg0: i32) -> (i32, i32) {
    %c0_i32 = arith.constant 0 : i32
    %c0_i32_0 = arith.constant 0 : i32
    %c0_i32_1 = arith.constant 0 : i32
    return %c0_i32, %c0_i32_0 : i32, i32
  }
  func.func @transform_3(%arg0: i32) -> (i32, i32) {
    %c0_i32 = arith.constant 0 : i32
    %c0_i32_0 = arith.constant 0 : i32
    return %arg0, %c0_i32 : i32, i32
  }
}

module attributes {stable_mosaic.version = 11 : i64} {
  func.func @_maxpool2_kernel(%arg0: memref<16x2x8x256xf32, #tpu.memory_space<vmem>>, %arg1: memref<16x8x128xf32, #tpu.memory_space<vmem>>) attributes {dimension_semantics = [], scalar_prefetch = 0 : i64, scratch_operands = 0 : i64, tpu.core_type = #tpu.core_type<tc>} {
    %c0 = arith.constant 0 : index
    %c0_0 = arith.constant 0 : index
    %c0_1 = arith.constant 0 : index
    %c0_2 = arith.constant 0 : index
    %0 = vector.load %arg0[%c0, %c0_0, %c0_1, %c0_2] : memref<16x2x8x256xf32, #tpu.memory_space<vmem>>, vector<16x1x8x128xf32>
    %1 = vector.shape_cast %0 : vector<16x1x8x128xf32> to vector<16x8x128xf32>
    %c0_3 = arith.constant 0 : index
    %c0_4 = arith.constant 0 : index
    %c0_5 = arith.constant 0 : index
    %c128 = arith.constant 128 : index
    %2 = vector.load %arg0[%c0_3, %c0_4, %c0_5, %c128] : memref<16x2x8x256xf32, #tpu.memory_space<vmem>>, vector<16x1x8x128xf32>
    %3 = vector.shape_cast %2 : vector<16x1x8x128xf32> to vector<16x8x128xf32>
    %c0_6 = arith.constant 0 : index
    %c1 = arith.constant 1 : index
    %c0_7 = arith.constant 0 : index
    %c0_8 = arith.constant 0 : index
    %4 = vector.load %arg0[%c0_6, %c1, %c0_7, %c0_8] : memref<16x2x8x256xf32, #tpu.memory_space<vmem>>, vector<16x1x8x128xf32>
    %5 = vector.shape_cast %4 : vector<16x1x8x128xf32> to vector<16x8x128xf32>
    %c0_9 = arith.constant 0 : index
    %c1_10 = arith.constant 1 : index
    %c0_11 = arith.constant 0 : index
    %c128_12 = arith.constant 128 : index
    %6 = vector.load %arg0[%c0_9, %c1_10, %c0_11, %c128_12] : memref<16x2x8x256xf32, #tpu.memory_space<vmem>>, vector<16x1x8x128xf32>
    %7 = vector.shape_cast %6 : vector<16x1x8x128xf32> to vector<16x8x128xf32>
    %8 = arith.maximumf %1, %3 : vector<16x8x128xf32>
    %9 = arith.maximumf %5, %7 : vector<16x8x128xf32>
    %10 = arith.maximumf %8, %9 : vector<16x8x128xf32>
    %c0_13 = arith.constant 0 : index
    %c0_14 = arith.constant 0 : index
    %c0_15 = arith.constant 0 : index
    %11 = vector.load %arg1[%c0_13, %c0_14, %c0_15] : memref<16x8x128xf32, #tpu.memory_space<vmem>>, vector<16x8x128xf32>
    tpu.vector_store %arg1[%c0_13, %c0_14, %c0_15], %10 {strides = array<i32>} : memref<16x8x128xf32, #tpu.memory_space<vmem>>, vector<16x8x128xf32>,
    return
  }
}

module attributes {stable_mosaic.version = 11 : i64} {
  func.func @_gemm_bias_act_kernel(%arg0: i32, %arg1: memref<128x1152xbf16, #tpu.memory_space<vmem>>, %arg2: memref<1152x128xbf16, #tpu.memory_space<vmem>>, %arg3: memref<1x128xf32, #tpu.memory_space<vmem>>, %arg4: memref<128x128xf32, #tpu.memory_space<vmem>>) attributes {dimension_semantics = [#tpu.dimension_semantics<parallel>], iteration_bounds = array<i64: 1>, scalar_prefetch = 0 : i64, scratch_operands = 0 : i64, tpu.core_type = #tpu.core_type<tc>, window_params = [{transform_indices = @transform_0, window_bounds = array<i64: 128, 1152>}, {pipeline_mode = #tpu.pipeline_mode<synchronous>, transform_indices = @transform_1, window_bounds = array<i64: 1152, 128>}, {pipeline_mode = #tpu.pipeline_mode<synchronous>, transform_indices = @transform_2, window_bounds = array<i64: 1, 128>}, {transform_indices = @transform_3, window_bounds = array<i64: 128, 128>}]} {
    %c0 = arith.constant 0 : index
    %c0_0 = arith.constant 0 : index
    %0 = vector.load %arg1[%c0, %c0_0] : memref<128x1152xbf16, #tpu.memory_space<vmem>>, vector<128x1152xbf16>
    %c0_1 = arith.constant 0 : index
    %c0_2 = arith.constant 0 : index
    %1 = vector.load %arg2[%c0_1, %c0_2] : memref<1152x128xbf16, #tpu.memory_space<vmem>>, vector<1152x128xbf16>
    %cst = arith.constant dense<0.000000e+00> : vector<128x128xf32>
    %2 = tpu.matmul %0, %1, %cst {dimension_numbers = #tpu.dot_dimension_numbers<[1], [0], [0], [1], [0, 0, 1, 1], [], []>} : vector<128x1152xbf16>, vector<1152x128xbf16>, vector<128x128xf32> -> vector<128x128xf32>
    %c0_3 = arith.constant 0 : index
    %c0_4 = arith.constant 0 : index
    %3 = vector.load %arg3[%c0_3, %c0_4] : memref<1x128xf32, #tpu.memory_space<vmem>>, vector<1x128xf32>
    %4 = vector.broadcast %3 : vector<1x128xf32> to vector<128x128xf32>
    %5 = arith.addf %2, %4 : vector<128x128xf32>
    %cst_5 = arith.constant 0.000000e+00 : f32
    %6 = vector.broadcast %cst_5 : f32 to vector<128x128xf32>
    %7 = arith.maximumf %5, %6 : vector<128x128xf32>
    %c0_6 = arith.constant 0 : index
    %c0_7 = arith.constant 0 : index
    %8 = vector.load %arg4[%c0_6, %c0_7] : memref<128x128xf32, #tpu.memory_space<vmem>>, vector<128x128xf32>
    tpu.vector_store %arg4[%c0_6, %c0_7], %7 {strides = array<i32>} : memref<128x128xf32, #tpu.memory_space<vmem>>, vector<128x128xf32>,
    return
  }
  func.func @transform_0(%arg0: i32) -> (i32, i32) {
    %c0_i32 = arith.constant 0 : i32
    %c0_i32_0 = arith.constant 0 : i32
    return %arg0, %c0_i32 : i32, i32
  }
  func.func @transform_1(%arg0: i32) -> (i32, i32) {
    %c0_i32 = arith.constant 0 : i32
    %c0_i32_0 = arith.constant 0 : i32
    %c0_i32_1 = arith.constant 0 : i32
    return %c0_i32, %c0_i32_0 : i32, i32
  }
  func.func @transform_2(%arg0: i32) -> (i32, i32) {
    %c0_i32 = arith.constant 0 : i32
    %c0_i32_0 = arith.constant 0 : i32
    %c0_i32_1 = arith.constant 0 : i32
    return %c0_i32, %c0_i32_0 : i32, i32
  }
  func.func @transform_3(%arg0: i32) -> (i32, i32) {
    %c0_i32 = arith.constant 0 : i32
    %c0_i32_0 = arith.constant 0 : i32
    return %arg0, %c0_i32 : i32, i32
  }
}

module attributes {stable_mosaic.version = 11 : i64} {
  func.func @_maxpool2_kernel(%arg0: memref<8x2x4x256xf32, #tpu.memory_space<vmem>>, %arg1: memref<8x4x128xf32, #tpu.memory_space<vmem>>) attributes {dimension_semantics = [], scalar_prefetch = 0 : i64, scratch_operands = 0 : i64, tpu.core_type = #tpu.core_type<tc>} {
    %c0 = arith.constant 0 : index
    %c0_0 = arith.constant 0 : index
    %c0_1 = arith.constant 0 : index
    %c0_2 = arith.constant 0 : index
    %0 = vector.load %arg0[%c0, %c0_0, %c0_1, %c0_2] : memref<8x2x4x256xf32, #tpu.memory_space<vmem>>, vector<8x1x4x128xf32>
    %1 = vector.shape_cast %0 : vector<8x1x4x128xf32> to vector<8x4x128xf32>
    %c0_3 = arith.constant 0 : index
    %c0_4 = arith.constant 0 : index
    %c0_5 = arith.constant 0 : index
    %c128 = arith.constant 128 : index
    %2 = vector.load %arg0[%c0_3, %c0_4, %c0_5, %c128] : memref<8x2x4x256xf32, #tpu.memory_space<vmem>>, vector<8x1x4x128xf32>
    %3 = vector.shape_cast %2 : vector<8x1x4x128xf32> to vector<8x4x128xf32>
    %c0_6 = arith.constant 0 : index
    %c1 = arith.constant 1 : index
    %c0_7 = arith.constant 0 : index
    %c0_8 = arith.constant 0 : index
    %4 = vector.load %arg0[%c0_6, %c1, %c0_7, %c0_8] : memref<8x2x4x256xf32, #tpu.memory_space<vmem>>, vector<8x1x4x128xf32>
    %5 = vector.shape_cast %4 : vector<8x1x4x128xf32> to vector<8x4x128xf32>
    %c0_9 = arith.constant 0 : index
    %c1_10 = arith.constant 1 : index
    %c0_11 = arith.constant 0 : index
    %c128_12 = arith.constant 128 : index
    %6 = vector.load %arg0[%c0_9, %c1_10, %c0_11, %c128_12] : memref<8x2x4x256xf32, #tpu.memory_space<vmem>>, vector<8x1x4x128xf32>
    %7 = vector.shape_cast %6 : vector<8x1x4x128xf32> to vector<8x4x128xf32>
    %8 = arith.maximumf %1, %3 : vector<8x4x128xf32>
    %9 = arith.maximumf %5, %7 : vector<8x4x128xf32>
    %10 = arith.maximumf %8, %9 : vector<8x4x128xf32>
    %c0_13 = arith.constant 0 : index
    %c0_14 = arith.constant 0 : index
    %c0_15 = arith.constant 0 : index
    %11 = vector.load %arg1[%c0_13, %c0_14, %c0_15] : memref<8x4x128xf32, #tpu.memory_space<vmem>>, vector<8x4x128xf32>
    tpu.vector_store %arg1[%c0_13, %c0_14, %c0_15], %10 {strides = array<i32>} : memref<8x4x128xf32, #tpu.memory_space<vmem>>, vector<8x4x128xf32>,
    return
  }
}

module attributes {stable_mosaic.version = 11 : i64} {
  func.func @_gemm_bias_act_kernel(%arg0: i32, %arg1: memref<32x1152xbf16, #tpu.memory_space<vmem>>, %arg2: memref<1152x128xbf16, #tpu.memory_space<vmem>>, %arg3: memref<1x128xf32, #tpu.memory_space<vmem>>, %arg4: memref<32x128xf32, #tpu.memory_space<vmem>>) attributes {dimension_semantics = [#tpu.dimension_semantics<parallel>], iteration_bounds = array<i64: 1>, scalar_prefetch = 0 : i64, scratch_operands = 0 : i64, tpu.core_type = #tpu.core_type<tc>, window_params = [{transform_indices = @transform_0, window_bounds = array<i64: 32, 1152>}, {pipeline_mode = #tpu.pipeline_mode<synchronous>, transform_indices = @transform_1, window_bounds = array<i64: 1152, 128>}, {pipeline_mode = #tpu.pipeline_mode<synchronous>, transform_indices = @transform_2, window_bounds = array<i64: 1, 128>}, {transform_indices = @transform_3, window_bounds = array<i64: 32, 128>}]} {
    %c0 = arith.constant 0 : index
    %c0_0 = arith.constant 0 : index
    %0 = vector.load %arg1[%c0, %c0_0] : memref<32x1152xbf16, #tpu.memory_space<vmem>>, vector<32x1152xbf16>
    %c0_1 = arith.constant 0 : index
    %c0_2 = arith.constant 0 : index
    %1 = vector.load %arg2[%c0_1, %c0_2] : memref<1152x128xbf16, #tpu.memory_space<vmem>>, vector<1152x128xbf16>
    %cst = arith.constant dense<0.000000e+00> : vector<32x128xf32>
    %2 = tpu.matmul %0, %1, %cst {dimension_numbers = #tpu.dot_dimension_numbers<[1], [0], [0], [1], [0, 0, 1, 1], [], []>} : vector<32x1152xbf16>, vector<1152x128xbf16>, vector<32x128xf32> -> vector<32x128xf32>
    %c0_3 = arith.constant 0 : index
    %c0_4 = arith.constant 0 : index
    %3 = vector.load %arg3[%c0_3, %c0_4] : memref<1x128xf32, #tpu.memory_space<vmem>>, vector<1x128xf32>
    %4 = vector.broadcast %3 : vector<1x128xf32> to vector<32x128xf32>
    %5 = arith.addf %2, %4 : vector<32x128xf32>
    %c0_5 = arith.constant 0 : index
    %c0_6 = arith.constant 0 : index
    %6 = vector.load %arg4[%c0_5, %c0_6] : memref<32x128xf32, #tpu.memory_space<vmem>>, vector<32x128xf32>
    tpu.vector_store %arg4[%c0_5, %c0_6], %5 {strides = array<i32>} : memref<32x128xf32, #tpu.memory_space<vmem>>, vector<32x128xf32>,
    return
  }
  func.func @transform_0(%arg0: i32) -> (i32, i32) {
    %c0_i32 = arith.constant 0 : i32
    %c0_i32_0 = arith.constant 0 : i32
    return %arg0, %c0_i32 : i32, i32
  }
  func.func @transform_1(%arg0: i32) -> (i32, i32) {
    %c0_i32 = arith.constant 0 : i32
    %c0_i32_0 = arith.constant 0 : i32
    %c0_i32_1 = arith.constant 0 : i32
    return %c0_i32, %c0_i32_0 : i32, i32
  }
  func.func @transform_2(%arg0: i32) -> (i32, i32) {
    %c0_i32 = arith.constant 0 : i32
    %c0_i32_0 = arith.constant 0 : i32
    %c0_i32_1 = arith.constant 0 : i32
    return %c0_i32, %c0_i32_0 : i32, i32
  }
  func.func @transform_3(%arg0: i32) -> (i32, i32) {
    %c0_i32 = arith.constant 0 : i32
    %c0_i32_0 = arith.constant 0 : i32
    return %arg0, %c0_i32 : i32, i32
  }
}

module attributes {stable_mosaic.version = 11 : i64} {
  func.func @_maxpool2_kernel(%arg0: memref<4x2x2x256xf32, #tpu.memory_space<vmem>>, %arg1: memref<4x2x128xf32, #tpu.memory_space<vmem>>) attributes {dimension_semantics = [], scalar_prefetch = 0 : i64, scratch_operands = 0 : i64, tpu.core_type = #tpu.core_type<tc>} {
    %c0 = arith.constant 0 : index
    %c0_0 = arith.constant 0 : index
    %c0_1 = arith.constant 0 : index
    %c0_2 = arith.constant 0 : index
    %0 = vector.load %arg0[%c0, %c0_0, %c0_1, %c0_2] : memref<4x2x2x256xf32, #tpu.memory_space<vmem>>, vector<4x1x2x128xf32>
    %1 = vector.shape_cast %0 : vector<4x1x2x128xf32> to vector<4x2x128xf32>
    %c0_3 = arith.constant 0 : index
    %c0_4 = arith.constant 0 : index
    %c0_5 = arith.constant 0 : index
    %c128 = arith.constant 128 : index
    %2 = vector.load %arg0[%c0_3, %c0_4, %c0_5, %c128] : memref<4x2x2x256xf32, #tpu.memory_space<vmem>>, vector<4x1x2x128xf32>
    %3 = vector.shape_cast %2 : vector<4x1x2x128xf32> to vector<4x2x128xf32>
    %c0_6 = arith.constant 0 : index
    %c1 = arith.constant 1 : index
    %c0_7 = arith.constant 0 : index
    %c0_8 = arith.constant 0 : index
    %4 = vector.load %arg0[%c0_6, %c1, %c0_7, %c0_8] : memref<4x2x2x256xf32, #tpu.memory_space<vmem>>, vector<4x1x2x128xf32>
    %5 = vector.shape_cast %4 : vector<4x1x2x128xf32> to vector<4x2x128xf32>
    %c0_9 = arith.constant 0 : index
    %c1_10 = arith.constant 1 : index
    %c0_11 = arith.constant 0 : index
    %c128_12 = arith.constant 128 : index
    %6 = vector.load %arg0[%c0_9, %c1_10, %c0_11, %c128_12] : memref<4x2x2x256xf32, #tpu.memory_space<vmem>>, vector<4x1x2x128xf32>
    %7 = vector.shape_cast %6 : vector<4x1x2x128xf32> to vector<4x2x128xf32>
    %8 = arith.maximumf %1, %3 : vector<4x2x128xf32>
    %9 = arith.maximumf %5, %7 : vector<4x2x128xf32>
    %10 = arith.maximumf %8, %9 : vector<4x2x128xf32>
    %c0_13 = arith.constant 0 : index
    %c0_14 = arith.constant 0 : index
    %c0_15 = arith.constant 0 : index
    %11 = vector.load %arg1[%c0_13, %c0_14, %c0_15] : memref<4x2x128xf32, #tpu.memory_space<vmem>>, vector<4x2x128xf32>
    tpu.vector_store %arg1[%c0_13, %c0_14, %c0_15], %10 {strides = array<i32>} : memref<4x2x128xf32, #tpu.memory_space<vmem>>, vector<4x2x128xf32>,
    return
  }
}

module attributes {stable_mosaic.version = 11 : i64} {
  func.func @_vq_kernel(%arg0: i32, %arg1: memref<8x128xf32, #tpu.memory_space<vmem>>, %arg2: memref<128x128xf32, #tpu.memory_space<vmem>>, %arg3: memref<8x128xf32, #tpu.memory_space<vmem>>, %arg4: memref<1x1xf32, #tpu.memory_space<vmem>>) attributes {dimension_semantics = [#tpu.dimension_semantics<arbitrary>], iteration_bounds = array<i64: 1>, scalar_prefetch = 0 : i64, scratch_operands = 0 : i64, tpu.core_type = #tpu.core_type<tc>, window_params = [{transform_indices = @transform_0, window_bounds = array<i64: 8, 128>}, {pipeline_mode = #tpu.pipeline_mode<synchronous>, transform_indices = @transform_1, window_bounds = array<i64: 128, 128>}, {transform_indices = @transform_2, window_bounds = array<i64: 8, 128>}, {pipeline_mode = #tpu.pipeline_mode<synchronous>, transform_indices = @transform_3, window_bounds = array<i64: 1, 1>}]} {
    %c0_i32 = arith.constant 0 : i32
    %0 = arith.cmpi eq, %arg0, %c0_i32 : i32
    %1 = arith.extui %0 : i1 to i32
    %c0_i32_0 = arith.constant 0 : i32
    %2 = arith.cmpi ne, %1, %c0_i32_0 : i32
    scf.if %2 {
      %cst_16 = arith.constant 0.000000e+00 : f32
      %39 = vector.broadcast %cst_16 : f32 to vector<1x1xf32>
      %c0_17 = arith.constant 0 : index
      %c0_18 = arith.constant 0 : index
      %40 = vector.load %arg4[%c0_17, %c0_18] : memref<1x1xf32, #tpu.memory_space<vmem>>, vector<1x1xf32>
      tpu.vector_store %arg4[%c0_17, %c0_18], %39 {strides = array<i32>} : memref<1x1xf32, #tpu.memory_space<vmem>>, vector<1x1xf32>,
    } else {
    }
    %c0 = arith.constant 0 : index
    %c0_1 = arith.constant 0 : index
    %3 = vector.load %arg1[%c0, %c0_1] : memref<8x128xf32, #tpu.memory_space<vmem>>, vector<8x128xf32>
    %c0_2 = arith.constant 0 : index
    %c0_3 = arith.constant 0 : index
    %4 = vector.load %arg2[%c0_2, %c0_3] : memref<128x128xf32, #tpu.memory_space<vmem>>, vector<128x128xf32>
    %5 = arith.mulf %3, %3 : vector<8x128xf32>
    %cst = arith.constant dense<0.000000e+00> : vector<8xf32>
    %6 = vector.multi_reduction <add>, %5, %cst [1] : vector<8x128xf32> to vector<8xf32>
    %7 = vector.shape_cast %6 : vector<8xf32> to vector<8x1xf32>
    %8 = arith.mulf %4, %4 : vector<128x128xf32>
    %cst_4 = arith.constant dense<0.000000e+00> : vector<128xf32>
    %9 = vector.multi_reduction <add>, %8, %cst_4 [1] : vector<128x128xf32> to vector<128xf32>
    %10 = vector.shape_cast %9 : vector<128xf32> to vector<128x1xf32>
    %cst_5 = arith.constant dense<0.000000e+00> : vector<8x128xf32>
    %11 = tpu.matmul %3, %4, %cst_5 {dimension_numbers = #tpu.dot_dimension_numbers<[1], [1], [0], [0], [0, 0, 1, 0], [], []>} : vector<8x128xf32>, vector<128x128xf32>, vector<8x128xf32> -> vector<8x128xf32>
    %12 = tpu.transpose %10, [1, 0] : vector<128x1xf32> -> vector<1x128xf32>
    %13 = vector.broadcast %7 : vector<8x1xf32> to vector<8x128xf32>
    %14 = vector.broadcast %12 : vector<1x128xf32> to vector<8x128xf32>
    %15 = arith.addf %13, %14 : vector<8x128xf32>
    %cst_6 = arith.constant 2.000000e+00 : f32
    %16 = vector.broadcast %cst_6 : f32 to vector<8x128xf32>
    %17 = arith.mulf %16, %11 : vector<8x128xf32>
    %18 = arith.subf %15, %17 : vector<8x128xf32>
    %19 = tpu.reduce_index %18 {axis = 1 : i32, kind = #tpu.reduction_kind<arg_min>} : vector<8x128xf32> -> vector<8xi32>
    %20 = vector.shape_cast %19 : vector<8xi32> to vector<8x1xi32>
    %21 = tpu.iota {dimensions = array<i32: 1>} : vector<8x128xi32>
    %22 = vector.broadcast %20 : vector<8x1xi32> to vector<8x128xi32>
    %23 = arith.cmpi eq, %21, %22 : vector<8x128xi32>
    %24 = arith.extui %23 : vector<8x128xi1> to vector<8x128xi32>
    %25 = arith.sitofp %24 : vector<8x128xi32> to vector<8x128xf32>
    %cst_7 = arith.constant dense<0.000000e+00> : vector<8x128xf32>
    %26 = tpu.matmul %25, %4, %cst_7 {dimension_numbers = #tpu.dot_dimension_numbers<[1], [0], [0], [1], [0, 0, 1, 1], [], []>} : vector<8x128xf32>, vector<128x128xf32>, vector<8x128xf32> -> vector<8x128xf32>
    %c0_8 = arith.constant 0 : index
    %c0_9 = arith.constant 0 : index
    %27 = vector.load %arg3[%c0_8, %c0_9] : memref<8x128xf32, #tpu.memory_space<vmem>>, vector<8x128xf32>
    tpu.vector_store %arg3[%c0_8, %c0_9], %26 {strides = array<i32>} : memref<8x128xf32, #tpu.memory_space<vmem>>, vector<8x128xf32>,
    %28 = arith.subf %26, %3 : vector<8x128xf32>
    %c0_10 = arith.constant 0 : index
    %c0_11 = arith.constant 0 : index
    %29 = vector.load %arg4[%c0_10, %c0_11] : memref<1x1xf32, #tpu.memory_space<vmem>>, vector<1x1xf32>
    %30 = arith.mulf %28, %28 : vector<8x128xf32>
    %31 = vector.shape_cast %30 : vector<8x128xf32> to vector<1x8x128xf32>
    %cst_12 = arith.constant dense<0.000000e+00> : vector<1xf32>
    %32 = vector.multi_reduction <add>, %31, %cst_12 [1, 2] : vector<1x8x128xf32> to vector<1xf32>
    %33 = vector.shape_cast %32 : vector<1xf32> to vector<1x1x1xf32>
    %34 = vector.extract %33[0, 0, 0] : f32 from vector<1x1x1xf32>
    %cst_13 = arith.constant 0.00244140625 : f32
    %35 = arith.mulf %34, %cst_13 : f32
    %36 = vector.broadcast %35 : f32 to vector<1x1xf32>
    %37 = arith.addf %29, %36 : vector<1x1xf32>
    %c0_14 = arith.constant 0 : index
    %c0_15 = arith.constant 0 : index
    %38 = vector.load %arg4[%c0_14, %c0_15] : memref<1x1xf32, #tpu.memory_space<vmem>>, vector<1x1xf32>
    tpu.vector_store %arg4[%c0_14, %c0_15], %37 {strides = array<i32>} : memref<1x1xf32, #tpu.memory_space<vmem>>, vector<1x1xf32>,
    return
  }
  func.func @transform_0(%arg0: i32) -> (i32, i32) {
    %c0_i32 = arith.constant 0 : i32
    %c0_i32_0 = arith.constant 0 : i32
    return %arg0, %c0_i32 : i32, i32
  }
  func.func @transform_1(%arg0: i32) -> (i32, i32) {
    %c0_i32 = arith.constant 0 : i32
    %c0_i32_0 = arith.constant 0 : i32
    %c0_i32_1 = arith.constant 0 : i32
    return %c0_i32, %c0_i32_0 : i32, i32
  }
  func.func @transform_2(%arg0: i32) -> (i32, i32) {
    %c0_i32 = arith.constant 0 : i32
    %c0_i32_0 = arith.constant 0 : i32
    return %arg0, %c0_i32 : i32, i32
  }
  func.func @transform_3(%arg0: i32) -> (i32, i32) {
    %c0_i32 = arith.constant 0 : i32
    %c0_i32_0 = arith.constant 0 : i32
    %c0_i32_1 = arith.constant 0 : i32
    return %c0_i32, %c0_i32_0 : i32, i32
  }
}

module attributes {stable_mosaic.version = 11 : i64} {
  func.func @_gemm_bias_act_kernel(%arg0: i32, %arg1: memref<8x576xbf16, #tpu.memory_space<vmem>>, %arg2: memref<576x256xbf16, #tpu.memory_space<vmem>>, %arg3: memref<1x256xf32, #tpu.memory_space<vmem>>, %arg4: memref<8x256xf32, #tpu.memory_space<vmem>>) attributes {dimension_semantics = [#tpu.dimension_semantics<parallel>], iteration_bounds = array<i64: 1>, scalar_prefetch = 0 : i64, scratch_operands = 0 : i64, tpu.core_type = #tpu.core_type<tc>, window_params = [{transform_indices = @transform_0, window_bounds = array<i64: 8, 576>}, {pipeline_mode = #tpu.pipeline_mode<synchronous>, transform_indices = @transform_1, window_bounds = array<i64: 576, 256>}, {pipeline_mode = #tpu.pipeline_mode<synchronous>, transform_indices = @transform_2, window_bounds = array<i64: 1, 256>}, {transform_indices = @transform_3, window_bounds = array<i64: 8, 256>}]} {
    %c0 = arith.constant 0 : index
    %c0_0 = arith.constant 0 : index
    %0 = vector.load %arg1[%c0, %c0_0] : memref<8x576xbf16, #tpu.memory_space<vmem>>, vector<8x576xbf16>
    %c0_1 = arith.constant 0 : index
    %c0_2 = arith.constant 0 : index
    %1 = vector.load %arg2[%c0_1, %c0_2] : memref<576x256xbf16, #tpu.memory_space<vmem>>, vector<576x256xbf16>
    %cst = arith.constant dense<0.000000e+00> : vector<8x256xf32>
    %2 = tpu.matmul %0, %1, %cst {dimension_numbers = #tpu.dot_dimension_numbers<[1], [0], [0], [1], [0, 0, 1, 1], [], []>} : vector<8x576xbf16>, vector<576x256xbf16>, vector<8x256xf32> -> vector<8x256xf32>
    %c0_3 = arith.constant 0 : index
    %c0_4 = arith.constant 0 : index
    %3 = vector.load %arg3[%c0_3, %c0_4] : memref<1x256xf32, #tpu.memory_space<vmem>>, vector<1x256xf32>
    %4 = vector.broadcast %3 : vector<1x256xf32> to vector<8x256xf32>
    %5 = arith.addf %2, %4 : vector<8x256xf32>
    %cst_5 = arith.constant 0.000000e+00 : f32
    %6 = vector.broadcast %cst_5 : f32 to vector<8x256xf32>
    %7 = arith.maximumf %5, %6 : vector<8x256xf32>
    %c0_6 = arith.constant 0 : index
    %c0_7 = arith.constant 0 : index
    %8 = vector.load %arg4[%c0_6, %c0_7] : memref<8x256xf32, #tpu.memory_space<vmem>>, vector<8x256xf32>
    tpu.vector_store %arg4[%c0_6, %c0_7], %7 {strides = array<i32>} : memref<8x256xf32, #tpu.memory_space<vmem>>, vector<8x256xf32>,
    return
  }
  func.func @transform_0(%arg0: i32) -> (i32, i32) {
    %c0_i32 = arith.constant 0 : i32
    %c0_i32_0 = arith.constant 0 : i32
    return %arg0, %c0_i32 : i32, i32
  }
  func.func @transform_1(%arg0: i32) -> (i32, i32) {
    %c0_i32 = arith.constant 0 : i32
    %c0_i32_0 = arith.constant 0 : i32
    %c0_i32_1 = arith.constant 0 : i32
    return %c0_i32, %c0_i32_0 : i32, i32
  }
  func.func @transform_2(%arg0: i32) -> (i32, i32) {
    %c0_i32 = arith.constant 0 : i32
    %c0_i32_0 = arith.constant 0 : i32
    %c0_i32_1 = arith.constant 0 : i32
    return %c0_i32, %c0_i32_0 : i32, i32
  }
  func.func @transform_3(%arg0: i32) -> (i32, i32) {
    %c0_i32 = arith.constant 0 : i32
    %c0_i32_0 = arith.constant 0 : i32
    return %arg0, %c0_i32 : i32, i32
  }
}

module attributes {stable_mosaic.version = 11 : i64} {
  func.func @_gemm_bias_act_kernel(%arg0: i32, %arg1: memref<32x576xbf16, #tpu.memory_space<vmem>>, %arg2: memref<576x128xbf16, #tpu.memory_space<vmem>>, %arg3: memref<1x128xf32, #tpu.memory_space<vmem>>, %arg4: memref<32x128xf32, #tpu.memory_space<vmem>>) attributes {dimension_semantics = [#tpu.dimension_semantics<parallel>], iteration_bounds = array<i64: 1>, scalar_prefetch = 0 : i64, scratch_operands = 0 : i64, tpu.core_type = #tpu.core_type<tc>, window_params = [{transform_indices = @transform_0, window_bounds = array<i64: 32, 576>}, {pipeline_mode = #tpu.pipeline_mode<synchronous>, transform_indices = @transform_1, window_bounds = array<i64: 576, 128>}, {pipeline_mode = #tpu.pipeline_mode<synchronous>, transform_indices = @transform_2, window_bounds = array<i64: 1, 128>}, {transform_indices = @transform_3, window_bounds = array<i64: 32, 128>}]} {
    %c0 = arith.constant 0 : index
    %c0_0 = arith.constant 0 : index
    %0 = vector.load %arg1[%c0, %c0_0] : memref<32x576xbf16, #tpu.memory_space<vmem>>, vector<32x576xbf16>
    %c0_1 = arith.constant 0 : index
    %c0_2 = arith.constant 0 : index
    %1 = vector.load %arg2[%c0_1, %c0_2] : memref<576x128xbf16, #tpu.memory_space<vmem>>, vector<576x128xbf16>
    %cst = arith.constant dense<0.000000e+00> : vector<32x128xf32>
    %2 = tpu.matmul %0, %1, %cst {dimension_numbers = #tpu.dot_dimension_numbers<[1], [0], [0], [1], [0, 0, 1, 1], [], []>} : vector<32x576xbf16>, vector<576x128xbf16>, vector<32x128xf32> -> vector<32x128xf32>
    %c0_3 = arith.constant 0 : index
    %c0_4 = arith.constant 0 : index
    %3 = vector.load %arg3[%c0_3, %c0_4] : memref<1x128xf32, #tpu.memory_space<vmem>>, vector<1x128xf32>
    %4 = vector.broadcast %3 : vector<1x128xf32> to vector<32x128xf32>
    %5 = arith.addf %2, %4 : vector<32x128xf32>
    %cst_5 = arith.constant 0.000000e+00 : f32
    %6 = vector.broadcast %cst_5 : f32 to vector<32x128xf32>
    %7 = arith.maximumf %5, %6 : vector<32x128xf32>
    %c0_6 = arith.constant 0 : index
    %c0_7 = arith.constant 0 : index
    %8 = vector.load %arg4[%c0_6, %c0_7] : memref<32x128xf32, #tpu.memory_space<vmem>>, vector<32x128xf32>
    tpu.vector_store %arg4[%c0_6, %c0_7], %7 {strides = array<i32>} : memref<32x128xf32, #tpu.memory_space<vmem>>, vector<32x128xf32>,
    return
  }
  func.func @transform_0(%arg0: i32) -> (i32, i32) {
    %c0_i32 = arith.constant 0 : i32
    %c0_i32_0 = arith.constant 0 : i32
    return %arg0, %c0_i32 : i32, i32
  }
  func.func @transform_1(%arg0: i32) -> (i32, i32) {
    %c0_i32 = arith.constant 0 : i32
    %c0_i32_0 = arith.constant 0 : i32
    %c0_i32_1 = arith.constant 0 : i32
    return %c0_i32, %c0_i32_0 : i32, i32
  }
  func.func @transform_2(%arg0: i32) -> (i32, i32) {
    %c0_i32 = arith.constant 0 : i32
    %c0_i32_0 = arith.constant 0 : i32
    %c0_i32_1 = arith.constant 0 : i32
    return %c0_i32, %c0_i32_0 : i32, i32
  }
  func.func @transform_3(%arg0: i32) -> (i32, i32) {
    %c0_i32 = arith.constant 0 : i32
    %c0_i32_0 = arith.constant 0 : i32
    return %arg0, %c0_i32 : i32, i32
  }
}

module attributes {stable_mosaic.version = 11 : i64} {
  func.func @_gemm_bias_act_kernel(%arg0: i32, %arg1: memref<128x288xbf16, #tpu.memory_space<vmem>>, %arg2: memref<288x128xbf16, #tpu.memory_space<vmem>>, %arg3: memref<1x128xf32, #tpu.memory_space<vmem>>, %arg4: memref<128x128xf32, #tpu.memory_space<vmem>>) attributes {dimension_semantics = [#tpu.dimension_semantics<parallel>], iteration_bounds = array<i64: 1>, scalar_prefetch = 0 : i64, scratch_operands = 0 : i64, tpu.core_type = #tpu.core_type<tc>, window_params = [{transform_indices = @transform_0, window_bounds = array<i64: 128, 288>}, {pipeline_mode = #tpu.pipeline_mode<synchronous>, transform_indices = @transform_1, window_bounds = array<i64: 288, 128>}, {pipeline_mode = #tpu.pipeline_mode<synchronous>, transform_indices = @transform_2, window_bounds = array<i64: 1, 128>}, {transform_indices = @transform_3, window_bounds = array<i64: 128, 128>}]} {
    %c0 = arith.constant 0 : index
    %c0_0 = arith.constant 0 : index
    %0 = vector.load %arg1[%c0, %c0_0] : memref<128x288xbf16, #tpu.memory_space<vmem>>, vector<128x288xbf16>
    %c0_1 = arith.constant 0 : index
    %c0_2 = arith.constant 0 : index
    %1 = vector.load %arg2[%c0_1, %c0_2] : memref<288x128xbf16, #tpu.memory_space<vmem>>, vector<288x128xbf16>
    %cst = arith.constant dense<0.000000e+00> : vector<128x128xf32>
    %2 = tpu.matmul %0, %1, %cst {dimension_numbers = #tpu.dot_dimension_numbers<[1], [0], [0], [1], [0, 0, 1, 1], [], []>} : vector<128x288xbf16>, vector<288x128xbf16>, vector<128x128xf32> -> vector<128x128xf32>
    %c0_3 = arith.constant 0 : index
    %c0_4 = arith.constant 0 : index
    %3 = vector.load %arg3[%c0_3, %c0_4] : memref<1x128xf32, #tpu.memory_space<vmem>>, vector<1x128xf32>
    %4 = vector.broadcast %3 : vector<1x128xf32> to vector<128x128xf32>
    %5 = arith.addf %2, %4 : vector<128x128xf32>
    %6 = math.tanh %5 : vector<128x128xf32>
    %c0_5 = arith.constant 0 : index
    %c0_6 = arith.constant 0 : index
    %7 = vector.load %arg4[%c0_5, %c0_6] : memref<128x128xf32, #tpu.memory_space<vmem>>, vector<128x128xf32>
    tpu.vector_store %arg4[%c0_5, %c0_6], %6 {strides = array<i32>} : memref<128x128xf32, #tpu.memory_space<vmem>>, vector<128x128xf32>,
    return
  }
  func.func @transform_0(%arg0: i32) -> (i32, i32) {
    %c0_i32 = arith.constant 0 : i32
    %c0_i32_0 = arith.constant 0 : i32
    return %arg0, %c0_i32 : i32, i32
  }
  func.func @transform_1(%arg0: i32) -> (i32, i32) {
    %c0_i32 = arith.constant 0 : i32
    %c0_i32_0 = arith.constant 0 : i32
    %c0_i32_1 = arith.constant 0 : i32
    return %c0_i32, %c0_i32_0 : i32, i32
  }
  func.func @transform_2(%arg0: i32) -> (i32, i32) {
    %c0_i32 = arith.constant 0 : i32
    %c0_i32_0 = arith.constant 0 : i32
    %c0_i32_1 = arith.constant 0 : i32
    return %c0_i32, %c0_i32_0 : i32, i32
  }
  func.func @transform_3(%arg0: i32) -> (i32, i32) {
    %c0_i32 = arith.constant 0 : i32
    %c0_i32_0 = arith.constant 0 : i32
    return %arg0, %c0_i32 : i32, i32
  }
}

</mosaic_0001>

<bundles_post_ra>
// kernel: vqvae_forward.11
= control target key start
LH: loop header
LB: loop body
LE: loop exit
PB: predicated region body
PF: predicated region fallthrough
CT: control target
= control target key end

     0   :  { %s423_s0 = inlined_call_operand.vmem [shape: f32[16,2,8,256], index: 0, kind: input, shape index: {}]   ;;  %s424_s1 = inlined_call_operand.vmem [shape: f32[16,8,128], index: 1, kind: output, shape index: {}]  }
   0x1   :  { %v8_v0 = vld [vmem:[%s423_s0] sm:$0xff]  ;;  %v24_v1 = vld [vmem:[%s423_s0 + $0x8] sm:$0xff]  ;;  %v141_v2 = vld [vmem:[%s423_s0 + $0x10] sm:$0xff] }
   0x2   :  { %v157_v3 = vld [vmem:[%s423_s0 + $0x18] sm:$0xff]  ;;  %v73_v4 = vmax.f32 %v8_v0, %v24_v1  ;;  %v9_v5 = vld [vmem:[%s423_s0 + $0x20] sm:$0xff]  ;;  %v25_v6 = vld [vmem:[%s423_s0 + $0x28] sm:$0xff] }
   0x3   :  { %v89_v7 = vmax.f32 %v141_v2, %v157_v3  ;;  %v142_v8 = vld [vmem:[%s423_s0 + $0x30] sm:$0xff]  ;;  %v158_v9 = vld [vmem:[%s423_s0 + $0x38] sm:$0xff]  ;;  %v74_v10 = vmax.f32 %v9_v5, %v25_v6  ;;  %v10_v11 = vld [vmem:[%s423_s0 + $0x40] sm:$0xff] }
   0x4   :  { %v90_v12 = vmax.f32 %v142_v8, %v158_v9  ;;  %v26_v13 = vld [vmem:[%s423_s0 + $0x48] sm:$0xff]  ;;  %v143_v14 = vld [vmem:[%s423_s0 + $0x50] sm:$0xff]  ;;  %v159_v15 = vld [vmem:[%s423_s0 + $0x58] sm:$0xff] }
   0x5   :  { %v105_v16 = vmax.f32 %v73_v4, %v89_v7  ;;  %v75_v17 = vmax.f32 %v10_v11, %v26_v13  ;;  %v91_v18 = vmax.f32 %v143_v14, %v159_v15  ;;  %v11_v19 = vld [vmem:[%s423_s0 + $0x60] sm:$0xff]  ;;  %v27_v20 = vld [vmem:[%s423_s0 + $0x68] sm:$0xff]  ;;  %v144_v21 = vld [vmem:[%s423_s0 + $0x70] sm:$0xff] }
   0x6   :  { %v106_v22 = vmax.f32 %v74_v10, %v90_v12  ;;  %v160_v23 = vld [vmem:[%s423_s0 + $0x78] sm:$0xff]  ;;  %v76_v24 = vmax.f32 %v11_v19, %v27_v20  ;;  %v12_v25 = vld [vmem:[%s423_s0 + $0x80] sm:$0xff]  ;;  %v28_v26 = vld [vmem:[%s423_s0 + $0x88] sm:$0xff] }
   0x7   :  { %121 = vst [vmem:[%s424_s1] sm:$0xff] %v105_v16  ;;  %v107_v27 = vmax.f32 %v75_v17, %v91_v18  ;;  %v92_v28 = vmax.f32 %v144_v21, %v160_v23  ;;  %v145_v29 = vld [vmem:[%s423_s0 + $0x90] sm:$0xff]  ;;  %v161_v30 = vld [vmem:[%s423_s0 + $0x98] sm:$0xff]  ;;  %v77_v31 = vmax.f32 %v12_v25, %v28_v26  ;;  %v13_v32 = vld [vmem:[%s423_s0 + $0xa0] sm:$0xff] }
   0x8   :  { %122 = vst [vmem:[%s424_s1 + $0x8] sm:$0xff] %v106_v22  ;;  %v93_v33 = vmax.f32 %v145_v29, %v161_v30  ;;  %v29_v34 = vld [vmem:[%s423_s0 + $0xa8] sm:$0xff]  ;;  %v146_v35 = vld [vmem:[%s423_s0 + $0xb0] sm:$0xff]  ;;  %v162_v36 = vld [vmem:[%s423_s0 + $0xb8] sm:$0xff] }
   0x9   :  { %123 = vst [vmem:[%s424_s1 + $0x10] sm:$0xff] %v107_v27  ;;  %v108_v37 = vmax.f32 %v76_v24, %v92_v28  ;;  %v78_v38 = vmax.f32 %v13_v32, %v29_v34  ;;  %v94_v39 = vmax.f32 %v146_v35, %v162_v36  ;;  %v14_v40 = vld [vmem:[%s423_s0 + $0xc0] sm:$0xff]  ;;  %v30_v41 = vld [vmem:[%s423_s0 + $0xc8] sm:$0xff]  ;;  %v147_v42 = vld [vmem:[%s423_s0 + $0xd0] sm:$0xff] }
   0xa   :  { %v109_v43 = vmax.f32 %v77_v31, %v93_v33  ;;  %v163_v44 = vld [vmem:[%s423_s0 + $0xd8] sm:$0xff]  ;;  %v79_v45 = vmax.f32 %v14_v40, %v30_v41  ;;  %v15_v46 = vld [vmem:[%s423_s0 + $0xe0] sm:$0xff]  ;;  %v31_v47 = vld [vmem:[%s423_s0 + $0xe8] sm:$0xff] }
   0xb   :  { %124 = vst [vmem:[%s424_s1 + $0x18] sm:$0xff] %v108_v37  ;;  %v110_v48 = vmax.f32 %v78_v38, %v94_v39  ;;  %v95_v49 = vmax.f32 %v147_v42, %v163_v44  ;;  %v148_v50 = vld [vmem:[%s423_s0 + $0xf0] sm:$0xff]  ;;  %v164_v51 = vld [vmem:[%s423_s0 + $0xf8] sm:$0xff]  ;;  %v80_v52 = vmax.f32 %v15_v46, %v31_v47  ;;  %v16_v53 = vld [vmem:[%s423_s0 + $0x100] sm:$0xff] }
   0xc   :  { %125 = vst [vmem:[%s424_s1 + $0x20] sm:$0xff] %v109_v43  ;;  %v96_v54 = vmax.f32 %v148_v50, %v164_v51  ;;  %v32_v55 = vld [vmem:[%s423_s0 + $0x108] sm:$0xff]  ;;  %v149_v56 = vld [vmem:[%s423_s0 + $0x110] sm:$0xff]  ;;  %v165_v57 = vld [vmem:[%s423_s0 + $0x118] sm:$0xff] }
   0xd   :  { %126 = vst [vmem:[%s424_s1 + $0x28] sm:$0xff] %v110_v48  ;;  %v111_v58 = vmax.f32 %v79_v45, %v95_v49  ;;  %v81_v59 = vmax.f32 %v16_v53, %v32_v55  ;;  %v97_v60 = vmax.f32 %v149_v56, %v165_v57  ;;  %v17_v61 = vld [vmem:[%s423_s0 + $0x120] sm:$0xff]  ;;  %v33_v62 = vld [vmem:[%s423_s0 + $0x128] sm:$0xff]  ;;  %v150_v63 = vld [vmem:[%s423_s0 + $0x130] sm:$0xff] }
   0xe   :  { %v112_v0 = vmax.f32 %v80_v52, %v96_v54  ;;  %v166_v1 = vld [vmem:[%s423_s0 + $0x138] sm:$0xff]  ;;  %v82_v2 = vmax.f32 %v17_v61, %v33_v62  ;;  %v18_v3 = vld [vmem:[%s423_s0 + $0x140] sm:$0xff]  ;;  %v34_v4 = vld [vmem:[%s423_s0 + $0x148] sm:$0xff] }
   0xf   :  { %127 = vst [vmem:[%s424_s1 + $0x30] sm:$0xff] %v111_v58  ;;  %v113_v5 = vmax.f32 %v81_v59, %v97_v60  ;;  %v98_v6 = vmax.f32 %v150_v63, %v166_v1  ;;  %v151_v7 = vld [vmem:[%s423_s0 + $0x150] sm:$0xff]  ;;  %v167_v8 = vld [vmem:[%s423_s0 + $0x158] sm:$0xff]  ;;  %v83_v9 = vmax.f32 %v18_v3, %v34_v4  ;;  %v19_v10 = vld [vmem:[%s423_s0 + $0x160] sm:$0xff] }
  0x10   :  { %128 = vst [vmem:[%s424_s1 + $0x38] sm:$0xff] %v112_v0  ;;  %v99_v11 = vmax.f32 %v151_v7, %v167_v8  ;;  %v35_v12 = vld [vmem:[%s423_s0 + $0x168] sm:$0xff]  ;;  %v152_v13 = vld [vmem:[%s423_s0 + $0x170] sm:$0xff]  ;;  %v168_v14 = vld [vmem:[%s423_s0 + $0x178] sm:$0xff] }
  0x11   :  { %129 = vst [vmem:[%s424_s1 + $0x40] sm:$0xff] %v113_v5  ;;  %v114_v15 = vmax.f32 %v82_v2, %v98_v6  ;;  %v84_v16 = vmax.f32 %v19_v10, %v35_v12  ;;  %v100_v17 = vmax.f32 %v152_v13, %v168_v14  ;;  %v20_v18 = vld [vmem:[%s423_s0 + $0x180] sm:$0xff]  ;;  %v36_v19 = vld [vmem:[%s423_s0 + $0x188] sm:$0xff]  ;;  %v153_v20 = vld [vmem:[%s423_s0 + $0x190] sm:$0xff] }
  0x12   :  { %v115_v21 = vmax.f32 %v83_v9, %v99_v11  ;;  %v169_v22 = vld [vmem:[%s423_s0 + $0x198] sm:$0xff]  ;;  %v85_v23 = vmax.f32 %v20_v18, %v36_v19  ;;  %v21_v24 = vld [vmem:[%s423_s0 + $0x1a0] sm:$0xff]  ;;  %v37_v25 = vld [vmem:[%s423_s0 + $0x1a8] sm:$0xff] }
  0x13   :  { %130 = vst [vmem:[%s424_s1 + $0x48] sm:$0xff] %v114_v15  ;;  %v116_v26 = vmax.f32 %v84_v16, %v100_v17  ;;  %v101_v27 = vmax.f32 %v153_v20, %v169_v22  ;;  %v154_v28 = vld [vmem:[%s423_s0 + $0x1b0] sm:$0xff]  ;;  %v170_v29 = vld [vmem:[%s423_s0 + $0x1b8] sm:$0xff]  ;;  %v86_v30 = vmax.f32 %v21_v24, %v37_v25  ;;  %v22_v31 = vld [vmem:[%s423_s0 + $0x1c0] sm:$0xff] }
  0x14   :  { %131 = vst [vmem:[%s424_s1 + $0x50] sm:$0xff] %v115_v21  ;;  %v102_v32 = vmax.f32 %v154_v28, %v170_v29  ;;  %v38_v33 = vld [vmem:[%s423_s0 + $0x1c8] sm:$0xff]  ;;  %v155_v34 = vld [vmem:[%s423_s0 + $0x1d0] sm:$0xff]  ;;  %v171_v35 = vld [vmem:[%s423_s0 + $0x1d8] sm:$0xff] }
  0x15   :  { %132 = vst [vmem:[%s424_s1 + $0x58] sm:$0xff] %v116_v26  ;;  %v117_v36 = vmax.f32 %v85_v23, %v101_v27  ;;  %v87_v37 = vmax.f32 %v22_v31, %v38_v33  ;;  %v103_v38 = vmax.f32 %v155_v34, %v171_v35  ;;  %v23_v39 = vld [vmem:[%s423_s0 + $0x1e0] sm:$0xff]  ;;  %v39_v40 = vld [vmem:[%s423_s0 + $0x1e8] sm:$0xff]  ;;  %v156_v41 = vld [vmem:[%s423_s0 + $0x1f0] sm:$0xff] }
  0x16   :  { %v118_v42 = vmax.f32 %v86_v30, %v102_v32  ;;  %v172_v43 = vld [vmem:[%s423_s0 + $0x1f8] sm:$0xff]  ;;  %v88_v44 = vmax.f32 %v23_v39, %v39_v40 }
  0x17   :  { %133 = vst [vmem:[%s424_s1 + $0x60] sm:$0xff] %v117_v36  ;;  %v119_v45 = vmax.f32 %v87_v37, %v103_v38  ;;  %v104_v46 = vmax.f32 %v156_v41, %v172_v43 }
  0x18   :  { %134 = vst [vmem:[%s424_s1 + $0x68] sm:$0xff] %v118_v42 }
  0x19   :  { %135 = vst [vmem:[%s424_s1 + $0x70] sm:$0xff] %v119_v45  ;;  %v120_v47 = vmax.f32 %v88_v44, %v104_v46 }
  0x1b   :  { %136 = vst [vmem:[%s424_s1 + $0x78] sm:$0xff] %v120_v47 }

// kernel: vqvae_forward.10
= control target key start
LH: loop header
LB: loop body
LE: loop exit
PB: predicated region body
PF: predicated region fallthrough
CT: control target
= control target key end

     0   :  { %s806_s12 = smov 0   ;;  %s938_s0 = inlined_call_operand.vmem [shape: bf16[512,27], index: 0, kind: input, shape index: {}]   ;;  %s939_s1 = inlined_call_operand.vmem [shape: bf16[27,128], index: 1, kind: input, shape index: {}]   ;;  %s940_s2 = inlined_call_operand.vmem [shape: f32[1,128], index: 2, kind: input, shape index: {}]   ;;  %s941_s3 = inlined_call_operand.vmem [shape: f32[512,128], index: 3, kind: output, shape index: {}]  }
   0x1 LB: > { %s646_s13 = sadd.s32 4294967295, %s783_s12   ;;  %p650_p0 = scmp.ge.s32.totalorder %s783_s12, 1  ;;  %s783_s12 = sphi %s806_s12, %s13_s12  }
   0x2   : > { %p138_p1 = scmp.lt.s32.totalorder %s783_s12, 3 }
   0x4   : > { %p139_p2 = pnand %p650_p0, %p138_p1 }
   0x5   : > { %v759_v0 = vld [vmem:[%s939_s1] sm:$0xff] (!%p139_p2)   ;;  %vm358_vm0 = vcmask (!%p139_p2), 1044480   ;;  %v760_v1 = vld [vmem:[%s939_s1 + $0x8] sm:$0x3f] (!%p139_p2)   ;;  %vm359_vm1 = vcmask (!%p139_p2), 1045504   ;;  %s651_s18 = sshll.u32 (!%p139_p2), %s646_s13, 5 }
   0x6   : > { %142 = sbr.rel (%p139_p2) target bundleno = 263 (0x107), region = 32  ;;  %710 = vmatprep.subr.bf16.mxu0 (!%p139_p2), %v759_v0  ;;  %746 = vmatprep.subr.bf16.mxu1 (!%p139_p2), %v759_v0  ;;  %v785_v2 = vmov (!%p139_p2), 65535   ;;  %p163_p3 = scmp.lt.s32.totalorder (!%p139_p2), %s651_s18, 63  ;;  %vm309_vm2 = vcmask (!%p139_p2), 220160   ;;  %v863_v22 = vld [vmem:[%s940_s2] ss:$0 sm:$0xff] (!%p139_p2) }
   0x7   : > { %711 = vmatpush3.bf16.msra.mxu0 (!%p139_p2), %v759_v0  ;;  %748 = vmatpush3.bf16.msra.mxu1 (!%p139_p2), %v759_v0  ;;  %v360_v3 = vsel (!%p139_p2), %vm358_vm0, 4294967295, %v785_v2 }
   0x8   : > { %v361_v4 = vsel (!%p139_p2), %vm359_vm1, %v360_v3, 0 }
   0x9   : > { %v363_v5 = vand.u32 (!%p139_p2), %v760_v1, %v361_v4 }
   0xb   : > { %712 = vmatprep.subr.bf16.mxu0 (!%p139_p2), %v363_v5  ;;  %747 = vmatprep.subr.bf16.mxu1 (!%p139_p2), %v363_v5 }
   0xc   : > { %713 = vmatpush3.bf16.msra.mxu0 (!%p139_p2), %v363_v5  ;;  %749 = vmatpush3.bf16.msra.mxu1 (!%p139_p2), %v363_v5 }
   0xd   : > { %s943_s18 = smov (!%p163_p3, %s651_s18), 63 }
   0xe   : > { %s652_s19 = sshll.u32 %s943_s18, 2  ;;  %s654_s25 = sshll.u32 %s943_s18, 3 }
   0xf   : > { %s826_s22 = scalar_lea.vmem %s938_s0, %s652_s19  ;;  %s870_s28 = scalar_lea.vmem %s941_s3, %s654_s25 }
  0x10   : > { %v761_v6 = vld [vmem:[%s826_s22] sm:$0xff]   ;;  %v763_v8 = vld [vmem:[%s826_s22 + $0x8] sm:$0xff]   ;;  %v765_v10 = vld [vmem:[%s826_s22 + $0x10] sm:$0xff]  }
  0x11   : > { %v762_v7 = vld [vmem:[%s826_s22 + $0x40] sm:$0xff]   ;;  %714 = vmatprep.mubr.msk.bf16.mxu0 %vm309_vm2, %v761_v6  ;;  %v764_v9 = vld [vmem:[%s826_s22 + $0x48] sm:$0xff]   ;;  %v766_v11 = vld [vmem:[%s826_s22 + $0x50] sm:$0xff]  }
  0x12   : > { %730 = vmatprep.mubr.msk.bf16.mxu1 %vm309_vm2, %v762_v7  ;;  %715 = vmatmul.mubr.msk.bf16.vlgmr.msra.gmra.mrb[0].mxu0 %vm309_vm2, %v763_v8  ;;  %v767_v12 = vld [vmem:[%s826_s22 + $0x18] sm:$0xff]   ;;  %v769_v14 = vld [vmem:[%s826_s22 + $0x20] sm:$0xff]   ;;  %v771_v16 = vld [vmem:[%s826_s22 + $0x28] sm:$0xff]  }
  0x13   : > { %731 = vmatmul.mubr.msk.bf16.vlgmr.msra.gmra.mrb[0].mxu1 %vm309_vm2, %v764_v9  ;;  %718 = vmatprep.mubr.msk.bf16.mxu0 %vm309_vm2, %v765_v10  ;;  %v768_v13 = vld [vmem:[%s826_s22 + $0x58] sm:$0xff]   ;;  %v770_v15 = vld [vmem:[%s826_s22 + $0x60] sm:$0xff]   ;;  %v772_v17 = vld [vmem:[%s826_s22 + $0x68] sm:$0xff]  }
  0x14   : > { %734 = vmatprep.mubr.msk.bf16.mxu1 %vm309_vm2, %v766_v11  ;;  %v773_v18 = vld [vmem:[%s826_s22 + $0x30] sm:$0xff]   ;;  %v775_v20 = vld [vmem:[%s826_s22 + $0x38] sm:$0xff]  }
  0x15   : > { %v774_v19 = vld [vmem:[%s826_s22 + $0x70] sm:$0xff]   ;;  %v776_v21 = vld [vmem:[%s826_s22 + $0x78] sm:$0xff]  }
  0x1a   : > { %719 = vmatmul.mubr.msk.bf16.gmra.mrb[4].mxu0 %vm309_vm2, %v767_v12 }
  0x1b   : > { %735 = vmatmul.mubr.msk.bf16.gmra.mrb[4].mxu1 %vm309_vm2, %v768_v13  ;;  %722 = vmatprep.mubr.msk.bf16.mxu0 %vm309_vm2, %v769_v14 }
  0x1c   : > { %738 = vmatprep.mubr.msk.bf16.mxu1 %vm309_vm2, %v770_v15 }
  0x22   : > { %723 = vmatmul.mubr.msk.bf16.gmra.mrb[8].mxu0 %vm309_vm2, %v771_v16 }
  0x23   : > { %739 = vmatmul.mubr.msk.bf16.gmra.mrb[8].mxu1 %vm309_vm2, %v772_v17  ;;  %726 = vmatprep.mubr.msk.bf16.mxu0 %vm309_vm2, %v773_v18 }
  0x24   : > { %742 = vmatprep.mubr.msk.bf16.mxu1 %vm309_vm2, %v774_v19 }
  0x2a   : > { %727 = vmatmul.mubr.msk.bf16.gmra.mrb[12].mxu0 %vm309_vm2, %v775_v20 }
  0x2b   : > { %743 = vmatmul.mubr.msk.bf16.gmra.mrb[12].mxu1 %vm309_vm2, %v776_v21 }
  0xe5   : > { %v716_v23 = vpop.f32.mrb[0].mxu0 }
  0xe6   : > { %v408_v24 = vadd.f32 %v716_v23, %v863_v22  ;;  %v732_v25 = vpop.f32.mrb[0].mxu1  ;;  %v399_v26 = vpop.f32.mrb[1].mxu0 }
  0xe7   : > { %v472_v27 = vadd.f32 %v732_v25, %v863_v22  ;;  %v400_v28 = vadd.f32 %v863_v22, %v399_v26  ;;  %v463_v29 = vpop.f32.mrb[1].mxu1  ;;  %v717_v30 = vpop.f32.mrb[2].mxu0 }
  0xe8   : > { %v528_v31 = vmax.f32 %v408_v24, 0.0  ;;  %v464_v32 = vadd.f32 %v863_v22, %v463_v29  ;;  %v411_v33 = vadd.f32 %v717_v30, %v863_v22  ;;  %v733_v34 = vpop.f32.mrb[2].mxu1  ;;  %v402_v35 = vpop.f32.mrb[3].mxu0 }
  0xe9   : > { %v544_v36 = vmax.f32 %v472_v27, 0.0  ;;  %v526_v37 = vmax.f32 %v400_v28, 0.0  ;;  %v475_v38 = vadd.f32 %v733_v34, %v863_v22  ;;  %v403_v39 = vadd.f32 %v863_v22, %v402_v35  ;;  %v466_v40 = vpop.f32.mrb[3].mxu1 }
  0xea   : > { %560 = vst [vmem:[%s870_s28 + $0x10] sm:$0xff] %v528_v31  ;;  %v542_v41 = vmax.f32 %v464_v32, 0.0  ;;  %v529_v42 = vmax.f32 %v411_v33, 0.0  ;;  %v467_v43 = vadd.f32 %v863_v22, %v466_v40 }
  0xeb   : > { %576 = vst [vmem:[%s870_s28 + $0x90] sm:$0xff] %v544_v36  ;;  %558 = vst [vmem:[%s870_s28] sm:$0xff] %v526_v37  ;;  %v545_v44 = vmax.f32 %v475_v38, 0.0  ;;  %v527_v45 = vmax.f32 %v403_v39, 0.0 }
  0xec   : > { %574 = vst [vmem:[%s870_s28 + $0x80] sm:$0xff] %v542_v41  ;;  %561 = vst [vmem:[%s870_s28 + $0x18] sm:$0xff] %v529_v42  ;;  %v543_v46 = vmax.f32 %v467_v43, 0.0 }
  0xed   : > { %577 = vst [vmem:[%s870_s28 + $0x98] sm:$0xff] %v545_v44  ;;  %559 = vst [vmem:[%s870_s28 + $0x8] sm:$0xff] %v527_v45  ;;  %v720_v47 = vpop.f32.mrb[4].mxu0 }
  0xee   : > { %575 = vst [vmem:[%s870_s28 + $0x88] sm:$0xff] %v543_v46  ;;  %v424_v48 = vadd.f32 %v720_v47, %v863_v22  ;;  %v736_v49 = vpop.f32.mrb[4].mxu1  ;;  %v415_v50 = vpop.f32.mrb[5].mxu0 }
  0xef   : > { %v488_v51 = vadd.f32 %v736_v49, %v863_v22  ;;  %v416_v52 = vadd.f32 %v863_v22, %v415_v50  ;;  %v479_v53 = vpop.f32.mrb[5].mxu1  ;;  %v721_v54 = vpop.f32.mrb[6].mxu0 }
  0xf0   : > { %v532_v55 = vmax.f32 %v424_v48, 0.0  ;;  %v480_v56 = vadd.f32 %v863_v22, %v479_v53  ;;  %v427_v57 = vadd.f32 %v721_v54, %v863_v22  ;;  %v737_v58 = vpop.f32.mrb[6].mxu1  ;;  %v418_v59 = vpop.f32.mrb[7].mxu0 }
  0xf1   : > { %v548_v60 = vmax.f32 %v488_v51, 0.0  ;;  %v530_v61 = vmax.f32 %v416_v52, 0.0  ;;  %v491_v62 = vadd.f32 %v737_v58, %v863_v22  ;;  %v419_v63 = vadd.f32 %v863_v22, %v418_v59  ;;  %v482_v0 = vpop.f32.mrb[7].mxu1 }
  0xf2   : > { %564 = vst [vmem:[%s870_s28 + $0x30] sm:$0xff] %v532_v55  ;;  %v546_v1 = vmax.f32 %v480_v56, 0.0  ;;  %v533_v2 = vmax.f32 %v427_v57, 0.0  ;;  %v483_v3 = vadd.f32 %v863_v22, %v482_v0 }
  0xf3   : > { %580 = vst [vmem:[%s870_s28 + $0xb0] sm:$0xff] %v548_v60  ;;  %562 = vst [vmem:[%s870_s28 + $0x20] sm:$0xff] %v530_v61  ;;  %v549_v4 = vmax.f32 %v491_v62, 0.0  ;;  %v531_v5 = vmax.f32 %v419_v63, 0.0 }
  0xf4   : > { %578 = vst [vmem:[%s870_s28 + $0xa0] sm:$0xff] %v546_v1  ;;  %565 = vst [vmem:[%s870_s28 + $0x38] sm:$0xff] %v533_v2  ;;  %v547_v6 = vmax.f32 %v483_v3, 0.0 }
  0xf5   : > { %581 = vst [vmem:[%s870_s28 + $0xb8] sm:$0xff] %v549_v4  ;;  %563 = vst [vmem:[%s870_s28 + $0x28] sm:$0xff] %v531_v5  ;;  %v724_v7 = vpop.f32.mrb[8].mxu0 }
  0xf6   : > { %579 = vst [vmem:[%s870_s28 + $0xa8] sm:$0xff] %v547_v6  ;;  %v440_v8 = vadd.f32 %v724_v7, %v863_v22  ;;  %v740_v9 = vpop.f32.mrb[8].mxu1  ;;  %v431_v10 = vpop.f32.mrb[9].mxu0 }
  0xf7   : > { %v504_v11 = vadd.f32 %v740_v9, %v863_v22  ;;  %v432_v12 = vadd.f32 %v863_v22, %v431_v10  ;;  %v495_v13 = vpop.f32.mrb[9].mxu1  ;;  %v725_v14 = vpop.f32.mrb[10].mxu0 }
  0xf8   : > { %v536_v15 = vmax.f32 %v440_v8, 0.0  ;;  %v496_v16 = vadd.f32 %v863_v22, %v495_v13  ;;  %v443_v17 = vadd.f32 %v725_v14, %v863_v22  ;;  %v741_v18 = vpop.f32.mrb[10].mxu1  ;;  %v434_v19 = vpop.f32.mrb[11].mxu0 }
  0xf9   : > { %v552_v20 = vmax.f32 %v504_v11, 0.0  ;;  %v534_v21 = vmax.f32 %v432_v12, 0.0  ;;  %v507_v23 = vadd.f32 %v741_v18, %v863_v22  ;;  %v435_v24 = vadd.f32 %v863_v22, %v434_v19  ;;  %v498_v25 = vpop.f32.mrb[11].mxu1 }
  0xfa   : > { %568 = vst [vmem:[%s870_s28 + $0x50] sm:$0xff] %v536_v15  ;;  %v550_v26 = vmax.f32 %v496_v16, 0.0  ;;  %v537_v27 = vmax.f32 %v443_v17, 0.0  ;;  %v499_v28 = vadd.f32 %v863_v22, %v498_v25 }
  0xfb   : > { %584 = vst [vmem:[%s870_s28 + $0xd0] sm:$0xff] %v552_v20  ;;  %566 = vst [vmem:[%s870_s28 + $0x40] sm:$0xff] %v534_v21  ;;  %v553_v29 = vmax.f32 %v507_v23, 0.0  ;;  %v535_v30 = vmax.f32 %v435_v24, 0.0 }
  0xfc   : > { %582 = vst [vmem:[%s870_s28 + $0xc0] sm:$0xff] %v550_v26  ;;  %569 = vst [vmem:[%s870_s28 + $0x58] sm:$0xff] %v537_v27  ;;  %v551_v31 = vmax.f32 %v499_v28, 0.0 }
  0xfd   : > { %585 = vst [vmem:[%s870_s28 + $0xd8] sm:$0xff] %v553_v29  ;;  %567 = vst [vmem:[%s870_s28 + $0x48] sm:$0xff] %v535_v30  ;;  %v728_v32 = vpop.f32.mrb[12].mxu0 }
  0xfe   : > { %583 = vst [vmem:[%s870_s28 + $0xc8] sm:$0xff] %v551_v31  ;;  %v456_v33 = vadd.f32 %v728_v32, %v863_v22  ;;  %v744_v34 = vpop.f32.mrb[12].mxu1  ;;  %v447_v35 = vpop.f32.mrb[13].mxu0 }
  0xff   : > { %v520_v36 = vadd.f32 %v744_v34, %v863_v22  ;;  %v448_v37 = vadd.f32 %v863_v22, %v447_v35  ;;  %v511_v38 = vpop.f32.mrb[13].mxu1  ;;  %v729_v39 = vpop.f32.mrb[14].mxu0 }
 0x100   : > { %v540_v40 = vmax.f32 %v456_v33, 0.0  ;;  %v512_v41 = vadd.f32 %v863_v22, %v511_v38  ;;  %v459_v42 = vadd.f32 %v729_v39, %v863_v22  ;;  %v745_v43 = vpop.f32.mrb[14].mxu1  ;;  %v450_v44 = vpop.f32.mrb[15].mxu0 }
 0x101   : > { %v556_v45 = vmax.f32 %v520_v36, 0.0  ;;  %v538_v46 = vmax.f32 %v448_v37, 0.0  ;;  %v523_v47 = vadd.f32 %v745_v43, %v863_v22  ;;  %v451_v48 = vadd.f32 %v863_v22, %v450_v44  ;;  %v514_v49 = vpop.f32.mrb[15].mxu1 }
 0x102   : > { %572 = vst [vmem:[%s870_s28 + $0x70] sm:$0xff] %v540_v40  ;;  %v554_v50 = vmax.f32 %v512_v41, 0.0  ;;  %v541_v51 = vmax.f32 %v459_v42, 0.0  ;;  %v515_v52 = vadd.f32 %v863_v22, %v514_v49 }
 0x103   : > { %588 = vst [vmem:[%s870_s28 + $0xf0] sm:$0xff] %v556_v45  ;;  %570 = vst [vmem:[%s870_s28 + $0x60] sm:$0xff] %v538_v46  ;;  %v557_v53 = vmax.f32 %v523_v47, 0.0  ;;  %v539_v54 = vmax.f32 %v451_v48, 0.0 }
 0x104   : > { %586 = vst [vmem:[%s870_s28 + $0xe0] sm:$0xff] %v554_v50  ;;  %573 = vst [vmem:[%s870_s28 + $0x78] sm:$0xff] %v541_v51  ;;  %v555_v55 = vmax.f32 %v515_v52, 0.0 }
 0x105   : > { %589 = vst [vmem:[%s870_s28 + $0xf8] sm:$0xff] %v557_v53  ;;  %571 = vst [vmem:[%s870_s28 + $0x68] sm:$0xff] %v539_v54 }
 0x106   : > { %587 = vst [vmem:[%s870_s28 + $0xe8] sm:$0xff] %v555_v55 }
 0x107 PF: > { %s13_s12 = sadd.s32 1, %s783_s12  }
 0x108   : > { %p10_p4 = scmp.ge.s32.totalorder %s13_s12, 4  }
 0x10a   :  { %12 = sbr.rel (!%p10_p4) target bundleno = 1 (0x1), region = 62 }

// kernel: vqvae_forward.13
= control target key start
LH: loop header
LB: loop body
LE: loop exit
PB: predicated region body
PF: predicated region fallthrough
CT: control target
= control target key end

     0   :  { %s223_s0 = inlined_call_operand.vmem [shape: f32[8,2,4,256], index: 0, kind: input, shape index: {}]   ;;  %s224_s1 = inlined_call_operand.vmem [shape: f32[8,4,128], index: 1, kind: output, shape index: {}]  }
   0x1   :  { %v8_v0 = vld [vmem:[%s223_s0] sm:$0xf]  ;;  %v16_v1 = vld [vmem:[%s223_s0 + $0x4] sm:$0xf]  ;;  %v77_v2 = vld [vmem:[%s223_s0 + $0x8] sm:$0xf] }
   0x2   :  { %v85_v3 = vld [vmem:[%s223_s0 + $0xc] sm:$0xf]  ;;  %v41_v4 = vmax.f32 %v8_v0, %v16_v1  ;;  %v9_v5 = vld [vmem:[%s223_s0 + $0x10] sm:$0xf]  ;;  %v17_v6 = vld [vmem:[%s223_s0 + $0x14] sm:$0xf] }
   0x3   :  { %v49_v7 = vmax.f32 %v77_v2, %v85_v3  ;;  %v78_v8 = vld [vmem:[%s223_s0 + $0x18] sm:$0xf]  ;;  %v86_v9 = vld [vmem:[%s223_s0 + $0x1c] sm:$0xf]  ;;  %v42_v10 = vmax.f32 %v9_v5, %v17_v6  ;;  %v10_v11 = vld [vmem:[%s223_s0 + $0x20] sm:$0xf] }
   0x4   :  { %v50_v12 = vmax.f32 %v78_v8, %v86_v9  ;;  %v18_v13 = vld [vmem:[%s223_s0 + $0x24] sm:$0xf]  ;;  %v79_v14 = vld [vmem:[%s223_s0 + $0x28] sm:$0xf]  ;;  %v87_v15 = vld [vmem:[%s223_s0 + $0x2c] sm:$0xf] }
   0x5   :  { %v57_v16 = vmax.f32 %v41_v4, %v49_v7  ;;  %v43_v17 = vmax.f32 %v10_v11, %v18_v13  ;;  %v51_v18 = vmax.f32 %v79_v14, %v87_v15  ;;  %v11_v19 = vld [vmem:[%s223_s0 + $0x30] sm:$0xf]  ;;  %v19_v20 = vld [vmem:[%s223_s0 + $0x34] sm:$0xf]  ;;  %v80_v21 = vld [vmem:[%s223_s0 + $0x38] sm:$0xf] }
   0x6   :  { %v58_v22 = vmax.f32 %v42_v10, %v50_v12  ;;  %v88_v23 = vld [vmem:[%s223_s0 + $0x3c] sm:$0xf]  ;;  %v44_v24 = vmax.f32 %v11_v19, %v19_v20  ;;  %v12_v25 = vld [vmem:[%s223_s0 + $0x40] sm:$0xf]  ;;  %v20_v26 = vld [vmem:[%s223_s0 + $0x44] sm:$0xf] }
   0x7   :  { %65 = vst [vmem:[%s224_s1] sm:$0xf] %v57_v16  ;;  %v59_v27 = vmax.f32 %v43_v17, %v51_v18  ;;  %v52_v28 = vmax.f32 %v80_v21, %v88_v23  ;;  %v81_v29 = vld [vmem:[%s223_s0 + $0x48] sm:$0xf]  ;;  %v89_v30 = vld [vmem:[%s223_s0 + $0x4c] sm:$0xf]  ;;  %v45_v31 = vmax.f32 %v12_v25, %v20_v26 }
   0x8   :  { %v13_v32 = vld [vmem:[%s223_s0 + $0x50] sm:$0xf]  ;;  %66 = vst [vmem:[%s224_s1 + $0x4] sm:$0xf] %v58_v22  ;;  %v53_v33 = vmax.f32 %v81_v29, %v89_v30  ;;  %v21_v34 = vld [vmem:[%s223_s0 + $0x54] sm:$0xf] }
   0x9   :  { %v82_v35 = vld [vmem:[%s223_s0 + $0x58] sm:$0xf]  ;;  %v90_v36 = vld [vmem:[%s223_s0 + $0x5c] sm:$0xf]  ;;  %67 = vst [vmem:[%s224_s1 + $0x8] sm:$0xf] %v59_v27  ;;  %v60_v37 = vmax.f32 %v44_v24, %v52_v28  ;;  %v46_v38 = vmax.f32 %v13_v32, %v21_v34 }
   0xa   :  { %v54_v39 = vmax.f32 %v82_v35, %v90_v36  ;;  %v14_v40 = vld [vmem:[%s223_s0 + $0x60] sm:$0xf]  ;;  %v22_v41 = vld [vmem:[%s223_s0 + $0x64] sm:$0xf]  ;;  %v83_v42 = vld [vmem:[%s223_s0 + $0x68] sm:$0xf]  ;;  %v61_v43 = vmax.f32 %v45_v31, %v53_v33 }
   0xb   :  { %v91_v44 = vld [vmem:[%s223_s0 + $0x6c] sm:$0xf]  ;;  %v47_v45 = vmax.f32 %v14_v40, %v22_v41  ;;  %v15_v46 = vld [vmem:[%s223_s0 + $0x70] sm:$0xf]  ;;  %v23_v47 = vld [vmem:[%s223_s0 + $0x74] sm:$0xf] }
   0xc   :  { %68 = vst [vmem:[%s224_s1 + $0xc] sm:$0xf] %v60_v37  ;;  %v62_v48 = vmax.f32 %v46_v38, %v54_v39  ;;  %v55_v49 = vmax.f32 %v83_v42, %v91_v44  ;;  %v84_v50 = vld [vmem:[%s223_s0 + $0x78] sm:$0xf]  ;;  %v92_v51 = vld [vmem:[%s223_s0 + $0x7c] sm:$0xf]  ;;  %v48_v52 = vmax.f32 %v15_v46, %v23_v47 }
   0xd   :  { %69 = vst [vmem:[%s224_s1 + $0x10] sm:$0xf] %v61_v43  ;;  %v56_v53 = vmax.f32 %v84_v50, %v92_v51 }
   0xe   :  { %70 = vst [vmem:[%s224_s1 + $0x14] sm:$0xf] %v62_v48  ;;  %v63_v54 = vmax.f32 %v47_v45, %v55_v49 }
   0xf   :  { %v64_v55 = vmax.f32 %v48_v52, %v56_v53 }
  0x10   :  { %71 = vst [vmem:[%s224_s1 + $0x18] sm:$0xf] %v63_v54 }
  0x11   :  { %72 = vst [vmem:[%s224_s1 + $0x1c] sm:$0xf] %v64_v55 }

// kernel: vqvae_forward.12
= control target key start
LH: loop header
LB: loop body
LE: loop exit
PB: predicated region body
PF: predicated region fallthrough
CT: control target
= control target key end

     0   :  { %s2807_s1 = inlined_call_operand.vmem [shape: bf16[1152,128], index: 1, kind: input, shape index: {}]   ;;  %s2808_s0 = inlined_call_operand.vmem [shape: bf16[128,1152], index: 0, kind: input, shape index: {}]   ;;  %s2809_s2 = inlined_call_operand.vmem [shape: f32[1,128], index: 2, kind: input, shape index: {}]   ;;  %s2810_s3 = inlined_call_operand.vmem [shape: f32[128,128], index: 3, kind: output, shape index: {}]  }
   0x1   :  { %v2032_v0 = vld [vmem:[%s2807_s1 + $0x40] sm:$0xff]   ;;  %v2036_v4 = vld [vmem:[%s2807_s1 + $0x48] sm:$0xff]   ;;  %v2040_v8 = vld [vmem:[%s2807_s1 + $0x50] sm:$0xff]  }
   0x2   :  { %v2033_v1 = vld [vmem:[%s2807_s1 + $0xc0] sm:$0xff]   ;;  %1712 = vmatprep.subr.bf16.mxu0 %v2032_v0  ;;  %v2037_v5 = vld [vmem:[%s2807_s1 + $0xc8] sm:$0xff]   ;;  %v2041_v9 = vld [vmem:[%s2807_s1 + $0xd0] sm:$0xff]  }
   0x3   :  { %v2034_v2 = vld [vmem:[%s2807_s1] sm:$0xff]   ;;  %1776 = vmatprep.subr.bf16.mxu1 %v2033_v1  ;;  %v2038_v6 = vld [vmem:[%s2807_s1 + $0x8] sm:$0xff]   ;;  %v2042_v10 = vld [vmem:[%s2807_s1 + $0x10] sm:$0xff]  }
   0x4   :  { %v2035_v3 = vld [vmem:[%s2807_s1 + $0x80] sm:$0xff]   ;;  %1713 = vmatpush3.bf16.msra.mxu0 %v2034_v2  ;;  %v2039_v7 = vld [vmem:[%s2807_s1 + $0x88] sm:$0xff]   ;;  %v2043_v11 = vld [vmem:[%s2807_s1 + $0x90] sm:$0xff]  }
   0x5   :  { %1777 = vmatpush3.bf16.msra.mxu1 %v2035_v3  ;;  %1714 = vmatprep.subr.bf16.mxu0 %v2036_v4  ;;  %v2044_v12 = vld [vmem:[%s2807_s1 + $0x58] sm:$0xff]   ;;  %v2048_v16 = vld [vmem:[%s2807_s1 + $0x60] sm:$0xff]   ;;  %v2052_v20 = vld [vmem:[%s2807_s1 + $0x68] sm:$0xff]  }
   0x6   :  { %1778 = vmatprep.subr.bf16.mxu1 %v2037_v5  ;;  %v2045_v13 = vld [vmem:[%s2807_s1 + $0xd8] sm:$0xff]   ;;  %v2049_v17 = vld [vmem:[%s2807_s1 + $0xe0] sm:$0xff]   ;;  %v2053_v21 = vld [vmem:[%s2807_s1 + $0xe8] sm:$0xff]  }
   0x7   :  { %v2046_v14 = vld [vmem:[%s2807_s1 + $0x18] sm:$0xff]   ;;  %v2050_v18 = vld [vmem:[%s2807_s1 + $0x20] sm:$0xff]   ;;  %v2054_v22 = vld [vmem:[%s2807_s1 + $0x28] sm:$0xff]  }
   0x8   :  { %1715 = vmatpush3.bf16.msra.mxu0 %v2038_v6  ;;  %v2047_v15 = vld [vmem:[%s2807_s1 + $0x98] sm:$0xff]   ;;  %v2051_v19 = vld [vmem:[%s2807_s1 + $0xa0] sm:$0xff]   ;;  %v2055_v23 = vld [vmem:[%s2807_s1 + $0xa8] sm:$0xff]  }
   0x9   :  { %1779 = vmatpush3.bf16.msra.mxu1 %v2039_v7  ;;  %1716 = vmatprep.subr.bf16.mxu0 %v2040_v8  ;;  %v2056_v24 = vld [vmem:[%s2807_s1 + $0x70] sm:$0xff]   ;;  %v2060_v28 = vld [vmem:[%s2807_s1 + $0x78] sm:$0xff]   ;;  %v2064_v32 = vld [vmem:[%s2808_s0] ss:$36 sps:$4 sm:$0xff]  }
   0xa   :  { %1780 = vmatprep.subr.bf16.mxu1 %v2041_v9  ;;  %v2057_v25 = vld [vmem:[%s2807_s1 + $0xf0] sm:$0xff]   ;;  %v2061_v29 = vld [vmem:[%s2807_s1 + $0xf8] sm:$0xff]   ;;  %v2066_v33 = vld [vmem:[%s2808_s0 + $0x4] ss:$36 sps:$4 sm:$0xff]  }
   0xb   :  { %v2058_v26 = vld [vmem:[%s2807_s1 + $0x30] sm:$0xff]   ;;  %v2062_v30 = vld [vmem:[%s2807_s1 + $0x38] sm:$0xff]   ;;  %v2067_v34 = vld [vmem:[%s2808_s0 + $0x8] ss:$36 sps:$4 sm:$0xff]   ;;  %1078 = vmatprep.mubr.bf16.mxu0 %v2066_v33 }
   0xc   :  { %1717 = vmatpush3.bf16.msra.mxu0 %v2042_v10  ;;  %v2059_v27 = vld [vmem:[%s2807_s1 + $0xb0] sm:$0xff]   ;;  %v2063_v31 = vld [vmem:[%s2807_s1 + $0xb8] sm:$0xff]   ;;  %v2070_v36 = vld [vmem:[%s2807_s1 + $0x140] sm:$0xff]  }
   0xd   :  { %1781 = vmatpush3.bf16.msra.mxu1 %v2043_v11  ;;  %1718 = vmatprep.subr.bf16.mxu0 %v2044_v12  ;;  %v2069_v35 = vld [vmem:[%s2808_s0 + $0xc] ss:$36 sps:$4 sm:$0xff]   ;;  %v2071_v37 = vld [vmem:[%s2807_s1 + $0x1c0] sm:$0xff]   ;;  %v2076_v41 = vld [vmem:[%s2808_s0 + $0x54] ss:$36 sps:$4 sm:$0xff]  }
   0xe   :  { %1782 = vmatprep.subr.bf16.mxu1 %v2045_v13  ;;  %1175 = vmatprep.mubr.bf16.mxu1 %v2069_v35  ;;  %v2072_v38 = vld [vmem:[%s2807_s1 + $0x100] sm:$0xff]   ;;  %v2074_v40 = vld [vmem:[%s2808_s0 + $0x4c] ss:$36 sps:$4 sm:$0xff]   ;;  %v2084_v48 = vld [vmem:[%s2808_s0 + $0x94] ss:$36 sps:$4 sm:$0xff]  }
   0xf   :  { %v2073_v39 = vld [vmem:[%s2807_s1 + $0x180] sm:$0xff]   ;;  %v2078_v42 = vld [vmem:[%s2808_s0 + $0x48] ss:$36 sps:$4 sm:$0xff]   ;;  %v2079_v43 = vld [vmem:[%s2808_s0 + $0x50] ss:$36 sps:$4 sm:$0xff]  }
  0x10   :  { %1719 = vmatpush3.bf16.msra.mxu0 %v2046_v14  ;;  %v2080_v44 = vld [vmem:[%s2807_s1 + $0x148] sm:$0xff]   ;;  %v2086_v49 = vld [vmem:[%s2808_s0 + $0x9c] ss:$36 sps:$4 sm:$0xff]   ;;  %v2088_v50 = vld [vmem:[%s2808_s0 + $0x90] ss:$36 sps:$4 sm:$0xff]  }
  0x11   :  { %1783 = vmatpush3.bf16.msra.mxu1 %v2047_v15  ;;  %1720 = vmatprep.subr.bf16.mxu0 %v2048_v16  ;;  %v2081_v45 = vld [vmem:[%s2807_s1 + $0x1c8] sm:$0xff]   ;;  %v2089_v51 = vld [vmem:[%s2808_s0 + $0x98] ss:$36 sps:$4 sm:$0xff]   ;;  %v2090_v52 = vld [vmem:[%s2807_s1 + $0x150] sm:$0xff]  }
  0x12   :  { %1784 = vmatprep.subr.bf16.mxu1 %v2049_v17  ;;  %v2082_v46 = vld [vmem:[%s2807_s1 + $0x108] sm:$0xff]   ;;  %v2091_v53 = vld [vmem:[%s2807_s1 + $0x1d0] sm:$0xff]   ;;  %v2094_v56 = vld [vmem:[%s2808_s0 + $0xdc] ss:$36 sps:$4 sm:$0xff]  }
  0x13   :  { %v2083_v47 = vld [vmem:[%s2807_s1 + $0x188] sm:$0xff]   ;;  %v2092_v54 = vld [vmem:[%s2807_s1 + $0x110] sm:$0xff]   ;;  %v2098_v58 = vld [vmem:[%s2808_s0 + $0xd8] ss:$36 sps:$4 sm:$0xff]  }
  0x14   :  { %1721 = vmatpush3.bf16.msra.mxu0 %v2050_v18  ;;  %v2093_v55 = vld [vmem:[%s2807_s1 + $0x190] sm:$0xff]   ;;  %v2096_v57 = vld [vmem:[%s2808_s0 + $0xe4] ss:$36 sps:$4 sm:$0xff]   ;;  %v2100_v60 = vld [vmem:[%s2807_s1 + $0x158] sm:$0xff]  }
  0x15   :  { %1785 = vmatpush3.bf16.msra.mxu1 %v2051_v19  ;;  %1722 = vmatprep.subr.bf16.mxu0 %v2052_v20  ;;  %v2099_v59 = vld [vmem:[%s2808_s0 + $0xe0] ss:$36 sps:$4 sm:$0xff]   ;;  %v2101_v61 = vld [vmem:[%s2807_s1 + $0x1d8] sm:$0xff]   ;;  %v2106_v1 = vld [vmem:[%s2808_s0 + $0x12c] ss:$36 sps:$4 sm:$0xff]  }
  0x16   :  { %1786 = vmatprep.subr.bf16.mxu1 %v2053_v21  ;;  %v2102_v62 = vld [vmem:[%s2807_s1 + $0x118] sm:$0xff]   ;;  %v2104_v0 = vld [vmem:[%s2808_s0 + $0x124] ss:$36 sps:$4 sm:$0xff]   ;;  %v2114_v8 = vld [vmem:[%s2808_s0 + $0x16c] ss:$36 sps:$4 sm:$0xff]  }
  0x17   :  { %v2103_v63 = vld [vmem:[%s2807_s1 + $0x198] sm:$0xff]   ;;  %v2108_v2 = vld [vmem:[%s2808_s0 + $0x120] ss:$36 sps:$4 sm:$0xff]   ;;  %v2109_v4 = vld [vmem:[%s2808_s0 + $0x128] ss:$36 sps:$4 sm:$0xff]  }
  0x18   :  { %1723 = vmatpush3.bf16.msra.mxu0 %v2054_v22  ;;  %v2110_v3 = vld [vmem:[%s2807_s1 + $0x160] sm:$0xff]   ;;  %v2116_v9 = vld [vmem:[%s2808_s0 + $0x174] ss:$36 sps:$4 sm:$0xff]   ;;  %v2120_v10 = vld [vmem:[%s2807_s1 + $0x168] sm:$0xff]  }
  0x19   :  { %1787 = vmatpush3.bf16.msra.mxu1 %v2055_v23  ;;  %1724 = vmatprep.subr.bf16.mxu0 %v2056_v24  ;;  %v2111_v5 = vld [vmem:[%s2807_s1 + $0x1e0] sm:$0xff]   ;;  %v2121_v11 = vld [vmem:[%s2807_s1 + $0x1e8] sm:$0xff]   ;;  %v2119_v15 = vld [vmem:[%s2808_s0 + $0x170] ss:$36 sps:$4 sm:$0xff]  }
  0x1a   :  { %1788 = vmatprep.subr.bf16.mxu1 %v2057_v25  ;;  %v2112_v6 = vld [vmem:[%s2807_s1 + $0x120] sm:$0xff]   ;;  %v2118_v12 = vld [vmem:[%s2808_s0 + $0x168] ss:$36 sps:$4 sm:$0xff]   ;;  %v2124_v16 = vld [vmem:[%s2808_s0 + $0x1b4] ss:$36 sps:$4 sm:$0xff]  }
  0x1b   :  { %v2113_v7 = vld [vmem:[%s2807_s1 + $0x1a0] sm:$0xff]   ;;  %v2122_v13 = vld [vmem:[%s2807_s1 + $0x128] sm:$0xff]   ;;  %v2130_v18 = vld [vmem:[%s2807_s1 + $0x170] sm:$0xff]  }
  0x1c   :  { %1725 = vmatpush3.bf16.msra.mxu0 %v2058_v26  ;;  %v2123_v14 = vld [vmem:[%s2807_s1 + $0x1a8] sm:$0xff]   ;;  %v2126_v17 = vld [vmem:[%s2808_s0 + $0x1bc] ss:$36 sps:$4 sm:$0xff]   ;;  %v2131_v19 = vld [vmem:[%s2807_s1 + $0x1f0] sm:$0xff]  }
  0x1d   :  { %1789 = vmatpush3.bf16.msra.mxu1 %v2059_v27  ;;  %1726 = vmatprep.subr.bf16.mxu0 %v2060_v28  ;;  %v2132_v20 = vld [vmem:[%s2807_s1 + $0x130] sm:$0xff]   ;;  %v2129_v23 = vld [vmem:[%s2808_s0 + $0x1b8] ss:$36 sps:$4 sm:$0xff]   ;;  %v2136_v25 = vld [vmem:[%s2808_s0 + $0x204] ss:$36 sps:$4 sm:$0xff]  }
  0x1e   :  { %1790 = vmatprep.subr.bf16.mxu1 %v2061_v29  ;;  %v2133_v21 = vld [vmem:[%s2807_s1 + $0x1b0] sm:$0xff]   ;;  %v2134_v24 = vld [vmem:[%s2808_s0 + $0x1fc] ss:$36 sps:$4 sm:$0xff]  }
  0x1f   :  { %v2128_v22 = vld [vmem:[%s2808_s0 + $0x1b0] ss:$36 sps:$4 sm:$0xff]   ;;  %v2140_v26 = vld [vmem:[%s2807_s1 + $0x178] sm:$0xff]  }
  0x20   :  { %1727 = vmatpush3.bf16.msra.mxu0 %v2062_v30  ;;  %v2141_v27 = vld [vmem:[%s2807_s1 + $0x1f8] sm:$0xff]   ;;  %v2144_v35 = vld [vmem:[%s2808_s0 + $0x10] ss:$36 sps:$4 sm:$0xff]  }
  0x21   :  { %1791 = vmatpush3.bf16.msra.mxu1 %v2063_v31  ;;  %1840 = vmatprep.subr.bf16.mxu0 %v2070_v36  ;;  %v2142_v28 = vld [vmem:[%s2807_s1 + $0x138] sm:$0xff]   ;;  %v2139_v31 = vld [vmem:[%s2808_s0 + $0x200] ss:$36 sps:$4 sm:$0xff]  }
  0x22   :  { %1904 = vmatprep.subr.bf16.mxu1 %v2071_v37  ;;  %v2143_v29 = vld [vmem:[%s2807_s1 + $0x1b8] sm:$0xff]  }
  0x23   :  { %1079 = vmatmul.mubr.bf16.vlgmr.msra.gmra.mrb[0].mxu0 %v2064_v32  ;;  %v2138_v30 = vld [vmem:[%s2808_s0 + $0x1f8] ss:$36 sps:$4 sm:$0xff]   ;;  %v2150_v32 = vld [vmem:[%s2807_s1 + $0x200] sm:$0xff]  }
  0x24   :  { %1176 = vmatmul.mubr.bf16.vlgmr.msra.gmra.mrb[0].mxu1 %v2067_v34  ;;  %1841 = vmatpush3.bf16.msra.mxu0 %v2072_v38  ;;  %v2146_v33 = vld [vmem:[%s2808_s0 + $0x14] ss:$36 sps:$4 sm:$0xff]   ;;  %v2149_v34 = vld [vmem:[%s2808_s0 + $0x1c] ss:$36 sps:$4 sm:$0xff]   ;;  %v2153_v38 = vld [vmem:[%s2808_s0 + $0x64] ss:$36 sps:$4 sm:$0xff]  }
  0x25   :  { %1905 = vmatpush3.bf16.msra.mxu1 %v2073_v39  ;;  %1086 = vmatprep.mubr.bf16.mxu0 %v2074_v40  ;;  %v2147_v36 = vld [vmem:[%s2808_s0 + $0x18] ss:$36 sps:$4 sm:$0xff]   ;;  %v2157_v39 = vld [vmem:[%s2807_s1 + $0x208] sm:$0xff]   ;;  %v2164_v40 = vld [vmem:[%s2807_s1 + $0x210] sm:$0xff]  }
  0x26   :  { %1183 = vmatprep.mubr.bf16.mxu1 %v2076_v41  ;;  %1842 = vmatprep.subr.bf16.mxu0 %v2080_v44  ;;  %v2151_v37 = vld [vmem:[%s2808_s0 + $0x5c] ss:$36 sps:$4 sm:$0xff]   ;;  %v2160_v44 = vld [vmem:[%s2808_s0 + $0xac] ss:$36 sps:$4 sm:$0xff]  }
  0x27   :  { %1906 = vmatprep.subr.bf16.mxu1 %v2081_v45  ;;  %v2155_v41 = vld [vmem:[%s2808_s0 + $0x58] ss:$36 sps:$4 sm:$0xff]  }
  0x28   :  { %1843 = vmatpush3.bf16.msra.mxu0 %v2082_v46  ;;  %v2171_v45 = vld [vmem:[%s2807_s1 + $0x218] sm:$0xff]   ;;  %v2178_v46 = vld [vmem:[%s2807_s1 + $0x220] sm:$0xff]  }
  0x29   :  { %1907 = vmatpush3.bf16.msra.mxu1 %v2083_v47  ;;  %1844 = vmatprep.subr.bf16.mxu0 %v2090_v52  ;;  %v2162_v47 = vld [vmem:[%s2808_s0 + $0xa0] ss:$36 sps:$4 sm:$0xff]   ;;  %v2169_v52 = vld [vmem:[%s2808_s0 + $0xe8] ss:$36 sps:$4 sm:$0xff]  }
  0x2a   :  { %1908 = vmatprep.subr.bf16.mxu1 %v2091_v53  ;;  %v2192_v53 = vld [vmem:[%s2807_s1 + $0x230] sm:$0xff]  }
  0x2b   :  { %1087 = vmatmul.mubr.bf16.gmra.mrb[4].mxu0 %v2078_v42  ;;  %v2156_v42 = vld [vmem:[%s2808_s0 + $0x60] ss:$36 sps:$4 sm:$0xff]  }
  0x2c   :  { %1184 = vmatmul.mubr.bf16.gmra.mrb[4].mxu1 %v2079_v43  ;;  %1094 = vmatprep.mubr.bf16.mxu0 %v2084_v48  ;;  %v2158_v43 = vld [vmem:[%s2808_s0 + $0xa4] ss:$36 sps:$4 sm:$0xff]  }
  0x2d   :  { %1191 = vmatprep.mubr.bf16.mxu1 %v2086_v49  ;;  %1845 = vmatpush3.bf16.msra.mxu0 %v2092_v54  ;;  %v2163_v48 = vld [vmem:[%s2808_s0 + $0xa8] ss:$36 sps:$4 sm:$0xff]   ;;  %v2170_v54 = vld [vmem:[%s2808_s0 + $0xf0] ss:$36 sps:$4 sm:$0xff]  }
  0x2e   :  { %1909 = vmatpush3.bf16.msra.mxu1 %v2093_v55  ;;  %1846 = vmatprep.subr.bf16.mxu0 %v2100_v60  ;;  %v2165_v49 = vld [vmem:[%s2808_s0 + $0xec] ss:$36 sps:$4 sm:$0xff]   ;;  %v2172_v55 = vld [vmem:[%s2808_s0 + $0x134] ss:$36 sps:$4 sm:$0xff]   ;;  %v2179_v60 = vld [vmem:[%s2808_s0 + $0x17c] ss:$36 sps:$4 sm:$0xff]  }
  0x2f   :  { %1910 = vmatprep.subr.bf16.mxu1 %v2101_v61  ;;  %v2181_v61 = vld [vmem:[%s2808_s0 + $0x184] ss:$36 sps:$4 sm:$0xff]  }
  0x31   :  { %1847 = vmatpush3.bf16.msra.mxu0 %v2102_v62  ;;  %v2183_v62 = vld [vmem:[%s2808_s0 + $0x178] ss:$36 sps:$4 sm:$0xff]  }
  0x32   :  { %1911 = vmatpush3.bf16.msra.mxu1 %v2103_v63  ;;  %1848 = vmatprep.subr.bf16.mxu0 %v2110_v3  ;;  %v2184_v63 = vld [vmem:[%s2808_s0 + $0x180] ss:$36 sps:$4 sm:$0xff]   ;;  %v2191_v3 = vld [vmem:[%s2808_s0 + $0x1c8] ss:$36 sps:$4 sm:$0xff]  }
  0x33   :  { %1095 = vmatmul.mubr.bf16.gmra.mrb[8].mxu0 %v2088_v50  ;;  %1912 = vmatprep.subr.bf16.mxu1 %v2111_v5  ;;  %v2167_v50 = vld [vmem:[%s2808_s0 + $0xf4] ss:$36 sps:$4 sm:$0xff]  }
  0x34   :  { %1192 = vmatmul.mubr.bf16.gmra.mrb[8].mxu1 %v2089_v51  ;;  %1102 = vmatprep.mubr.bf16.mxu0 %v2094_v56  ;;  %v2185_v51 = vld [vmem:[%s2807_s1 + $0x228] sm:$0xff]   ;;  %v2174_v56 = vld [vmem:[%s2808_s0 + $0x13c] ss:$36 sps:$4 sm:$0xff]   ;;  %v2195_v5 = vld [vmem:[%s2808_s0 + $0x214] ss:$36 sps:$4 sm:$0xff]  }
  0x35   :  { %1199 = vmatprep.mubr.bf16.mxu1 %v2096_v57  ;;  %1849 = vmatpush3.bf16.msra.mxu0 %v2112_v6  ;;  %v2199_v57 = vld [vmem:[%s2807_s1 + $0x238] sm:$0xff]   ;;  %v2197_v6 = vld [vmem:[%s2808_s0 + $0x208] ss:$36 sps:$4 sm:$0xff]  }
  0x36   :  { %1913 = vmatpush3.bf16.msra.mxu1 %v2113_v7  ;;  %1850 = vmatprep.subr.bf16.mxu0 %v2120_v10  ;;  %v2198_v7 = vld [vmem:[%s2808_s0 + $0x210] ss:$36 sps:$4 sm:$0xff]   ;;  %v2202_v10 = vld [vmem:[%s2808_s0 + $0x68] ss:$36 sps:$4 sm:$0xff]  }
  0x37   :  { %1914 = vmatprep.subr.bf16.mxu1 %v2121_v11  ;;  %v2203_v11 = vld [vmem:[%s2808_s0 + $0x188] ss:$36 sps:$4 sm:$0xff]  }
  0x39   :  { %1851 = vmatpush3.bf16.msra.mxu0 %v2122_v13  ;;  %v2205_v13 = vld [vmem:[%s2808_s0 + $0x1d0] ss:$36 sps:$4 sm:$0xff]  }
  0x3a   :  { %1915 = vmatpush3.bf16.msra.mxu1 %v2123_v14  ;;  %1852 = vmatprep.subr.bf16.mxu0 %v2130_v18  ;;  %v2206_v14 = vld [vmem:[%s2808_s0 + $0xf8] ss:$36 sps:$4 sm:$0xff]   ;;  %v2663_v18 = vld [vmem:[%s2809_s2] ss:$0 sm:$0xff] }
  0x3b   :  { %1103 = vmatmul.mubr.bf16.gmra.mrb[12].mxu0 %v2098_v58  ;;  %1916 = vmatprep.subr.bf16.mxu1 %v2131_v19  ;;  %v2176_v58 = vld [vmem:[%s2808_s0 + $0x130] ss:$36 sps:$4 sm:$0xff]  }
  0x3c   :  { %1200 = vmatmul.mubr.bf16.gmra.mrb[12].mxu1 %v2099_v59  ;;  %1110 = vmatprep.mubr.bf16.mxu0 %v2104_v0  ;;  %v2177_v59 = vld [vmem:[%s2808_s0 + $0x138] ss:$36 sps:$4 sm:$0xff]   ;;  %v2186_v0 = vld [vmem:[%s2808_s0 + $0x1c4] ss:$36 sps:$4 sm:$0xff]  }
  0x3d   :  { %1207 = vmatprep.mubr.bf16.mxu1 %v2106_v1  ;;  %1853 = vmatpush3.bf16.msra.mxu0 %v2132_v20  ;;  %v2188_v1 = vld [vmem:[%s2808_s0 + $0x1cc] ss:$36 sps:$4 sm:$0xff]  }
  0x3e   :  { %1917 = vmatpush3.bf16.msra.mxu1 %v2133_v21  ;;  %1854 = vmatprep.subr.bf16.mxu0 %v2140_v26 }
  0x3f   :  { %1918 = vmatprep.subr.bf16.mxu1 %v2141_v27 }
  0x41   :  { %1855 = vmatpush3.bf16.msra.mxu0 %v2142_v28 }
  0x42   :  { %1919 = vmatpush3.bf16.msra.mxu1 %v2143_v29  ;;  %1984 = vmatprep.subr.bf16.mxu0 %v2150_v32 }
  0x43   :  { %1111 = vmatmul.mubr.bf16.gmra.mrb[16].mxu0 %v2108_v2  ;;  %2016 = vmatprep.subr.bf16.mxu1 %v2150_v32  ;;  %v2190_v2 = vld [vmem:[%s2808_s0 + $0x1c0] ss:$36 sps:$4 sm:$0xff]  }
  0x44   :  { %1208 = vmatmul.mubr.bf16.gmra.mrb[16].mxu1 %v2109_v4  ;;  %1118 = vmatprep.mubr.bf16.mxu0 %v2114_v8  ;;  %v2193_v4 = vld [vmem:[%s2808_s0 + $0x20c] ss:$36 sps:$4 sm:$0xff]   ;;  %v2200_v8 = vld [vmem:[%s2808_s0 + $0x20] ss:$36 sps:$4 sm:$0xff]  }
  0x45   :  { %1215 = vmatprep.mubr.bf16.mxu1 %v2116_v9  ;;  %v2201_v9 = vld [vmem:[%s2808_s0 + $0x140] ss:$36 sps:$4 sm:$0xff]  }
  0x4b   :  { %1119 = vmatmul.mubr.bf16.gmra.mrb[20].mxu0 %v2118_v12  ;;  %v2204_v12 = vld [vmem:[%s2808_s0 + $0xb0] ss:$36 sps:$4 sm:$0xff]  }
  0x4c   :  { %1216 = vmatmul.mubr.bf16.gmra.mrb[20].mxu1 %v2119_v15  ;;  %1126 = vmatprep.mubr.bf16.mxu0 %v2124_v16  ;;  %v2207_v15 = vld [vmem:[%s2808_s0 + $0x218] ss:$36 sps:$4 sm:$0xff]  }
  0x4d   :  { %1223 = vmatprep.mubr.bf16.mxu1 %v2126_v17 }
  0x53   :  { %1127 = vmatmul.mubr.bf16.gmra.mrb[24].mxu0 %v2128_v22 }
  0x54   :  { %1224 = vmatmul.mubr.bf16.gmra.mrb[24].mxu1 %v2129_v23  ;;  %1134 = vmatprep.mubr.bf16.mxu0 %v2134_v24 }
  0x55   :  { %1231 = vmatprep.mubr.bf16.mxu1 %v2136_v25 }
  0x5b   :  { %1135 = vmatmul.mubr.bf16.gmra.mrb[28].mxu0 %v2138_v30 }
  0x5c   :  { %1232 = vmatmul.mubr.bf16.gmra.mrb[28].mxu1 %v2139_v31  ;;  %1272 = vmatprep.mubr.bf16.mxu0 %v2146_v33 }
  0x5d   :  { %1369 = vmatprep.mubr.bf16.mxu1 %v2149_v34 }
  0x63   :  { %1273 = vmatmul.mubr.bf16.vlgmr.msra.gmra.mrb[32].mxu0 %v2144_v35 }
  0x64   :  { %1370 = vmatmul.mubr.bf16.vlgmr.msra.gmra.mrb[32].mxu1 %v2147_v36  ;;  %1985 = vmatpush3.bf16.msra.mxu0 %v2150_v32 }
  0x65   :  { %2024 = vmatpush3.bf16.msra.mxu1 %v2150_v32  ;;  %1280 = vmatprep.mubr.bf16.mxu0 %v2151_v37 }
  0x66   :  { %1377 = vmatprep.mubr.bf16.mxu1 %v2153_v38  ;;  %1986 = vmatprep.subr.bf16.mxu0 %v2157_v39 }
  0x67   :  { %2017 = vmatprep.subr.bf16.mxu1 %v2157_v39 }
  0x68   :  { %1987 = vmatpush3.bf16.msra.mxu0 %v2157_v39 }
  0x69   :  { %2025 = vmatpush3.bf16.msra.mxu1 %v2157_v39  ;;  %1988 = vmatprep.subr.bf16.mxu0 %v2164_v40 }
  0x6a   :  { %2018 = vmatprep.subr.bf16.mxu1 %v2164_v40 }
  0x6b   :  { %1281 = vmatmul.mubr.bf16.gmra.mrb[36].mxu0 %v2155_v41 }
  0x6c   :  { %1378 = vmatmul.mubr.bf16.gmra.mrb[36].mxu1 %v2156_v42  ;;  %1288 = vmatprep.mubr.bf16.mxu0 %v2158_v43 }
  0x6d   :  { %1385 = vmatprep.mubr.bf16.mxu1 %v2160_v44  ;;  %1989 = vmatpush3.bf16.msra.mxu0 %v2164_v40 }
  0x6e   :  { %2026 = vmatpush3.bf16.msra.mxu1 %v2164_v40  ;;  %1990 = vmatprep.subr.bf16.mxu0 %v2171_v45 }
  0x6f   :  { %2019 = vmatprep.subr.bf16.mxu1 %v2171_v45 }
  0x71   :  { %1991 = vmatpush3.bf16.msra.mxu0 %v2171_v45 }
  0x72   :  { %2027 = vmatpush3.bf16.msra.mxu1 %v2171_v45  ;;  %1992 = vmatprep.subr.bf16.mxu0 %v2178_v46 }
  0x73   :  { %1289 = vmatmul.mubr.bf16.gmra.mrb[40].mxu0 %v2162_v47  ;;  %2020 = vmatprep.subr.bf16.mxu1 %v2178_v46 }
  0x74   :  { %1386 = vmatmul.mubr.bf16.gmra.mrb[40].mxu1 %v2163_v48  ;;  %1296 = vmatprep.mubr.bf16.mxu0 %v2165_v49 }
  0x75   :  { %1393 = vmatprep.mubr.bf16.mxu1 %v2167_v50  ;;  %1993 = vmatpush3.bf16.msra.mxu0 %v2178_v46 }
  0x76   :  { %2028 = vmatpush3.bf16.msra.mxu1 %v2178_v46  ;;  %1994 = vmatprep.subr.bf16.mxu0 %v2185_v51 }
  0x77   :  { %2021 = vmatprep.subr.bf16.mxu1 %v2185_v51 }
  0x79   :  { %1995 = vmatpush3.bf16.msra.mxu0 %v2185_v51 }
  0x7a   :  { %2029 = vmatpush3.bf16.msra.mxu1 %v2185_v51  ;;  %1996 = vmatprep.subr.bf16.mxu0 %v2192_v53 }
  0x7b   :  { %1297 = vmatmul.mubr.bf16.gmra.mrb[44].mxu0 %v2169_v52  ;;  %2022 = vmatprep.subr.bf16.mxu1 %v2192_v53 }
  0x7c   :  { %1394 = vmatmul.mubr.bf16.gmra.mrb[44].mxu1 %v2170_v54  ;;  %1304 = vmatprep.mubr.bf16.mxu0 %v2172_v55 }
  0x7d   :  { %1401 = vmatprep.mubr.bf16.mxu1 %v2174_v56  ;;  %1997 = vmatpush3.bf16.msra.mxu0 %v2192_v53 }
  0x7e   :  { %2030 = vmatpush3.bf16.msra.mxu1 %v2192_v53  ;;  %1998 = vmatprep.subr.bf16.mxu0 %v2199_v57 }
  0x7f   :  { %2023 = vmatprep.subr.bf16.mxu1 %v2199_v57 }
  0x81   :  { %1999 = vmatpush3.bf16.msra.mxu0 %v2199_v57 }
  0x82   :  { %2031 = vmatpush3.bf16.msra.mxu1 %v2199_v57 }
  0x83   :  { %1305 = vmatmul.mubr.bf16.gmra.mrb[48].mxu0 %v2176_v58 }
  0x84   :  { %1402 = vmatmul.mubr.bf16.gmra.mrb[48].mxu1 %v2177_v59  ;;  %1312 = vmatprep.mubr.bf16.mxu0 %v2179_v60 }
  0x85   :  { %1409 = vmatprep.mubr.bf16.mxu1 %v2181_v61 }
  0x8b   :  { %1313 = vmatmul.mubr.bf16.gmra.mrb[52].mxu0 %v2183_v62 }
  0x8c   :  { %1410 = vmatmul.mubr.bf16.gmra.mrb[52].mxu1 %v2184_v63  ;;  %1320 = vmatprep.mubr.bf16.mxu0 %v2186_v0 }
  0x8d   :  { %1417 = vmatprep.mubr.bf16.mxu1 %v2188_v1 }
  0x93   :  { %1321 = vmatmul.mubr.bf16.gmra.mrb[56].mxu0 %v2190_v2 }
  0x94   :  { %1418 = vmatmul.mubr.bf16.gmra.mrb[56].mxu1 %v2191_v3  ;;  %1328 = vmatprep.mubr.bf16.mxu0 %v2193_v4 }
  0x95   :  { %1425 = vmatprep.mubr.bf16.mxu1 %v2195_v5 }
  0x9b   :  { %1329 = vmatmul.mubr.bf16.gmra.mrb[60].mxu0 %v2197_v6 }
  0x9c   :  { %1426 = vmatmul.mubr.bf16.gmra.mrb[60].mxu1 %v2198_v7  ;;  %2000 = vmatprep.mubr.bf16.mxu0 %v2200_v8 }
  0x9d   :  { %2008 = vmatprep.mubr.bf16.mxu1 %v2201_v9 }
  0xa3   :  { %2001 = vmatmul.mubr.bf16.vlgmr.msra.gmra.mrb[64].mxu0 %v2202_v10 }
  0xa4   :  { %2009 = vmatmul.mubr.bf16.vlgmr.msra.gmra.mrb[64].mxu1 %v2203_v11  ;;  %2004 = vmatprep.mubr.bf16.mxu0 %v2204_v12 }
  0xa5   :  { %2012 = vmatprep.mubr.bf16.mxu1 %v2205_v13 }
  0xab   :  { %2005 = vmatmul.mubr.bf16.gmra.mrb[68].mxu0 %v2206_v14 }
  0xac   :  { %2013 = vmatmul.mubr.bf16.gmra.mrb[68].mxu1 %v2207_v15 }
  0xf6   :  { %v1728_v16 = vpop.f32.mrb[0].mxu0 }
  0xf7   :  { %v1792_v17 = vpop.f32.mrb[0].mxu1  ;;  %v1729_v19 = vpop.f32.mrb[1].mxu0 }
  0xf8   :  { %v1730_v20 = vadd.f32 %v1729_v19, %v1728_v16  ;;  %v1793_v21 = vpop.f32.mrb[1].mxu1  ;;  %v1731_v22 = vpop.f32.mrb[2].mxu0 }
  0xf9   :  { %v1794_v23 = vadd.f32 %v1793_v21, %v1792_v17  ;;  %v1795_v24 = vpop.f32.mrb[2].mxu1  ;;  %v1732_v25 = vpop.f32.mrb[3].mxu0 }
  0xfa   :  { %v1081_v26 = vadd.f32 %v1730_v20, %v2663_v18  ;;  %v1733_v27 = vadd.f32 %v1732_v25, %v1731_v22  ;;  %v1796_v28 = vpop.f32.mrb[3].mxu1 }
  0xfb   :  { %v1797_v29 = vadd.f32 %v1796_v28, %v1795_v24 }
  0xfc   :  { %v2666_v30 = vadd.f32 %v1794_v23, %v1081_v26  ;;  %v1084_v31 = vadd.f32 %v1733_v27, %v2663_v18 }
  0xfe   :  { %v2669_v32 = vadd.f32 %v1797_v29, %v1084_v31  ;;  %v1734_v33 = vpop.f32.mrb[4].mxu0 }
  0xff   :  { %v1798_v34 = vpop.f32.mrb[4].mxu1  ;;  %v1735_v35 = vpop.f32.mrb[5].mxu0 }
 0x100   :  { %v1736_v36 = vadd.f32 %v1735_v35, %v1734_v33  ;;  %v1799_v37 = vpop.f32.mrb[5].mxu1  ;;  %v1737_v38 = vpop.f32.mrb[6].mxu0 }
 0x101   :  { %v1800_v39 = vadd.f32 %v1799_v37, %v1798_v34  ;;  %v1801_v40 = vpop.f32.mrb[6].mxu1  ;;  %v1738_v41 = vpop.f32.mrb[7].mxu0 }
 0x102   :  { %v1089_v42 = vadd.f32 %v1736_v36, %v2663_v18  ;;  %v1739_v43 = vadd.f32 %v1738_v41, %v1737_v38  ;;  %v1802_v44 = vpop.f32.mrb[7].mxu1 }
 0x103   :  { %v1803_v45 = vadd.f32 %v1802_v44, %v1801_v40 }
 0x104   :  { %v2672_v46 = vadd.f32 %v1800_v39, %v1089_v42  ;;  %v1092_v47 = vadd.f32 %v1739_v43, %v2663_v18 }
 0x106   :  { %v2675_v48 = vadd.f32 %v1803_v45, %v1092_v47  ;;  %v1740_v49 = vpop.f32.mrb[8].mxu0 }
 0x107   :  { %v1804_v50 = vpop.f32.mrb[8].mxu1  ;;  %v1741_v51 = vpop.f32.mrb[9].mxu0 }
 0x108   :  { %v1742_v52 = vadd.f32 %v1741_v51, %v1740_v49  ;;  %v1805_v53 = vpop.f32.mrb[9].mxu1  ;;  %v1743_v54 = vpop.f32.mrb[10].mxu0 }
 0x109   :  { %v1806_v55 = vadd.f32 %v1805_v53, %v1804_v50  ;;  %v1807_v56 = vpop.f32.mrb[10].mxu1  ;;  %v1744_v57 = vpop.f32.mrb[11].mxu0 }
 0x10a   :  { %v1097_v58 = vadd.f32 %v1742_v52, %v2663_v18  ;;  %v1745_v59 = vadd.f32 %v1744_v57, %v1743_v54  ;;  %v1808_v60 = vpop.f32.mrb[11].mxu1 }
 0x10b   :  { %v1809_v61 = vadd.f32 %v1808_v60, %v1807_v56 }
 0x10c   :  { %v2678_v62 = vadd.f32 %v1806_v55, %v1097_v58  ;;  %v1100_v63 = vadd.f32 %v1745_v59, %v2663_v18 }
 0x10e   :  { %v2681_v0 = vadd.f32 %v1809_v61, %v1100_v63  ;;  %v1746_v1 = vpop.f32.mrb[12].mxu0 }
 0x10f   :  { %v1810_v2 = vpop.f32.mrb[12].mxu1  ;;  %v1747_v3 = vpop.f32.mrb[13].mxu0 }
 0x110   :  { %v1748_v4 = vadd.f32 %v1747_v3, %v1746_v1  ;;  %v1811_v5 = vpop.f32.mrb[13].mxu1  ;;  %v1749_v6 = vpop.f32.mrb[14].mxu0 }
 0x111   :  { %v1812_v7 = vadd.f32 %v1811_v5, %v1810_v2  ;;  %v1813_v8 = vpop.f32.mrb[14].mxu1  ;;  %v1750_v9 = vpop.f32.mrb[15].mxu0 }
 0x112   :  { %v1105_v10 = vadd.f32 %v1748_v4, %v2663_v18  ;;  %v1751_v11 = vadd.f32 %v1750_v9, %v1749_v6  ;;  %v1814_v12 = vpop.f32.mrb[15].mxu1 }
 0x113   :  { %v1815_v13 = vadd.f32 %v1814_v12, %v1813_v8 }
 0x114   :  { %v2684_v14 = vadd.f32 %v1812_v7, %v1105_v10  ;;  %v1108_v15 = vadd.f32 %v1751_v11, %v2663_v18 }
 0x116   :  { %v2687_v16 = vadd.f32 %v1815_v13, %v1108_v15  ;;  %v1752_v17 = vpop.f32.mrb[16].mxu0 }
 0x117   :  { %v1816_v19 = vpop.f32.mrb[16].mxu1  ;;  %v1753_v20 = vpop.f32.mrb[17].mxu0 }
 0x118   :  { %v1754_v21 = vadd.f32 %v1753_v20, %v1752_v17  ;;  %v1817_v22 = vpop.f32.mrb[17].mxu1  ;;  %v1755_v23 = vpop.f32.mrb[18].mxu0 }
 0x119   :  { %v1818_v24 = vadd.f32 %v1817_v22, %v1816_v19  ;;  %v1819_v25 = vpop.f32.mrb[18].mxu1  ;;  %v1756_v26 = vpop.f32.mrb[19].mxu0 }
 0x11a   :  { %v1113_v27 = vadd.f32 %v1754_v21, %v2663_v18  ;;  %v1757_v28 = vadd.f32 %v1756_v26, %v1755_v23  ;;  %v1820_v29 = vpop.f32.mrb[19].mxu1 }
 0x11b   :  { %v1821_v31 = vadd.f32 %v1820_v29, %v1819_v25 }
 0x11c   :  { %v2690_v33 = vadd.f32 %v1818_v24, %v1113_v27  ;;  %v1116_v34 = vadd.f32 %v1757_v28, %v2663_v18 }
 0x11e   :  { %v2693_v35 = vadd.f32 %v1821_v31, %v1116_v34  ;;  %v1758_v36 = vpop.f32.mrb[20].mxu0 }
 0x11f   :  { %v1822_v37 = vpop.f32.mrb[20].mxu1  ;;  %v1759_v38 = vpop.f32.mrb[21].mxu0 }
 0x120   :  { %v1760_v39 = vadd.f32 %v1759_v38, %v1758_v36  ;;  %v1823_v40 = vpop.f32.mrb[21].mxu1  ;;  %v1761_v41 = vpop.f32.mrb[22].mxu0 }
 0x121   :  { %v1824_v42 = vadd.f32 %v1823_v40, %v1822_v37  ;;  %v1825_v43 = vpop.f32.mrb[22].mxu1  ;;  %v1762_v44 = vpop.f32.mrb[23].mxu0 }
 0x122   :  { %v1121_v45 = vadd.f32 %v1760_v39, %v2663_v18  ;;  %v1763_v47 = vadd.f32 %v1762_v44, %v1761_v41  ;;  %v1826_v49 = vpop.f32.mrb[23].mxu1 }
 0x123   :  { %v1827_v50 = vadd.f32 %v1826_v49, %v1825_v43 }
 0x124   :  { %v2696_v51 = vadd.f32 %v1824_v42, %v1121_v45  ;;  %v1124_v52 = vadd.f32 %v1763_v47, %v2663_v18 }
 0x126   :  { %v2699_v53 = vadd.f32 %v1827_v50, %v1124_v52  ;;  %v1764_v54 = vpop.f32.mrb[24].mxu0 }
 0x127   :  { %v1828_v55 = vpop.f32.mrb[24].mxu1  ;;  %v1765_v56 = vpop.f32.mrb[25].mxu0 }
 0x128   :  { %v1766_v57 = vadd.f32 %v1765_v56, %v1764_v54  ;;  %v1829_v58 = vpop.f32.mrb[25].mxu1  ;;  %v1767_v59 = vpop.f32.mrb[26].mxu0 }
 0x129   :  { %v1830_v60 = vadd.f32 %v1829_v58, %v1828_v55  ;;  %v1831_v61 = vpop.f32.mrb[26].mxu1  ;;  %v1768_v63 = vpop.f32.mrb[27].mxu0 }
 0x12a   :  { %v1129_v1 = vadd.f32 %v1766_v57, %v2663_v18  ;;  %v1769_v2 = vadd.f32 %v1768_v63, %v1767_v59  ;;  %v1832_v3 = vpop.f32.mrb[27].mxu1 }
 0x12b   :  { %v1833_v4 = vadd.f32 %v1832_v3, %v1831_v61 }
 0x12c   :  { %v2702_v5 = vadd.f32 %v1830_v60, %v1129_v1  ;;  %v1132_v6 = vadd.f32 %v1769_v2, %v2663_v18 }
 0x12e   :  { %v2705_v7 = vadd.f32 %v1833_v4, %v1132_v6  ;;  %v1770_v8 = vpop.f32.mrb[28].mxu0 }
 0x12f   :  { %v1834_v9 = vpop.f32.mrb[28].mxu1  ;;  %v1771_v10 = vpop.f32.mrb[29].mxu0 }
 0x130   :  { %v1772_v11 = vadd.f32 %v1771_v10, %v1770_v8  ;;  %v1835_v12 = vpop.f32.mrb[29].mxu1  ;;  %v1773_v13 = vpop.f32.mrb[30].mxu0 }
 0x131   :  { %v1836_v15 = vadd.f32 %v1835_v12, %v1834_v9  ;;  %v1837_v17 = vpop.f32.mrb[30].mxu1  ;;  %v1774_v19 = vpop.f32.mrb[31].mxu0 }
 0x132   :  { %v1137_v20 = vadd.f32 %v1772_v11, %v2663_v18  ;;  %v1775_v21 = vadd.f32 %v1774_v19, %v1773_v13  ;;  %v1838_v22 = vpop.f32.mrb[31].mxu1 }
 0x133   :  { %v1839_v23 = vadd.f32 %v1838_v22, %v1837_v17 }
 0x134   :  { %v2708_v24 = vadd.f32 %v1836_v15, %v1137_v20  ;;  %v1140_v25 = vadd.f32 %v1775_v21, %v2663_v18 }
 0x136   :  { %v2711_v26 = vadd.f32 %v1839_v23, %v1140_v25  ;;  %v1856_v27 = vpop.f32.mrb[32].mxu0 }
 0x137   :  { %v1920_v28 = vpop.f32.mrb[32].mxu1  ;;  %v1857_v29 = vpop.f32.mrb[33].mxu0 }
 0x138   :  { %v1858_v31 = vadd.f32 %v1857_v29, %v1856_v27  ;;  %v1921_v34 = vpop.f32.mrb[33].mxu1  ;;  %v1859_v36 = vpop.f32.mrb[34].mxu0 }
 0x139   :  { %v1922_v37 = vadd.f32 %v1921_v34, %v1920_v28  ;;  %v1923_v38 = vpop.f32.mrb[34].mxu1  ;;  %v1860_v39 = vpop.f32.mrb[35].mxu0 }
 0x13a   :  { %v1275_v40 = vadd.f32 %v1858_v31, %v2666_v30  ;;  %v1861_v41 = vadd.f32 %v1860_v39, %v1859_v36  ;;  %v1924_v42 = vpop.f32.mrb[35].mxu1 }
 0x13b   :  { %v1925_v43 = vadd.f32 %v1924_v42, %v1923_v38 }
 0x13c   :  { %v1278_v44 = vadd.f32 %v1861_v41, %v2669_v32  ;;  %v2715_v45 = vadd.f32 %v1922_v37, %v1275_v40 }
 0x13e   :  { %v1862_v18 = vpop.f32.mrb[36].mxu0  ;;  %v2717_v47 = vadd.f32 %v1925_v43, %v1278_v44 }
 0x13f   :  { %v1926_v49 = vpop.f32.mrb[36].mxu1  ;;  %v1863_v50 = vpop.f32.mrb[37].mxu0 }
 0x140   :  { %v1864_v52 = vadd.f32 %v1863_v50, %v1862_v18  ;;  %v1927_v54 = vpop.f32.mrb[37].mxu1  ;;  %v1865_v55 = vpop.f32.mrb[38].mxu0 }
 0x141   :  { %v1928_v56 = vadd.f32 %v1927_v54, %v1926_v49  ;;  %v1929_v57 = vpop.f32.mrb[38].mxu1  ;;  %v1866_v58 = vpop.f32.mrb[39].mxu0 }
 0x142   :  { %v1283_v30 = vadd.f32 %v1864_v52, %v2672_v46  ;;  %v1867_v59 = vadd.f32 %v1866_v58, %v1865_v55  ;;  %v1930_v60 = vpop.f32.mrb[39].mxu1 }
 0x143   :  { %v1931_v61 = vadd.f32 %v1930_v60, %v1929_v57 }
 0x144   :  { %v1286_v32 = vadd.f32 %v1867_v59, %v2675_v48  ;;  %v2721_v63 = vadd.f32 %v1928_v56, %v1283_v30 }
 0x146   :  { %v1868_v1 = vpop.f32.mrb[40].mxu0  ;;  %v2723_v2 = vadd.f32 %v1931_v61, %v1286_v32 }
 0x147   :  { %v1932_v3 = vpop.f32.mrb[40].mxu1  ;;  %v1869_v4 = vpop.f32.mrb[41].mxu0 }
 0x148   :  { %v1870_v6 = vadd.f32 %v1869_v4, %v1868_v1  ;;  %v1933_v8 = vpop.f32.mrb[41].mxu1  ;;  %v1871_v9 = vpop.f32.mrb[42].mxu0 }
 0x149   :  { %v1934_v10 = vadd.f32 %v1933_v8, %v1932_v3  ;;  %v1935_v11 = vpop.f32.mrb[42].mxu1  ;;  %v1872_v12 = vpop.f32.mrb[43].mxu0 }
 0x14a   :  { %v1291_v46 = vadd.f32 %v1870_v6, %v2678_v62  ;;  %v1873_v13 = vadd.f32 %v1872_v12, %v1871_v9  ;;  %v1936_v15 = vpop.f32.mrb[43].mxu1 }
 0x14b   :  { %v1937_v17 = vadd.f32 %v1936_v15, %v1935_v11 }
 0x14c   :  { %v1294_v48 = vadd.f32 %v1873_v13, %v2681_v0  ;;  %v2727_v19 = vadd.f32 %v1934_v10, %v1291_v46 }
 0x14e   :  { %v1874_v20 = vpop.f32.mrb[44].mxu0  ;;  %v2729_v21 = vadd.f32 %v1937_v17, %v1294_v48 }
 0x14f   :  { %v1938_v22 = vpop.f32.mrb[44].mxu1  ;;  %v1875_v23 = vpop.f32.mrb[45].mxu0 }
 0x150   :  { %v1876_v25 = vadd.f32 %v1875_v23, %v1874_v20  ;;  %v1939_v27 = vpop.f32.mrb[45].mxu1  ;;  %v1877_v28 = vpop.f32.mrb[46].mxu0 }
 0x151   :  { %v1940_v29 = vadd.f32 %v1939_v27, %v1938_v22  ;;  %v1941_v31 = vpop.f32.mrb[46].mxu1  ;;  %v1878_v34 = vpop.f32.mrb[47].mxu0 }
 0x152   :  { %v1299_v62 = vadd.f32 %v1876_v25, %v2684_v14  ;;  %v1879_v36 = vadd.f32 %v1878_v34, %v1877_v28  ;;  %v1942_v37 = vpop.f32.mrb[47].mxu1 }
 0x153   :  { %v1943_v38 = vadd.f32 %v1942_v37, %v1941_v31 }
 0x154   :  { %v1302_v0 = vadd.f32 %v1879_v36, %v2687_v16  ;;  %v2733_v39 = vadd.f32 %v1940_v29, %v1299_v62 }
 0x156   :  { %v1880_v40 = vpop.f32.mrb[48].mxu0  ;;  %v2735_v41 = vadd.f32 %v1943_v38, %v1302_v0 }
 0x157   :  { %v1944_v42 = vpop.f32.mrb[48].mxu1  ;;  %v1881_v43 = vpop.f32.mrb[49].mxu0 }
 0x158   :  { %v1882_v44 = vadd.f32 %v1881_v43, %v1880_v40  ;;  %v1945_v18 = vpop.f32.mrb[49].mxu1  ;;  %v1883_v49 = vpop.f32.mrb[50].mxu0 }
 0x159   :  { %v1946_v50 = vadd.f32 %v1945_v18, %v1944_v42  ;;  %v1947_v52 = vpop.f32.mrb[50].mxu1  ;;  %v1884_v54 = vpop.f32.mrb[51].mxu0 }
 0x15a   :  { %v1307_v14 = vadd.f32 %v1882_v44, %v2690_v33  ;;  %v1885_v55 = vadd.f32 %v1884_v54, %v1883_v49  ;;  %v1948_v56 = vpop.f32.mrb[51].mxu1 }
 0x15b   :  { %v1949_v57 = vadd.f32 %v1948_v56, %v1947_v52 }
 0x15c   :  { %v1310_v16 = vadd.f32 %v1885_v55, %v2693_v35  ;;  %v1404_v58 = vadd.f32 %v1946_v50, %v1307_v14 }
 0x15e   :  { %v1886_v30 = vpop.f32.mrb[52].mxu0  ;;  %v2739_v59 = vadd.f32 %v1949_v57, %v1310_v16 }
 0x15f   :  { %v1950_v60 = vpop.f32.mrb[52].mxu1  ;;  %v1887_v61 = vpop.f32.mrb[53].mxu0 }
 0x160   :  { %v1888_v32 = vadd.f32 %v1887_v61, %v1886_v30  ;;  %v1951_v1 = vpop.f32.mrb[53].mxu1  ;;  %v1889_v3 = vpop.f32.mrb[54].mxu0 }
 0x161   :  { %v1952_v4 = vadd.f32 %v1951_v1, %v1950_v60  ;;  %v1953_v6 = vpop.f32.mrb[54].mxu1  ;;  %v1890_v8 = vpop.f32.mrb[55].mxu0 }
 0x162   :  { %v1315_v9 = vadd.f32 %v1888_v32, %v2696_v51  ;;  %v1891_v33 = vadd.f32 %v1890_v8, %v1889_v3  ;;  %v1954_v10 = vpop.f32.mrb[55].mxu1 }
 0x163   :  { %v1955_v11 = vadd.f32 %v1954_v10, %v1953_v6 }
 0x164   :  { %v1318_v12 = vadd.f32 %v1891_v33, %v2699_v53  ;;  %v1412_v35 = vadd.f32 %v1952_v4, %v1315_v9 }
 0x166   :  { %v1892_v46 = vpop.f32.mrb[56].mxu0  ;;  %v1415_v13 = vadd.f32 %v1955_v11, %v1318_v12 }
 0x167   :  { %v1956_v15 = vpop.f32.mrb[56].mxu1  ;;  %v1893_v17 = vpop.f32.mrb[57].mxu0 }
 0x168   :  { %v1894_v48 = vadd.f32 %v1893_v17, %v1892_v46  ;;  %v1957_v20 = vpop.f32.mrb[57].mxu1  ;;  %v1895_v22 = vpop.f32.mrb[58].mxu0 }
 0x169   :  { %v1958_v23 = vadd.f32 %v1957_v20, %v1956_v15  ;;  %v1959_v25 = vpop.f32.mrb[58].mxu1  ;;  %v1896_v27 = vpop.f32.mrb[59].mxu0 }
 0x16a   :  { %v1323_v28 = vadd.f32 %v1894_v48, %v2702_v5  ;;  %v1897_v29 = vadd.f32 %v1896_v27, %v1895_v22  ;;  %v1960_v51 = vpop.f32.mrb[59].mxu1 }
 0x16b   :  { %v1961_v31 = vadd.f32 %v1960_v51, %v1959_v25 }
 0x16c   :  { %v1326_v34 = vadd.f32 %v1897_v29, %v2705_v7  ;;  %v1420_v62 = vadd.f32 %v1958_v23, %v1323_v28 }
 0x16e   :  { %v1898_v53 = vpop.f32.mrb[60].mxu0  ;;  %v2745_v36 = vadd.f32 %v1961_v31, %v1326_v34 }
 0x16f   :  { %v1962_v37 = vpop.f32.mrb[60].mxu1  ;;  %v1899_v38 = vpop.f32.mrb[61].mxu0 }
 0x170   :  { %v1900_v0 = vadd.f32 %v1899_v38, %v1898_v53  ;;  %v1963_v40 = vpop.f32.mrb[61].mxu1  ;;  %v1901_v42 = vpop.f32.mrb[62].mxu0 }
 0x171   :  { %v1964_v43 = vadd.f32 %v1963_v40, %v1962_v37  ;;  %v1965_v44 = vpop.f32.mrb[62].mxu1  ;;  %v1902_v18 = vpop.f32.mrb[63].mxu0 }
 0x172   :  { %v1331_v49 = vadd.f32 %v1900_v0, %v2708_v24  ;;  %v1903_v5 = vadd.f32 %v1902_v18, %v1901_v42  ;;  %v1966_v50 = vpop.f32.mrb[63].mxu1 }
 0x173   :  { %v1967_v52 = vadd.f32 %v1966_v50, %v1965_v44 }
 0x174   :  { %v1334_v54 = vadd.f32 %v1903_v5, %v2711_v26  ;;  %v1428_v7 = vadd.f32 %v1964_v43, %v1331_v49 }
 0x176   :  { %v2002_v14 = vpop.f32.mrb[64].mxu0  ;;  %v1431_v55 = vadd.f32 %v1967_v52, %v1334_v54 }
 0x177   :  { %v1477_v56 = vadd.f32 %v2002_v14, %v2721_v63  ;;  %v2010_v57 = vpop.f32.mrb[64].mxu1  ;;  %v1468_v16 = vpop.f32.mrb[65].mxu0 }
 0x178   :  { %v1509_v30 = vadd.f32 %v2010_v57, %v1412_v35  ;;  %v1469_v60 = vadd.f32 %v1468_v16, %v2715_v45  ;;  %v1500_v61 = vpop.f32.mrb[65].mxu1  ;;  %v2003_v32 = vpop.f32.mrb[66].mxu0 }
 0x179   :  { %v1533_v1 = vmax.f32 %v1477_v56, 0.0  ;;  %v1501_v3 = vadd.f32 %v1500_v61, %v1404_v58  ;;  %v1480_v24 = vadd.f32 %v2003_v32, %v2723_v2  ;;  %v2011_v4 = vpop.f32.mrb[66].mxu1  ;;  %v1471_v6 = vpop.f32.mrb[67].mxu0 }
 0x17a   :  { %v1541_v8 = vmax.f32 %v1509_v30, 0.0  ;;  %v1531_v26 = vmax.f32 %v1469_v60, 0.0  ;;  %v1512_v9 = vadd.f32 %v2011_v4, %v1415_v13  ;;  %v1472_v33 = vadd.f32 %v1471_v6, %v2717_v47  ;;  %v1503_v10 = vpop.f32.mrb[67].mxu1 }
 0x17b   :  { %1549 = vst [vmem:[%s2810_s3 + $0x10] sm:$0xff] %v1533_v1  ;;  %v1539_v63 = vmax.f32 %v1501_v3, 0.0  ;;  %v1534_v45 = vmax.f32 %v1480_v24, 0.0  ;;  %v1504_v11 = vadd.f32 %v1503_v10, %v2739_v59 }
 0x17c   :  { %1557 = vst [vmem:[%s2810_s3 + $0x50] sm:$0xff] %v1541_v8  ;;  %1547 = vst [vmem:[%s2810_s3] sm:$0xff] %v1531_v26  ;;  %v1542_v2 = vmax.f32 %v1512_v9, 0.0  ;;  %v1532_v58 = vmax.f32 %v1472_v33, 0.0 }
 0x17d   :  { %1555 = vst [vmem:[%s2810_s3 + $0x40] sm:$0xff] %v1539_v63  ;;  %1550 = vst [vmem:[%s2810_s3 + $0x18] sm:$0xff] %v1534_v45  ;;  %v1540_v47 = vmax.f32 %v1504_v11, 0.0 }
 0x17e   :  { %1558 = vst [vmem:[%s2810_s3 + $0x58] sm:$0xff] %v1542_v2  ;;  %1548 = vst [vmem:[%s2810_s3 + $0x8] sm:$0xff] %v1532_v58  ;;  %v2006_v59 = vpop.f32.mrb[68].mxu0 }
 0x17f   :  { %1556 = vst [vmem:[%s2810_s3 + $0x48] sm:$0xff] %v1540_v47  ;;  %v1493_v12 = vadd.f32 %v2006_v59, %v2733_v39  ;;  %v2014_v35 = vpop.f32.mrb[68].mxu1  ;;  %v1484_v46 = vpop.f32.mrb[69].mxu0 }
 0x180   :  { %v1525_v13 = vadd.f32 %v2014_v35, %v1428_v7  ;;  %v1485_v15 = vadd.f32 %v1484_v46, %v2727_v19  ;;  %v1516_v17 = vpop.f32.mrb[69].mxu1  ;;  %v2007_v48 = vpop.f32.mrb[70].mxu0 }
 0x181   :  { %v1537_v20 = vmax.f32 %v1493_v12, 0.0  ;;  %v1517_v22 = vadd.f32 %v1516_v17, %v1420_v62  ;;  %v1496_v23 = vadd.f32 %v2007_v48, %v2735_v41  ;;  %v2015_v25 = vpop.f32.mrb[70].mxu1  ;;  %v1487_v27 = vpop.f32.mrb[71].mxu0 }
 0x182   :  { %v1545_v28 = vmax.f32 %v1525_v13, 0.0  ;;  %v1535_v29 = vmax.f32 %v1485_v15, 0.0  ;;  %v1528_v51 = vadd.f32 %v2015_v25, %v1431_v55  ;;  %v1488_v31 = vadd.f32 %v1487_v27, %v2729_v21  ;;  %v1519_v34 = vpop.f32.mrb[71].mxu1 }
 0x183   :  { %1553 = vst [vmem:[%s2810_s3 + $0x30] sm:$0xff] %v1537_v20  ;;  %v1543_v39 = vmax.f32 %v1517_v22, 0.0  ;;  %v1538_v19 = vmax.f32 %v1496_v23, 0.0  ;;  %v1520_v53 = vadd.f32 %v1519_v34, %v2745_v36 }
 0x184   :  { %1561 = vst [vmem:[%s2810_s3 + $0x70] sm:$0xff] %v1545_v28  ;;  %1551 = vst [vmem:[%s2810_s3 + $0x20] sm:$0xff] %v1535_v29  ;;  %v1546_v41 = vmax.f32 %v1528_v51, 0.0  ;;  %v1536_v62 = vmax.f32 %v1488_v31, 0.0 }
 0x185   :  { %1559 = vst [vmem:[%s2810_s3 + $0x60] sm:$0xff] %v1543_v39  ;;  %1554 = vst [vmem:[%s2810_s3 + $0x38] sm:$0xff] %v1538_v19  ;;  %v1544_v21 = vmax.f32 %v1520_v53, 0.0 }
 0x186   :  { %1562 = vst [vmem:[%s2810_s3 + $0x78] sm:$0xff] %v1546_v41  ;;  %1552 = vst [vmem:[%s2810_s3 + $0x28] sm:$0xff] %v1536_v62 }
 0x187   :  { %1560 = vst [vmem:[%s2810_s3 + $0x68] sm:$0xff] %v1544_v21 }

// kernel: vqvae_forward.15
= control target key start
LH: loop header
LB: loop body
LE: loop exit
PB: predicated region body
PF: predicated region fallthrough
CT: control target
= control target key end

     0   :  { %s123_s0 = inlined_call_operand.vmem [shape: f32[4,2,2,256], index: 0, kind: input, shape index: {}]   ;;  %s124_s1 = inlined_call_operand.vmem [shape: f32[4,2,128], index: 1, kind: output, shape index: {}]  }
   0x1   :  { %v8_v0 = vld [vmem:[%s123_s0] sm:$0x3]  ;;  %v12_v1 = vld [vmem:[%s123_s0 + $0x2] sm:$0x3]  ;;  %v45_v2 = vld [vmem:[%s123_s0 + $0x4] sm:$0x3] }
   0x2   :  { %v49_v3 = vld [vmem:[%s123_s0 + $0x6] sm:$0x3]  ;;  %v25_v4 = vmax.f32 %v8_v0, %v12_v1  ;;  %v9_v5 = vld [vmem:[%s123_s0 + $0x8] sm:$0x3]  ;;  %v13_v6 = vld [vmem:[%s123_s0 + $0xa] sm:$0x3] }
   0x3   :  { %v29_v7 = vmax.f32 %v45_v2, %v49_v3  ;;  %v46_v8 = vld [vmem:[%s123_s0 + $0xc] sm:$0x3]  ;;  %v50_v9 = vld [vmem:[%s123_s0 + $0xe] sm:$0x3]  ;;  %v26_v10 = vmax.f32 %v9_v5, %v13_v6  ;;  %v10_v11 = vld [vmem:[%s123_s0 + $0x10] sm:$0x3] }
   0x4   :  { %v30_v12 = vmax.f32 %v46_v8, %v50_v9  ;;  %v14_v13 = vld [vmem:[%s123_s0 + $0x12] sm:$0x3]  ;;  %v47_v14 = vld [vmem:[%s123_s0 + $0x14] sm:$0x3]  ;;  %v51_v15 = vld [vmem:[%s123_s0 + $0x16] sm:$0x3] }
   0x5   :  { %v33_v16 = vmax.f32 %v25_v4, %v29_v7  ;;  %v27_v17 = vmax.f32 %v10_v11, %v14_v13  ;;  %v31_v18 = vmax.f32 %v47_v14, %v51_v15  ;;  %v11_v19 = vld [vmem:[%s123_s0 + $0x18] sm:$0x3]  ;;  %v15_v20 = vld [vmem:[%s123_s0 + $0x1a] sm:$0x3]  ;;  %v48_v21 = vld [vmem:[%s123_s0 + $0x1c] sm:$0x3] }
   0x6   :  { %v34_v22 = vmax.f32 %v26_v10, %v30_v12  ;;  %v52_v23 = vld [vmem:[%s123_s0 + $0x1e] sm:$0x3]  ;;  %v28_v24 = vmax.f32 %v11_v19, %v15_v20 }
   0x7   :  { %37 = vst [vmem:[%s124_s1] sm:$0x3] %v33_v16  ;;  %v35_v25 = vmax.f32 %v27_v17, %v31_v18  ;;  %v32_v26 = vmax.f32 %v48_v21, %v52_v23 }
   0x8   :  { %38 = vst [vmem:[%s124_s1 + $0x2] sm:$0x3] %v34_v22 }
   0x9   :  { %39 = vst [vmem:[%s124_s1 + $0x4] sm:$0x3] %v35_v25  ;;  %v36_v27 = vmax.f32 %v28_v24, %v32_v26 }
   0xb   :  { %40 = vst [vmem:[%s124_s1 + $0x6] sm:$0x3] %v36_v27 }

// kernel: vqvae_forward.14
= control target key start
LH: loop header
LB: loop body
LE: loop exit
PB: predicated region body
PF: predicated region fallthrough
CT: control target
= control target key end

     0   :  { %s1599_s1 = inlined_call_operand.vmem [shape: bf16[1152,128], index: 1, kind: input, shape index: {}]   ;;  %s1600_s0 = inlined_call_operand.vmem [shape: bf16[32,1152], index: 0, kind: input, shape index: {}]   ;;  %s1601_s2 = inlined_call_operand.vmem [shape: f32[1,128], index: 2, kind: input, shape index: {}]   ;;  %s1602_s3 = inlined_call_operand.vmem [shape: f32[32,128], index: 3, kind: output, shape index: {}]  }
   0x1   :  { %v1196_v0 = vld [vmem:[%s1599_s1 + $0x40] sm:$0xff]   ;;  %v1200_v4 = vld [vmem:[%s1599_s1 + $0x48] sm:$0xff]   ;;  %v1204_v8 = vld [vmem:[%s1599_s1 + $0x50] sm:$0xff]  }
   0x2   :  { %v1197_v1 = vld [vmem:[%s1599_s1] sm:$0xff]   ;;  %1054 = vmatprep.subr.bf16.mxu0 %v1196_v0  ;;  %v1201_v5 = vld [vmem:[%s1599_s1 + $0x8] sm:$0xff]   ;;  %v1205_v9 = vld [vmem:[%s1599_s1 + $0x10] sm:$0xff]  }
   0x3   :  { %v1198_v2 = vld [vmem:[%s1599_s1 + $0xc0] sm:$0xff]   ;;  %1055 = vmatpush3.bf16.msra.mxu0 %v1197_v1  ;;  %v1202_v6 = vld [vmem:[%s1599_s1 + $0xc8] sm:$0xff]   ;;  %v1206_v10 = vld [vmem:[%s1599_s1 + $0xd0] sm:$0xff]  }
   0x4   :  { %v1199_v3 = vld [vmem:[%s1599_s1 + $0x80] sm:$0xff]   ;;  %1082 = vmatprep.subr.bf16.mxu1 %v1198_v2  ;;  %1056 = vmatprep.subr.bf16.mxu0 %v1200_v4  ;;  %v1203_v7 = vld [vmem:[%s1599_s1 + $0x88] sm:$0xff]   ;;  %v1207_v11 = vld [vmem:[%s1599_s1 + $0x90] sm:$0xff]  }
   0x5   :  { %1083 = vmatpush3.bf16.msra.mxu1 %v1199_v3  ;;  %v1208_v12 = vld [vmem:[%s1599_s1 + $0x58] sm:$0xff]   ;;  %v1212_v16 = vld [vmem:[%s1599_s1 + $0x60] sm:$0xff]   ;;  %v1216_v20 = vld [vmem:[%s1599_s1 + $0x68] sm:$0xff]  }
   0x6   :  { %1084 = vmatprep.subr.bf16.mxu1 %v1202_v6  ;;  %v1209_v13 = vld [vmem:[%s1599_s1 + $0x18] sm:$0xff]   ;;  %v1213_v17 = vld [vmem:[%s1599_s1 + $0x20] sm:$0xff]   ;;  %v1217_v21 = vld [vmem:[%s1599_s1 + $0x28] sm:$0xff]  }
   0x7   :  { %1057 = vmatpush3.bf16.msra.mxu0 %v1201_v5  ;;  %v1210_v14 = vld [vmem:[%s1599_s1 + $0xd8] sm:$0xff]   ;;  %v1214_v18 = vld [vmem:[%s1599_s1 + $0xe0] sm:$0xff]   ;;  %v1218_v22 = vld [vmem:[%s1599_s1 + $0xe8] sm:$0xff]  }
   0x8   :  { %1058 = vmatprep.subr.bf16.mxu0 %v1204_v8  ;;  %v1211_v15 = vld [vmem:[%s1599_s1 + $0x98] sm:$0xff]   ;;  %v1215_v19 = vld [vmem:[%s1599_s1 + $0xa0] sm:$0xff]   ;;  %v1219_v23 = vld [vmem:[%s1599_s1 + $0xa8] sm:$0xff]  }
   0x9   :  { %1085 = vmatpush3.bf16.msra.mxu1 %v1203_v7  ;;  %v1220_v24 = vld [vmem:[%s1599_s1 + $0x70] sm:$0xff]   ;;  %v1224_v28 = vld [vmem:[%s1599_s1 + $0x78] sm:$0xff]   ;;  %v1227_v31 = vld [vmem:[%s1600_s0] ss:$36 sps:$4 sm:$0xff]  }
   0xa   :  { %1086 = vmatprep.subr.bf16.mxu1 %v1206_v10  ;;  %v1221_v25 = vld [vmem:[%s1599_s1 + $0x30] sm:$0xff]   ;;  %v1225_v29 = vld [vmem:[%s1599_s1 + $0x38] sm:$0xff]   ;;  %v1229_v32 = vld [vmem:[%s1600_s0 + $0x4] ss:$36 sps:$4 sm:$0xff]  }
   0xb   :  { %1059 = vmatpush3.bf16.msra.mxu0 %v1205_v9  ;;  %v1222_v26 = vld [vmem:[%s1599_s1 + $0xf0] sm:$0xff]   ;;  %v1226_v30 = vld [vmem:[%s1599_s1 + $0xf8] sm:$0xff]   ;;  %742 = vmatprep.mubr.bf16.mxu0 %v1229_v32  ;;  %v1231_v34 = vld [vmem:[%s1599_s1 + $0x140] sm:$0xff]  }
   0xc   :  { %1060 = vmatprep.subr.bf16.mxu0 %v1208_v12  ;;  %v1223_v27 = vld [vmem:[%s1599_s1 + $0xb0] sm:$0xff]   ;;  %v1230_v33 = vld [vmem:[%s1599_s1 + $0xb8] sm:$0xff]   ;;  %v1232_v35 = vld [vmem:[%s1600_s0 + $0x8] ss:$36 sps:$4 sm:$0xff]  }
   0xd   :  { %1087 = vmatpush3.bf16.msra.mxu1 %v1207_v11  ;;  %v1234_v36 = vld [vmem:[%s1600_s0 + $0xc] ss:$36 sps:$4 sm:$0xff]   ;;  %v1235_v37 = vld [vmem:[%s1599_s1 + $0x100] sm:$0xff]   ;;  %v1246_v48 = vld [vmem:[%s1599_s1 + $0x158] sm:$0xff]  }
   0xe   :  { %1088 = vmatprep.subr.bf16.mxu1 %v1210_v14  ;;  %791 = vmatprep.mubr.bf16.mxu1 %v1234_v36  ;;  %v1236_v38 = vld [vmem:[%s1599_s1 + $0x1c0] sm:$0xff]   ;;  %v1238_v40 = vld [vmem:[%s1599_s1 + $0x148] sm:$0xff]   ;;  %v1242_v44 = vld [vmem:[%s1599_s1 + $0x150] sm:$0xff]  }
   0xf   :  { %1061 = vmatpush3.bf16.msra.mxu0 %v1209_v13  ;;  %v1237_v39 = vld [vmem:[%s1599_s1 + $0x180] sm:$0xff]   ;;  %v1239_v41 = vld [vmem:[%s1599_s1 + $0x108] sm:$0xff]   ;;  %v1243_v45 = vld [vmem:[%s1599_s1 + $0x110] sm:$0xff]  }
  0x10   :  { %1062 = vmatprep.subr.bf16.mxu0 %v1212_v16  ;;  %v1240_v42 = vld [vmem:[%s1599_s1 + $0x1c8] sm:$0xff]   ;;  %v1244_v46 = vld [vmem:[%s1599_s1 + $0x1d0] sm:$0xff]   ;;  %v1247_v49 = vld [vmem:[%s1599_s1 + $0x118] sm:$0xff]  }
  0x11   :  { %1089 = vmatpush3.bf16.msra.mxu1 %v1211_v15  ;;  %v1241_v43 = vld [vmem:[%s1599_s1 + $0x188] sm:$0xff]   ;;  %v1245_v47 = vld [vmem:[%s1599_s1 + $0x190] sm:$0xff]   ;;  %v1248_v50 = vld [vmem:[%s1599_s1 + $0x1d8] sm:$0xff]  }
  0x12   :  { %1090 = vmatprep.subr.bf16.mxu1 %v1214_v18  ;;  %v1249_v51 = vld [vmem:[%s1599_s1 + $0x198] sm:$0xff]   ;;  %v1250_v52 = vld [vmem:[%s1599_s1 + $0x160] sm:$0xff]   ;;  %v1254_v56 = vld [vmem:[%s1599_s1 + $0x168] sm:$0xff]  }
  0x13   :  { %1063 = vmatpush3.bf16.msra.mxu0 %v1213_v17  ;;  %v1251_v53 = vld [vmem:[%s1599_s1 + $0x120] sm:$0xff]   ;;  %v1255_v57 = vld [vmem:[%s1600_s0 + $0x4c] ss:$36 sps:$4 sm:$0xff]   ;;  %v1260_v61 = vld [vmem:[%s1600_s0 + $0x54] ss:$36 sps:$4 sm:$0xff]  }
  0x14   :  { %1064 = vmatprep.subr.bf16.mxu0 %v1216_v20  ;;  %v1252_v54 = vld [vmem:[%s1599_s1 + $0x1e0] sm:$0xff]   ;;  %v1257_v58 = vld [vmem:[%s1599_s1 + $0x128] sm:$0xff]   ;;  %v1263_v63 = vld [vmem:[%s1600_s0 + $0x50] ss:$36 sps:$4 sm:$0xff]  }
  0x15   :  { %1091 = vmatpush3.bf16.msra.mxu1 %v1215_v19  ;;  %v1253_v55 = vld [vmem:[%s1599_s1 + $0x1a0] sm:$0xff]   ;;  %v1258_v59 = vld [vmem:[%s1600_s0 + $0x48] ss:$36 sps:$4 sm:$0xff]   ;;  %v1264_v0 = vld [vmem:[%s1599_s1 + $0x170] sm:$0xff]  }
  0x16   :  { %1092 = vmatprep.subr.bf16.mxu1 %v1218_v22  ;;  %v1259_v60 = vld [vmem:[%s1599_s1 + $0x1e8] sm:$0xff]   ;;  %v1265_v1 = vld [vmem:[%s1599_s1 + $0x130] sm:$0xff]   ;;  %v1268_v4 = vld [vmem:[%s1599_s1 + $0x178] sm:$0xff]  }
  0x17   :  { %1065 = vmatpush3.bf16.msra.mxu0 %v1217_v21  ;;  %v1262_v62 = vld [vmem:[%s1599_s1 + $0x1a8] sm:$0xff]   ;;  %v1266_v2 = vld [vmem:[%s1599_s1 + $0x1f0] sm:$0xff]   ;;  %v1269_v5 = vld [vmem:[%s1599_s1 + $0x138] sm:$0xff]  }
  0x18   :  { %1066 = vmatprep.subr.bf16.mxu0 %v1220_v24  ;;  %v1267_v3 = vld [vmem:[%s1599_s1 + $0x1b0] sm:$0xff]   ;;  %v1270_v6 = vld [vmem:[%s1599_s1 + $0x1f8] sm:$0xff]   ;;  %v1275_v10 = vld [vmem:[%s1599_s1 + $0x200] sm:$0xff]  }
  0x19   :  { %1093 = vmatpush3.bf16.msra.mxu1 %v1219_v23  ;;  %v1271_v7 = vld [vmem:[%s1600_s0 + $0x10] ss:$36 sps:$4 sm:$0xff]   ;;  %v1274_v9 = vld [vmem:[%s1599_s1 + $0x1b8] sm:$0xff]   ;;  %v1279_v13 = vld [vmem:[%s1599_s1 + $0x208] sm:$0xff]  }
  0x1a   :  { %1094 = vmatprep.subr.bf16.mxu1 %v1222_v26  ;;  %v1273_v8 = vld [vmem:[%s1600_s0 + $0x14] ss:$36 sps:$4 sm:$0xff]   ;;  %v1278_v12 = vld [vmem:[%s1600_s0 + $0x1c] ss:$36 sps:$4 sm:$0xff]   ;;  %v1284_v17 = vld [vmem:[%s1600_s0 + $0x64] ss:$36 sps:$4 sm:$0xff]  }
  0x1b   :  { %1067 = vmatpush3.bf16.msra.mxu0 %v1221_v25  ;;  %v1276_v11 = vld [vmem:[%s1600_s0 + $0x18] ss:$36 sps:$4 sm:$0xff]   ;;  %v1283_v16 = vld [vmem:[%s1599_s1 + $0x210] sm:$0xff]   ;;  %v1286_v18 = vld [vmem:[%s1600_s0 + $0x60] ss:$36 sps:$4 sm:$0xff]  }
  0x1c   :  { %1068 = vmatprep.subr.bf16.mxu0 %v1224_v28  ;;  %v1280_v14 = vld [vmem:[%s1600_s0 + $0x5c] ss:$36 sps:$4 sm:$0xff]   ;;  %v1289_v22 = vld [vmem:[%s1599_s1 + $0x228] sm:$0xff]   ;;  %v1290_v23 = vld [vmem:[%s1599_s1 + $0x230] sm:$0xff]  }
  0x1d   :  { %1095 = vmatpush3.bf16.msra.mxu1 %v1223_v27  ;;  %v1282_v15 = vld [vmem:[%s1600_s0 + $0x58] ss:$36 sps:$4 sm:$0xff]   ;;  %v1288_v20 = vld [vmem:[%s1599_s1 + $0x220] sm:$0xff]   ;;  %v1293_v25 = vld [vmem:[%s1600_s0 + $0x68] ss:$36 sps:$4 sm:$0xff]  }
  0x1e   :  { %1096 = vmatprep.subr.bf16.mxu1 %v1226_v30  ;;  %v1287_v19 = vld [vmem:[%s1599_s1 + $0x218] sm:$0xff]   ;;  %v1292_v21 = vld [vmem:[%s1600_s0 + $0x20] ss:$36 sps:$4 sm:$0xff]  }
  0x1f   :  { %1069 = vmatpush3.bf16.msra.mxu0 %v1225_v29  ;;  %v1291_v24 = vld [vmem:[%s1599_s1 + $0x238] sm:$0xff]   ;;  %v963_v27 = vld [vmem:[%s1601_s2] ss:$0 sm:$0xff] }
  0x20   :  { %1110 = vmatprep.subr.bf16.mxu0 %v1231_v34 }
  0x21   :  { %1097 = vmatpush3.bf16.msra.mxu1 %v1230_v33 }
  0x22   :  { %743 = vmatmul.mubr.bf16.vlgmr.msra.gmra.mrb[0].mxu0 %v1227_v31  ;;  %1138 = vmatprep.subr.bf16.mxu1 %v1236_v38 }
  0x23   :  { %1111 = vmatpush3.bf16.msra.mxu0 %v1235_v37  ;;  %750 = vmatprep.mubr.bf16.mxu0 %v1255_v57 }
  0x24   :  { %792 = vmatmul.mubr.bf16.vlgmr.msra.gmra.mrb[0].mxu1 %v1232_v35  ;;  %1112 = vmatprep.subr.bf16.mxu0 %v1238_v40 }
  0x25   :  { %1139 = vmatpush3.bf16.msra.mxu1 %v1237_v39  ;;  %799 = vmatprep.mubr.bf16.mxu1 %v1260_v61 }
  0x26   :  { %1140 = vmatprep.subr.bf16.mxu1 %v1240_v42 }
  0x27   :  { %1113 = vmatpush3.bf16.msra.mxu0 %v1239_v41 }
  0x28   :  { %1114 = vmatprep.subr.bf16.mxu0 %v1242_v44 }
  0x29   :  { %1141 = vmatpush3.bf16.msra.mxu1 %v1241_v43 }
  0x2a   :  { %1142 = vmatprep.subr.bf16.mxu1 %v1244_v46  ;;  %751 = vmatmul.mubr.bf16.gmra.mrb[4].mxu0 %v1258_v59 }
  0x2b   :  { %1115 = vmatpush3.bf16.msra.mxu0 %v1243_v45  ;;  %840 = vmatprep.mubr.bf16.mxu0 %v1273_v8 }
  0x2c   :  { %1116 = vmatprep.subr.bf16.mxu0 %v1246_v48  ;;  %800 = vmatmul.mubr.bf16.gmra.mrb[4].mxu1 %v1263_v63 }
  0x2d   :  { %1143 = vmatpush3.bf16.msra.mxu1 %v1245_v47  ;;  %889 = vmatprep.mubr.bf16.mxu1 %v1278_v12 }
  0x2e   :  { %1144 = vmatprep.subr.bf16.mxu1 %v1248_v50 }
  0x2f   :  { %1117 = vmatpush3.bf16.msra.mxu0 %v1247_v49 }
  0x30   :  { %1118 = vmatprep.subr.bf16.mxu0 %v1250_v52 }
  0x31   :  { %1145 = vmatpush3.bf16.msra.mxu1 %v1249_v51 }
  0x32   :  { %1146 = vmatprep.subr.bf16.mxu1 %v1252_v54 }
  0x33   :  { %1119 = vmatpush3.bf16.msra.mxu0 %v1251_v53 }
  0x34   :  { %1120 = vmatprep.subr.bf16.mxu0 %v1254_v56 }
  0x35   :  { %1147 = vmatpush3.bf16.msra.mxu1 %v1253_v55 }
  0x36   :  { %1148 = vmatprep.subr.bf16.mxu1 %v1259_v60 }
  0x37   :  { %1121 = vmatpush3.bf16.msra.mxu0 %v1257_v58 }
  0x38   :  { %1122 = vmatprep.subr.bf16.mxu0 %v1264_v0 }
  0x39   :  { %1149 = vmatpush3.bf16.msra.mxu1 %v1262_v62 }
  0x3a   :  { %1150 = vmatprep.subr.bf16.mxu1 %v1266_v2 }
  0x3b   :  { %1123 = vmatpush3.bf16.msra.mxu0 %v1265_v1 }
  0x3c   :  { %1124 = vmatprep.subr.bf16.mxu0 %v1268_v4 }
  0x3d   :  { %1151 = vmatpush3.bf16.msra.mxu1 %v1267_v3 }
  0x3e   :  { %1152 = vmatprep.subr.bf16.mxu1 %v1270_v6 }
  0x3f   :  { %1125 = vmatpush3.bf16.msra.mxu0 %v1269_v5 }
  0x40   :  { %1176 = vmatprep.subr.bf16.mxu0 %v1275_v10 }
  0x41   :  { %1153 = vmatpush3.bf16.msra.mxu1 %v1274_v9 }
  0x42   :  { %841 = vmatmul.mubr.bf16.vlgmr.msra.gmra.mrb[8].mxu0 %v1271_v7 }
  0x43   :  { %1177 = vmatpush3.bf16.msra.mxu0 %v1275_v10  ;;  %848 = vmatprep.mubr.bf16.mxu0 %v1280_v14 }
  0x44   :  { %890 = vmatmul.mubr.bf16.vlgmr.msra.gmra.mrb[8].mxu1 %v1276_v11  ;;  %1178 = vmatprep.subr.bf16.mxu0 %v1279_v13 }
  0x45   :  { %897 = vmatprep.mubr.bf16.mxu1 %v1284_v17 }
  0x47   :  { %1179 = vmatpush3.bf16.msra.mxu0 %v1279_v13 }
  0x48   :  { %1180 = vmatprep.subr.bf16.mxu0 %v1283_v16 }
  0x4a   :  { %849 = vmatmul.mubr.bf16.gmra.mrb[12].mxu0 %v1282_v15 }
  0x4b   :  { %1181 = vmatpush3.bf16.msra.mxu0 %v1283_v16  ;;  %1192 = vmatprep.mubr.bf16.mxu0 %v1292_v21 }
  0x4c   :  { %898 = vmatmul.mubr.bf16.gmra.mrb[12].mxu1 %v1286_v18  ;;  %1182 = vmatprep.subr.bf16.mxu0 %v1287_v19 }
  0x4f   :  { %1183 = vmatpush3.bf16.msra.mxu0 %v1287_v19 }
  0x50   :  { %1184 = vmatprep.subr.bf16.mxu0 %v1288_v20 }
  0x53   :  { %1185 = vmatpush3.bf16.msra.mxu0 %v1288_v20 }
  0x54   :  { %1186 = vmatprep.subr.bf16.mxu0 %v1289_v22 }
  0x57   :  { %1187 = vmatpush3.bf16.msra.mxu0 %v1289_v22 }
  0x58   :  { %1188 = vmatprep.subr.bf16.mxu0 %v1290_v23 }
  0x5b   :  { %1189 = vmatpush3.bf16.msra.mxu0 %v1290_v23 }
  0x5c   :  { %1190 = vmatprep.subr.bf16.mxu0 %v1291_v24 }
  0x5f   :  { %1191 = vmatpush3.bf16.msra.mxu0 %v1291_v24 }
  0x62   :  { %1193 = vmatmul.mubr.bf16.vlgmr.msra.gmra.mrb[16].mxu0 %v1293_v25 }
  0xf5   :  { %v1070_v26 = vpop.f32.mrb[0].mxu0 }
  0xf6   :  { %v1071_v28 = vpop.f32.mrb[1].mxu0 }
  0xf7   :  { %v1072_v29 = vadd.f32 %v1071_v28, %v1070_v26  ;;  %v1073_v30 = vpop.f32.mrb[2].mxu0  ;;  %v1098_v31 = vpop.f32.mrb[0].mxu1 }
  0xf8   :  { %v1074_v32 = vpop.f32.mrb[3].mxu0  ;;  %v1099_v35 = vpop.f32.mrb[1].mxu1 }
  0xf9   :  { %v745_v33 = vadd.f32 %v1072_v29, %v963_v27  ;;  %v1075_v34 = vadd.f32 %v1074_v32, %v1073_v30  ;;  %v1100_v36 = vadd.f32 %v1099_v35, %v1098_v31  ;;  %v1101_v37 = vpop.f32.mrb[2].mxu1 }
  0xfa   :  { %v1102_v39 = vpop.f32.mrb[3].mxu1 }
  0xfb   :  { %v748_v38 = vadd.f32 %v1075_v34, %v963_v27  ;;  %v794_v40 = vadd.f32 %v1100_v36, %v745_v33  ;;  %v1103_v41 = vadd.f32 %v1102_v39, %v1101_v37 }
  0xfd   :  { %v797_v42 = vadd.f32 %v1103_v41, %v748_v38  ;;  %v1076_v43 = vpop.f32.mrb[4].mxu0 }
  0xfe   :  { %v1077_v44 = vpop.f32.mrb[5].mxu0 }
  0xff   :  { %v1078_v45 = vadd.f32 %v1077_v44, %v1076_v43  ;;  %v1079_v46 = vpop.f32.mrb[6].mxu0  ;;  %v1104_v47 = vpop.f32.mrb[4].mxu1 }
 0x100   :  { %v1080_v48 = vpop.f32.mrb[7].mxu0  ;;  %v1105_v51 = vpop.f32.mrb[5].mxu1 }
 0x101   :  { %v753_v49 = vadd.f32 %v1078_v45, %v963_v27  ;;  %v1081_v50 = vadd.f32 %v1080_v48, %v1079_v46  ;;  %v1106_v52 = vadd.f32 %v1105_v51, %v1104_v47  ;;  %v1107_v53 = vpop.f32.mrb[6].mxu1 }
 0x102   :  { %v1108_v55 = vpop.f32.mrb[7].mxu1 }
 0x103   :  { %v756_v54 = vadd.f32 %v1081_v50, %v963_v27  ;;  %v802_v56 = vadd.f32 %v1106_v52, %v753_v49  ;;  %v1109_v57 = vadd.f32 %v1108_v55, %v1107_v53 }
 0x105   :  { %v805_v58 = vadd.f32 %v1109_v57, %v756_v54 }
 0x115   :  { %v1126_v59 = vpop.f32.mrb[8].mxu0 }
 0x116   :  { %v1127_v60 = vpop.f32.mrb[9].mxu0 }
 0x117   :  { %v1128_v61 = vadd.f32 %v1127_v60, %v1126_v59  ;;  %v1129_v62 = vpop.f32.mrb[10].mxu0  ;;  %v1154_v63 = vpop.f32.mrb[8].mxu1 }
 0x118   :  { %v1130_v0 = vpop.f32.mrb[11].mxu0  ;;  %v1155_v3 = vpop.f32.mrb[9].mxu1 }
 0x119   :  { %v843_v1 = vadd.f32 %v1128_v61, %v794_v40  ;;  %v1131_v2 = vadd.f32 %v1130_v0, %v1129_v62  ;;  %v1156_v4 = vadd.f32 %v1155_v3, %v1154_v63  ;;  %v1157_v5 = vpop.f32.mrb[10].mxu1 }
 0x11a   :  { %v1158_v7 = vpop.f32.mrb[11].mxu1 }
 0x11b   :  { %v846_v6 = vadd.f32 %v1131_v2, %v797_v42  ;;  %v1159_v8 = vadd.f32 %v1158_v7, %v1157_v5  ;;  %v892_v9 = vadd.f32 %v1156_v4, %v843_v1 }
 0x11d   :  { %v1132_v10 = vpop.f32.mrb[12].mxu0  ;;  %v895_v12 = vadd.f32 %v1159_v8, %v846_v6 }
 0x11e   :  { %v1133_v11 = vpop.f32.mrb[13].mxu0 }
 0x11f   :  { %v1134_v13 = vadd.f32 %v1133_v11, %v1132_v10  ;;  %v1135_v14 = vpop.f32.mrb[14].mxu0  ;;  %v1160_v15 = vpop.f32.mrb[12].mxu1 }
 0x120   :  { %v1136_v16 = vpop.f32.mrb[15].mxu0  ;;  %v1161_v19 = vpop.f32.mrb[13].mxu1 }
 0x121   :  { %v851_v17 = vadd.f32 %v1134_v13, %v802_v56  ;;  %v1137_v18 = vadd.f32 %v1136_v16, %v1135_v14  ;;  %v1162_v20 = vadd.f32 %v1161_v19, %v1160_v15  ;;  %v1163_v21 = vpop.f32.mrb[14].mxu1 }
 0x122   :  { %v1164_v23 = vpop.f32.mrb[15].mxu1 }
 0x123   :  { %v854_v22 = vadd.f32 %v1137_v18, %v805_v58  ;;  %v1165_v24 = vadd.f32 %v1164_v23, %v1163_v21  ;;  %v900_v25 = vadd.f32 %v1162_v20, %v851_v17 }
 0x125   :  { %v903_v26 = vadd.f32 %v1165_v24, %v854_v22 }
 0x135   :  { %v1194_v27 = vpop.f32.mrb[16].mxu0 }
 0x136   :  { %v949_v28 = vadd.f32 %v1194_v27, %v900_v25  ;;  %v940_v29 = vpop.f32.mrb[17].mxu0 }
 0x137   :  { %v941_v30 = vadd.f32 %v940_v29, %v892_v9  ;;  %v1195_v31 = vpop.f32.mrb[18].mxu0 }
 0x138   :  { %957 = vst [vmem:[%s1602_s3 + $0x10] sm:$0xff] %v949_v28  ;;  %v952_v32 = vadd.f32 %v1195_v31, %v903_v26  ;;  %v943_v33 = vpop.f32.mrb[19].mxu0 }
 0x139   :  { %955 = vst [vmem:[%s1602_s3] sm:$0xff] %v941_v30  ;;  %v944_v34 = vadd.f32 %v943_v33, %v895_v12 }
 0x13a   :  { %958 = vst [vmem:[%s1602_s3 + $0x18] sm:$0xff] %v952_v32 }
 0x13b   :  { %956 = vst [vmem:[%s1602_s3 + $0x8] sm:$0xff] %v944_v34 }

// kernel: vqvae_forward.16
= control target key start
LH: loop header
LB: loop body
LE: loop exit
PB: predicated region body
PF: predicated region fallthrough
CT: control target
= control target key end

     0   :  { %vm18_vm0 = vcmask 0   ;;  %v495_v3 = vmov 0.0|0.0   ;;  %v496_v7 = vmov 0.0   ;;  %vm497_vm1 = vmmov 0   ;;  %s610_s0 = inlined_call_operand.vmem [shape: f32[8,128], index: 0, kind: input, shape index: {}]   ;;  %s611_s1 = inlined_call_operand.vmem [shape: f32[128,128], index: 1, kind: input, shape index: {}]   ;;  %s612_s2 = inlined_call_operand.vmem [shape: f32[8,128], index: 2, kind: output, shape index: {0}]   ;;  %s613_s3 = inlined_call_operand.hbm [shape: f32[1,1], index: 3, kind: output, shape index: {1}]  }
   0x1   :  { %v21_v0 = vld [vmem:[%s611_s1] sm:$0xff]  ;;  %v22_v1 = vld [vmem:[%s611_s1 + $0x8] sm:$0xff]  ;;  %v23_v2 = vld [vmem:[%s611_s1 + $0x10] sm:$0xff]  ;;  %416 = vmatprep.subr.bf16.mxu0 %v495_v3  ;;  %19 = vst.msk [vmem:[#allocation2] sm:$0x1] %vm18_vm0, %v496_v7  ;;  %440 = vmatprep.subr.bf16.mxu1 %v495_v3 }
   0x2   :  { %v417_v4 = vpack.c.bf16 %v22_v1, %v21_v0  ;;  %v40_v5 = vmul.f32 %v21_v0, %v21_v0  ;;  %v42_v6 = vmul.f32 %v23_v2, %v23_v2  ;;  %v41_v8 = vmul.f32 %v22_v1, %v22_v1  ;;  %v24_v9 = vld [vmem:[%s611_s1 + $0x18] sm:$0xff]  ;;  %378 = vmatprep.mubr.msk.f32.mxu0 %vm497_vm1, %v496_v7 }
   0x3   :  { %v43_v10 = vmul.f32 %v24_v9, %v24_v9 }
   0x4   :  { %418 = vmatpush3.bf16.xpose.msra.mxu0 %v417_v4  ;;  %56 = vadd.xlane.f32.xlu0 %v40_v5 }
   0x5   :  { %419 = vmatprep.subr.bf16.mxu0 %v495_v3  ;;  %60 = vadd.xlane.f32.xlu1 %v42_v6 }
   0x6   :  { %9 = vsyncpa [#allocation3], 0  ;;  %v25_v11 = vld [vmem:[%s611_s1 + $0x20] sm:$0xff]  ;;  %442 = vmatpush3.bf16.msra.mxu1 %v417_v4  ;;  %v420_v12 = vpack.c.bf16 %v24_v9, %v23_v2  ;;  %v26_v13 = vld [vmem:[%s611_s1 + $0x28] sm:$0xff]  ;;  %413 = vmatprep.mubr.msk.f32.mxu1 %vm497_vm1, %v496_v7  ;;  %v190_v60 = vlaneseq  ;;  %v498_v9 = vmov 1.0   ;;  %s499_s21 = smov [#allocation2]  }
   0x7   :  { %v44_v14 = vmul.f32 %v25_v11, %v25_v11  ;;  %443 = vmatprep.subr.bf16.mxu1 %v495_v3  ;;  %v45_v15 = vmul.f32 %v26_v13, %v26_v13  ;;  %v27_v16 = vld [vmem:[%s611_s1 + $0x30] sm:$0xff]  ;;  %v28_v17 = vld [vmem:[%s611_s1 + $0x38] sm:$0xff]  ;;  %v423_v19 = vpack.c.bf16 %v26_v13, %v25_v11  ;;  %v29_v21 = vld [vmem:[%s611_s1 + $0x40] sm:$0xff]  ;;  %s300_s22 = sshll.u32 %s499_s21, 4  ;;  %s301_s22 = int_to_ptr.vmem [resolvable:$true] %s300_s22 }
   0x8   :  { %58 = vadd.xlane.f32.xlu0 %v41_v8  ;;  %v46_v18 = vmul.f32 %v27_v16, %v27_v16  ;;  %v47_v20 = vmul.f32 %v28_v17, %v28_v17  ;;  %v30_v22 = vld [vmem:[%s611_s1 + $0x48] sm:$0xff]  ;;  %v48_v23 = vmul.f32 %v29_v21, %v29_v21  ;;  %v426_v24 = vpack.c.bf16 %v28_v17, %v27_v16  ;;  %v31_v26 = vld [vmem:[%s611_s1 + $0x50] sm:$0xff]  ;;  %v32_v27 = vld [vmem:[%s611_s1 + $0x58] sm:$0xff]  ;;  %s475_s23 = scalar_lea.vmem %s301_s22, 32  ;;  %p476_p1 = scmp.lt.s32.totalorder %s301_s22, %s301_s22 }
   0x9   :  { %62 = vadd.xlane.f32.xlu1 %v43_v10  ;;  %v49_v25 = vmul.f32 %v30_v22, %v30_v22  ;;  %v50_v28 = vmul.f32 %v31_v26, %v31_v26  ;;  %v429_v29 = vpack.c.bf16 %v30_v22, %v29_v21  ;;  %v51_v30 = vmul.f32 %v32_v27, %v32_v27  ;;  %v33_v31 = vld [vmem:[%s611_s1 + $0x60] sm:$0xff]  ;;  %v34_v32 = vld [vmem:[%s611_s1 + $0x68] sm:$0xff]  ;;  %v35_v36 = vld [vmem:[%s611_s1 + $0x70] sm:$0xff] }
   0xa   :  { %445 = vmatpush3.bf16.msra.mxu1 %v420_v12  ;;  %v52_v33 = vmul.f32 %v33_v31, %v33_v31  ;;  %v432_v34 = vpack.c.bf16 %v32_v27, %v31_v26  ;;  %v53_v35 = vmul.f32 %v34_v32, %v34_v32  ;;  %v36_v37 = vld [vmem:[%s611_s1 + $0x78] sm:$0xff]  ;;  %v54_v38 = vmul.f32 %v35_v36, %v35_v36  ;;  %v584_v41 = vld [vmem:[%s610_s0] sm:$0xff] }
   0xb   :  { %446 = vmatprep.subr.bf16.mxu1 %v495_v3  ;;  %v435_v39 = vpack.c.bf16 %v34_v32, %v33_v31  ;;  %v55_v40 = vmul.f32 %v36_v37, %v36_v37  ;;  %v37_v42 = vmul.f32 %v584_v41, %v584_v41  ;;  %v438_v43 = vpack.c.bf16 %v36_v37, %v35_v36  ;;  %v276_v21 = vld [vmem:[#allocation2] sm:$0x1] }
   0xc   :  { %421 = vmatpush3.bf16.xpose.msra.mxu0 %v420_v12  ;;  %64 = vadd.xlane.f32.xlu0 %v44_v14  ;;  %v191_v61 = vshrl.u32 %v190_v60, 7  ;;  %v200_v7 = vand.u32 127, %v190_v60 }
   0xd   :  { %422 = vmatprep.subr.bf16.mxu0 %v495_v3  ;;  %66 = vadd.xlane.f32.xlu1 %v45_v15 }
   0xe   :  { %448 = vmatpush3.bf16.msra.mxu1 %v423_v19  ;;  %v192_v62 = vsub.s32 0, %v191_v61 }
   0xf   :  { %449 = vmatprep.subr.bf16.mxu1 %v495_v3 }
  0x10   :  { %68 = vadd.xlane.f32.xlu0 %v46_v18 }
  0x11   :  { %70 = vadd.xlane.f32.xlu1 %v47_v20 }
  0x12   :  { %451 = vmatpush3.bf16.msra.mxu1 %v426_v24 }
  0x13   :  { %452 = vmatprep.subr.bf16.mxu1 %v495_v3 }
  0x14   :  { %424 = vmatpush3.bf16.xpose.msra.mxu0 %v423_v19  ;;  %72 = vadd.xlane.f32.xlu0 %v48_v23 }
  0x15   :  { %425 = vmatprep.subr.bf16.mxu0 %v495_v3  ;;  %74 = vadd.xlane.f32.xlu1 %v49_v25 }
  0x16   :  { %454 = vmatpush3.bf16.msra.mxu1 %v429_v29 }
  0x17   :  { %455 = vmatprep.subr.bf16.mxu1 %v495_v3 }
  0x18   :  { %76 = vadd.xlane.f32.xlu0 %v50_v28 }
  0x19   :  { %78 = vadd.xlane.f32.xlu1 %v51_v30 }
  0x1a   :  { %457 = vmatpush3.bf16.msra.mxu1 %v432_v34 }
  0x1b   :  { %458 = vmatprep.subr.bf16.mxu1 %v495_v3 }
  0x1c   :  { %427 = vmatpush3.bf16.xpose.msra.mxu0 %v426_v24  ;;  %80 = vadd.xlane.f32.xlu0 %v52_v33 }
  0x1d   :  { %428 = vmatprep.subr.bf16.mxu0 %v495_v3  ;;  %82 = vadd.xlane.f32.xlu1 %v53_v35 }
  0x1e   :  { %460 = vmatpush3.bf16.msra.mxu1 %v435_v39 }
  0x1f   :  { %461 = vmatprep.subr.bf16.mxu1 %v495_v3 }
  0x20   :  { %84 = vadd.xlane.f32.xlu0 %v54_v38 }
  0x21   :  { %86 = vadd.xlane.f32.xlu1 %v55_v40 }
  0x22   :  { %463 = vmatpush3.bf16.msra.mxu1 %v438_v43 }
  0x24   :  { %430 = vmatpush3.bf16.xpose.msra.mxu0 %v429_v29  ;;  %38 = vadd.xlane.f32.xlu0 %v37_v42 }
  0x25   :  { %431 = vmatprep.subr.bf16.mxu0 %v495_v3 }
  0x2c   :  { %433 = vmatpush3.bf16.xpose.msra.mxu0 %v432_v34 }
  0x2d   :  { %434 = vmatprep.subr.bf16.mxu0 %v495_v3 }
  0x34   :  { %436 = vmatpush3.bf16.xpose.msra.mxu0 %v435_v39 }
  0x35   :  { %437 = vmatprep.subr.bf16.mxu0 %v495_v3 }
  0x3c   :  { %439 = vmatpush3.bf16.xpose.msra.mxu0 %v438_v43 }
  0x43   :  { %379 = vmatmul.mubr.f32.vlgmr.msra.gmra.mrb[0].mxu0 %v584_v41 }
  0x91   :  { %v57_v44 = vpop.xlane.xlu0 %56 }
  0x92   :  { %158 = vxpose.xlu1.b32.start [1/16] (narrow) %v57_v44, 8  ;;  %v61_v46 = vpop.xlane.xlu1 %60 }
  0x95   :  { %v59_v45 = vpop.xlane.xlu0 %58 }
  0x96   :  { %159 = vxpose.xlu1.b32.cont [2/16] (narrow) %v59_v45, 8  ;;  %v63_v47 = vpop.xlane.xlu1 %62 }
  0x99   :  { %v65_v48 = vpop.xlane.xlu0 %64 }
  0x9a   :  { %160 = vxpose.xlu1.b32.cont [3/16] (narrow) %v61_v46, 8  ;;  %v67_v49 = vpop.xlane.xlu1 %66 }
  0x9d   :  { %v69_v50 = vpop.xlane.xlu0 %68 }
  0x9e   :  { %161 = vxpose.xlu1.b32.cont [4/16] (narrow) %v63_v47, 8  ;;  %v71_v51 = vpop.xlane.xlu1 %70 }
  0xa1   :  { %v73_v52 = vpop.xlane.xlu0 %72 }
  0xa2   :  { %162 = vxpose.xlu1.b32.cont [5/16] (narrow) %v65_v48, 8  ;;  %v75_v53 = vpop.xlane.xlu1 %74 }
  0xa5   :  { %v77_v54 = vpop.xlane.xlu0 %76 }
  0xa6   :  { %163 = vxpose.xlu1.b32.cont [6/16] (narrow) %v67_v49, 8  ;;  %v79_v55 = vpop.xlane.xlu1 %78 }
  0xa9   :  { %v81_v56 = vpop.xlane.xlu0 %80 }
  0xaa   :  { %164 = vxpose.xlu1.b32.cont [7/16] (narrow) %v69_v50, 8  ;;  %v83_v57 = vpop.xlane.xlu1 %82 }
  0xad   :  { %v85_v58 = vpop.xlane.xlu0 %84 }
  0xae   :  { %165 = vxpose.xlu1.b32.cont [8/16] (narrow) %v71_v51, 8  ;;  %v87_v59 = vpop.xlane.xlu1 %86 }
  0xb1   :  { %v39_v0 = vpop.xlane.xlu0 %38 }
  0xb2   :  { %166 = vxpose.xlu1.b32.cont [9/16] (narrow) %v73_v52, 8 }
  0xb6   :  { %167 = vxpose.xlu1.b32.cont [10/16] (narrow) %v75_v53, 8 }
  0xba   :  { %168 = vxpose.xlu1.b32.cont [11/16] (narrow) %v77_v54, 8 }
  0xbe   :  { %169 = vxpose.xlu1.b32.cont [12/16] (narrow) %v79_v55, 8 }
  0xc2   :  { %170 = vxpose.xlu1.b32.cont [13/16] (narrow) %v81_v56, 8 }
  0xc6   :  { %171 = vxpose.xlu1.b32.cont [14/16] (narrow) %v83_v57, 8 }
  0xca   :  { %172 = vxpose.xlu1.b32.cont [15/16] (narrow) %v85_v58, 8 }
  0xce   :  { %173 = vxpose.xlu1.b32.end [16/16] (narrow) %v87_v59, 8 }
 0x112   :  { %v174_v63 = vpop.trf.xlu1 }
 0x113   :  { %v193_v1 = vrot.slane %v174_v63, %v192_v62 }
 0x115   :  { %v194_v2 = vadd.f32 %v193_v1, %v39_v0 }
 0x116   :  { %v154_v3 = vpop.f32.mrb[0].mxu0 }
 0x117   :  { %v195_v4 = vmul.f32 2.0, %v154_v3  ;;  %v380_v5 = vpop.f32.mrb[1].mxu0 }
 0x119   :  { %v196_v6 = vsub.f32 %v194_v2, %v195_v4 }
 0x11b   :  { %197 = vmin.index.xlane.f32.xlu0 %v196_v6 }
 0x1a8   :  { %v198_v8 = vpop.xlane.xlu0 %197 }
 0x1a9   :  { %vm201_vm2 = vcmp.eq.s32.totalorder %v200_v7, %v198_v8 }
 0x1aa   :  { %414 = vmatmul.mubr.msk.f32.vlgmr.msra.gmra.mrb[0].mxu1 %vm201_vm2, %v498_v9 }
 0x27d   :  { %v270_v10 = vpop.f32.mrb[0].mxu1 }
 0x27e   :  { %274 = vst [vmem:[%s612_s2] sm:$0xff] %v270_v10  ;;  %v275_v11 = vsub.f32 %v270_v10, %v584_v41  ;;  %v415_v12 = vpop.f32.mrb[1].mxu1  ;;  %s471_s2 = scalar_lea.vmem %s301_s22, 16 }
 0x27f   :  { %p472_p0 = scmp.ne.s32.totalorder %s301_s22, %s471_s2  ;;  %p477_p2 = scmp.lt.s32.totalorder %s475_s23, %s471_s2 }
 0x280   :  { %v277_v13 = vmul.f32 %v275_v11, %v275_v11 }
 0x281   :  { %p478_p3 = por %p477_p2, %p476_p1 }
 0x282   :  { %278 = vadd.xlane.f32.xlu0 %v277_v13 }
 0x283   :  { %p479_p4 = pnand %p478_p3, %p472_p0 }
 0x30f   :  { %v279_v14 = vpop.xlane.xlu0 %278 }
 0x310   :  { %v280_v15 = vrot.slane %v279_v14, 4 }
 0x312   :  { %v281_v16 = vadd.f32 %v280_v15, %v279_v14 }
 0x314   :  { %v282_v17 = vrot.slane %v281_v16, 2 }
 0x316   :  { %v283_v18 = vadd.f32 %v282_v17, %v281_v16 }
 0x318   :  { %v284_v19 = vrot.slane %v283_v18, 1 }
 0x31a   :  { %v285_v20 = vadd.f32 %v284_v19, %v283_v18 }
 0x31c   :  { %464 = vpush %v285_v20 }
 0x34d   :  { %s465_s19 = spop %464 }
 0x34e   :  { %s287_s20 = smul.f32 0.0024414063, %s465_s19 }
 0x350   :  { %v288_v22 = vstv %s287_s20 }
 0x351   :  { %v289_v23 = vadd.f32 %v288_v22, %v276_v21 }
 0x353   :  { %291 = vst.msk [vmem:[#allocation2] sm:$0x1] %vm18_vm0, %v289_v23 }
 0x354   :  { %482 = shalt.err (!%p479_p4)
}
 0x355   :  { %s483_s26 = scalar_lea.hbm %s613_s3, 16 }
 0x356   :  { %p484_p5 = scmp.ne.s32.totalorder %s613_s3, %s483_s26  ;;  %p487_p6 = scmp.lt.u32.totalorder %s483_s26, %s613_s3 }
 0x358   :  { %p489_p7 = pnand %p487_p6, %p484_p5 }
 0x35a   :  { %492 = shalt.err (!%p489_p7)
}
 0x35b   :  { %303 = dma.vmem_to_hbm [thread:$0]  %s301_s22, 16, %s613_s3, [#allocation3]  }
 0x35c   :  { %493 = dma.done.wait [#allocation3], 16  }
 0x35d   :  { %494 = vsyncadd [#allocation3], 4294967280 }
 0x35e   :  { %309 = vsyncpa [#allocation3], 1 }

// kernel: tile.19
= control target key start
LH: loop header
LB: loop body
LE: loop exit
PB: predicated region body
PF: predicated region fallthrough
CT: control target
= control target key end

     0   :  { %s6_s8 = smov 3  ;;  %vm8_vm0 = vcmask 523264   ;;  %s30_s9 = smov 64   ;;  %vm15_vm1 = vcmask 1048064   ;;  %s50_s0 = inlined_call_operand.vmem [shape: f32[4,64], index: 0, kind: input, shape index: {}]   ;;  %s51_s1 = inlined_call_operand.vmem [shape: f32[1,256], index: 1, kind: output, shape index: {}]  }
   0x1   :  { %v4_v0 = vld [vmem:[%s50_s0] sm:$0xf]  ;;  %s11_s0 = smov 3 }
   0x2   :  { %5 = vst [vmem:[#allocation1] sm:$0xf] %v4_v0 }
   0x9   :  { %v12_v1 = vld [vmem:[#allocation1 + $0x1] ss:$2 sm:%s11_s0]   ;;  %v7_v2 = vld [vmem:[#allocation1] ss:$2 sm:%s6_s8]  }
   0xa   :  { %13 = vrot.lane.b32.xlu0 %v12_v1, %s30_s9  ;;  %9 = vst.msk [vmem:[#allocation0] ss:$8 sm:$0x3] %vm8_vm0, %v7_v2  }
  0x7c   :  { %v14_v3 = vpop.permute.xlu0 %13  }
  0x7d   :  { %16 = vst.msk [vmem:[#allocation0] ss:$8 sm:$0x3] %vm15_vm1, %v14_v3  }
  0x84   :  { %v20_v4 = vld [vmem:[#allocation0] sm:$0x1]  ;;  %v24_v5 = vld [vmem:[#allocation0 + $0x8] sm:$0x1] }
  0x85   :  { %22 = vst [vmem:[%s51_s1] sm:$0x1] %v20_v4  ;;  %28 = vst [vmem:[%s51_s1 + $0x1] sm:$0x1] %v24_v5 }

// kernel: tile.18
= control target key start
LH: loop header
LB: loop body
LE: loop exit
PB: predicated region body
PF: predicated region fallthrough
CT: control target
= control target key end

     0   :  { %s22_s0 = inlined_call_operand.vmem [shape: f32[64], index: 0, kind: input, shape index: {}]   ;;  %s23_s1 = inlined_call_operand.vmem [shape: f32[4,64], index: 1, kind: output, shape index: {}]  }
   0x1   :  { %v4_v0 = vld [vmem:[%s22_s0] ss:$0 sm:$0xff] }
   0x2   :  { %5 = vst [vmem:[%s23_s1] sm:$0xf] %v4_v0 }

// kernel: vqvae_forward.17
= control target key start
LH: loop header
LB: loop body
LE: loop exit
PB: predicated region body
PF: predicated region fallthrough
CT: control target
= control target key end

     0   :  { %vm479_vm0 = vcmask 523264   ;;  %s1069_s1 = inlined_call_operand.vmem [shape: bf16[576,256], index: 1, kind: input, shape index: {}]   ;;  %s1070_s0 = inlined_call_operand.vmem [shape: bf16[8,576], index: 0, kind: input, shape index: {}]   ;;  %s1071_s2 = inlined_call_operand.vmem [shape: f32[1,256], index: 2, kind: input, shape index: {}]   ;;  %s1072_s3 = inlined_call_operand.vmem [shape: f32[8,256], index: 3, kind: output, shape index: {}]  }
   0x1   :  { %v701_v0 = vld [vmem:[%s1069_s1 + $0x104] ss:$8 sps:$4 sm:$0xff]   ;;  %v703_v1 = vld [vmem:[%s1069_s1 + $0x100] ss:$8 sps:$4 sm:$0xff]   ;;  %v704_v2 = vld [vmem:[%s1069_s1 + $0x114] ss:$8 sps:$4 sm:$0xff]  }
   0x2   :  { %524 = vmatprep.subr.bf16.mxu0 %v701_v0  ;;  %v706_v3 = vld [vmem:[%s1069_s1 + $0x110] ss:$8 sps:$4 sm:$0xff]   ;;  %v707_v4 = vld [vmem:[%s1069_s1 + $0x124] ss:$8 sps:$4 sm:$0xff]   ;;  %v712_v6 = vld [vmem:[%s1069_s1] ss:$8 sps:$4 sm:$0xff]  }
   0x3   :  { %525 = vmatpush1.bf16.msra.mxu0 %v703_v1  ;;  %v710_v5 = vld [vmem:[%s1069_s1 + $0x4] ss:$8 sps:$4 sm:$0xff]   ;;  %v709_v7 = vld [vmem:[%s1069_s1 + $0x120] ss:$8 sps:$4 sm:$0xff]   ;;  %v716_v8 = vld [vmem:[%s1069_s1 + $0x14] ss:$8 sps:$4 sm:$0xff]  }
   0x4   :  { %526 = vmatprep.subr.bf16.mxu0 %v704_v2  ;;  %483 = vmatprep.subr.bf16.mxu1 %v710_v5  ;;  %v718_v9 = vld [vmem:[%s1069_s1 + $0x10] ss:$8 sps:$4 sm:$0xff]   ;;  %v713_v10 = vld [vmem:[%s1069_s1 + $0x134] ss:$8 sps:$4 sm:$0xff]   ;;  %v722_v12 = vld [vmem:[%s1069_s1 + $0x24] ss:$8 sps:$4 sm:$0xff]  }
   0x5   :  { %484 = vmatpush1.bf16.msra.mxu1 %v712_v6  ;;  %v715_v11 = vld [vmem:[%s1069_s1 + $0x130] ss:$8 sps:$4 sm:$0xff]   ;;  %v719_v13 = vld [vmem:[%s1069_s1 + $0x144] ss:$8 sps:$4 sm:$0xff]   ;;  %v724_v14 = vld [vmem:[%s1069_s1 + $0x20] ss:$8 sps:$4 sm:$0xff]  }
   0x6   :  { %485 = vmatprep.subr.bf16.mxu1 %v716_v8  ;;  %v728_v15 = vld [vmem:[%s1069_s1 + $0x34] ss:$8 sps:$4 sm:$0xff]   ;;  %v721_v16 = vld [vmem:[%s1069_s1 + $0x140] ss:$8 sps:$4 sm:$0xff]   ;;  %v730_v18 = vld [vmem:[%s1069_s1 + $0x30] ss:$8 sps:$4 sm:$0xff]  }
   0x7   :  { %527 = vmatpush1.bf16.msra.mxu0 %v706_v3  ;;  %v725_v17 = vld [vmem:[%s1069_s1 + $0x154] ss:$8 sps:$4 sm:$0xff]   ;;  %v734_v19 = vld [vmem:[%s1069_s1 + $0x44] ss:$8 sps:$4 sm:$0xff]   ;;  %v727_v20 = vld [vmem:[%s1069_s1 + $0x150] ss:$8 sps:$4 sm:$0xff]  }
   0x8   :  { %528 = vmatprep.subr.bf16.mxu0 %v707_v4  ;;  %v731_v21 = vld [vmem:[%s1069_s1 + $0x164] ss:$8 sps:$4 sm:$0xff]   ;;  %v736_v22 = vld [vmem:[%s1069_s1 + $0x40] ss:$8 sps:$4 sm:$0xff]   ;;  %v740_v23 = vld [vmem:[%s1069_s1 + $0x54] ss:$8 sps:$4 sm:$0xff]  }
   0x9   :  { %486 = vmatpush1.bf16.msra.mxu1 %v718_v9  ;;  %v733_v24 = vld [vmem:[%s1069_s1 + $0x160] ss:$8 sps:$4 sm:$0xff]   ;;  %v737_v25 = vld [vmem:[%s1069_s1 + $0x174] ss:$8 sps:$4 sm:$0xff]   ;;  %v742_v26 = vld [vmem:[%s1069_s1 + $0x50] ss:$8 sps:$4 sm:$0xff]  }
   0xa   :  { %487 = vmatprep.subr.bf16.mxu1 %v722_v12  ;;  %v746_v27 = vld [vmem:[%s1069_s1 + $0x64] ss:$8 sps:$4 sm:$0xff]   ;;  %v739_v28 = vld [vmem:[%s1069_s1 + $0x170] ss:$8 sps:$4 sm:$0xff]   ;;  %v748_v30 = vld [vmem:[%s1069_s1 + $0x60] ss:$8 sps:$4 sm:$0xff]  }
   0xb   :  { %529 = vmatpush1.bf16.msra.mxu0 %v709_v7  ;;  %v743_v29 = vld [vmem:[%s1069_s1 + $0x184] ss:$8 sps:$4 sm:$0xff]   ;;  %v752_v31 = vld [vmem:[%s1069_s1 + $0x74] ss:$8 sps:$4 sm:$0xff]   ;;  %v745_v32 = vld [vmem:[%s1069_s1 + $0x180] ss:$8 sps:$4 sm:$0xff]  }
   0xc   :  { %530 = vmatprep.subr.bf16.mxu0 %v713_v10  ;;  %v749_v33 = vld [vmem:[%s1069_s1 + $0x194] ss:$8 sps:$4 sm:$0xff]   ;;  %v754_v34 = vld [vmem:[%s1069_s1 + $0x70] ss:$8 sps:$4 sm:$0xff]   ;;  %v758_v35 = vld [vmem:[%s1069_s1 + $0x84] ss:$8 sps:$4 sm:$0xff]  }
   0xd   :  { %488 = vmatpush1.bf16.msra.mxu1 %v724_v14  ;;  %v751_v36 = vld [vmem:[%s1069_s1 + $0x190] ss:$8 sps:$4 sm:$0xff]   ;;  %v755_v37 = vld [vmem:[%s1069_s1 + $0x1a4] ss:$8 sps:$4 sm:$0xff]   ;;  %v760_v38 = vld [vmem:[%s1069_s1 + $0x80] ss:$8 sps:$4 sm:$0xff]  }
   0xe   :  { %489 = vmatprep.subr.bf16.mxu1 %v728_v15  ;;  %v764_v39 = vld [vmem:[%s1069_s1 + $0x94] ss:$8 sps:$4 sm:$0xff]   ;;  %v757_v40 = vld [vmem:[%s1069_s1 + $0x1a0] ss:$8 sps:$4 sm:$0xff]   ;;  %v766_v42 = vld [vmem:[%s1069_s1 + $0x90] ss:$8 sps:$4 sm:$0xff]  }
   0xf   :  { %531 = vmatpush1.bf16.msra.mxu0 %v715_v11  ;;  %v761_v41 = vld [vmem:[%s1069_s1 + $0x1b4] ss:$8 sps:$4 sm:$0xff]   ;;  %v770_v43 = vld [vmem:[%s1069_s1 + $0xa4] ss:$8 sps:$4 sm:$0xff]   ;;  %v763_v46 = vld [vmem:[%s1069_s1 + $0x1b0] ss:$8 sps:$4 sm:$0xff]  }
  0x10   :  { %532 = vmatprep.subr.bf16.mxu0 %v719_v13  ;;  %v16_v44 = vld [vmem:[%s1070_s0 + $0x8] sm:$0xff]  ;;  %v776_v49 = vld [vmem:[%s1069_s1 + $0xb4] ss:$8 sps:$4 sm:$0xff]   ;;  %v778_v52 = vld [vmem:[%s1069_s1 + $0xb0] ss:$8 sps:$4 sm:$0xff]   ;;  %v814_v11 = vmov 0  }
  0x11   :  { %490 = vmatpush1.bf16.msra.mxu1 %v730_v18  ;;  %v617_v45 = vcombine.high %v16_v44, %v16_v44  ;;  %v772_v47 = vld [vmem:[%s1069_s1 + $0xa0] ss:$8 sps:$4 sm:$0xff]   ;;  %v767_v48 = vld [vmem:[%s1069_s1 + $0x1c4] ss:$8 sps:$4 sm:$0xff]   ;;  %v773_v51 = vld [vmem:[%s1069_s1 + $0x1d4] ss:$8 sps:$4 sm:$0xff]   ;;  %v616_v4 = vcombine.low %v16_v44, %v16_v44 }
  0x12   :  { %491 = vmatprep.subr.bf16.mxu1 %v734_v19  ;;  %v769_v50 = vld [vmem:[%s1069_s1 + $0x1c0] ss:$8 sps:$4 sm:$0xff]   ;;  %v782_v54 = vld [vmem:[%s1069_s1 + $0xc4] ss:$8 sps:$4 sm:$0xff]   ;;  %v775_v56 = vld [vmem:[%s1069_s1 + $0x1d0] ss:$8 sps:$4 sm:$0xff]  }
  0x13   :  { %533 = vmatpush1.bf16.msra.mxu0 %v721_v16  ;;  %556 = vmatprep.mubr.bf16.mxu0 %v617_v45  ;;  %v15_v53 = vld [vmem:[%s1070_s0] sm:$0xff]  ;;  %v788_v59 = vld [vmem:[%s1069_s1 + $0xd4] ss:$8 sps:$4 sm:$0xff]   ;;  %v790_v61 = vld [vmem:[%s1069_s1 + $0xd0] ss:$8 sps:$4 sm:$0xff]   ;;  %v92_v16 = vlaneseq }
  0x14   :  { %534 = vmatprep.subr.bf16.mxu0 %v725_v17  ;;  %v615_v55 = vcombine.high %v15_v53, %v15_v53  ;;  %v784_v57 = vld [vmem:[%s1069_s1 + $0xc0] ss:$8 sps:$4 sm:$0xff]   ;;  %v779_v58 = vld [vmem:[%s1069_s1 + $0x1e4] ss:$8 sps:$4 sm:$0xff]   ;;  %v785_v62 = vld [vmem:[%s1069_s1 + $0x1f4] ss:$8 sps:$4 sm:$0xff]   ;;  %v614_v8 = vcombine.low %v15_v53, %v15_v53 }
  0x15   :  { %492 = vmatpush1.bf16.msra.mxu1 %v736_v22  ;;  %v781_v60 = vld [vmem:[%s1069_s1 + $0x1e0] ss:$8 sps:$4 sm:$0xff]   ;;  %v797_v63 = vld [vmem:[%s1069_s1 + $0xe4] ss:$8 sps:$4 sm:$0xff]   ;;  %v787_v0 = vld [vmem:[%s1069_s1 + $0x1f0] ss:$8 sps:$4 sm:$0xff]  }
  0x16   :  { %493 = vmatprep.subr.bf16.mxu1 %v740_v23  ;;  %515 = vmatprep.mubr.bf16.mxu1 %v615_v55  ;;  %v799_v1 = vld [vmem:[%s1069_s1 + $0xe0] ss:$8 sps:$4 sm:$0xff]   ;;  %v796_v2 = vld [vmem:[%s1069_s1 + $0x204] ss:$8 sps:$4 sm:$0xff]   ;;  %v803_v3 = vld [vmem:[%s1069_s1 + $0xf4] ss:$8 sps:$4 sm:$0xff]  }
  0x17   :  { %535 = vmatpush1.bf16.msra.mxu0 %v727_v20  ;;  %v794_v5 = vld [vmem:[%s1069_s1 + $0x200] ss:$8 sps:$4 sm:$0xff]   ;;  %v805_v6 = vld [vmem:[%s1069_s1 + $0xf0] ss:$8 sps:$4 sm:$0xff]   ;;  %v802_v7 = vld [vmem:[%s1069_s1 + $0x214] ss:$8 sps:$4 sm:$0xff]  }
  0x18   :  { %536 = vmatprep.subr.bf16.mxu0 %v731_v21  ;;  %v800_v9 = vld [vmem:[%s1069_s1 + $0x210] ss:$8 sps:$4 sm:$0xff]   ;;  %v808_v10 = vld [vmem:[%s1069_s1 + $0x224] ss:$8 sps:$4 sm:$0xff]   ;;  %v806_v12 = vld [vmem:[%s1069_s1 + $0x220] ss:$8 sps:$4 sm:$0xff]  }
  0x19   :  { %494 = vmatpush1.bf16.msra.mxu1 %v742_v26  ;;  %v813_v13 = vld [vmem:[%s1069_s1 + $0x234] ss:$8 sps:$4 sm:$0xff]   ;;  %v811_v14 = vld [vmem:[%s1069_s1 + $0x230] ss:$8 sps:$4 sm:$0xff]   ;;  %v93_v17 = vshrl.u32 %v92_v16, 7 }
  0x1a   :  { %495 = vmatprep.subr.bf16.mxu1 %v746_v27  ;;  %v793_v15 = vld [vmem:[%s1070_s0 + $0x10] ss:$0 sps:$4 sm:$0xff]   ;;  %v90_v21 = vld [vmem:[%s1071_s2] sm:$0x3] }
  0x1b   :  { %537 = vmatpush1.bf16.msra.mxu0 %v733_v24  ;;  %v94_v19 = vsub.s32 0, %v93_v17  ;;  %v98_v22 = vsub.s32 1, %v93_v17 }
  0x1c   :  { %538 = vmatprep.subr.bf16.mxu0 %v737_v25 }
  0x1d   :  { %496 = vmatpush1.bf16.msra.mxu1 %v748_v30  ;;  %v95_v25 = vrot.slane %v90_v21, %v94_v19  ;;  %v99_v26 = vrot.slane %v90_v21, %v98_v22 }
  0x1e   :  { %497 = vmatprep.subr.bf16.mxu1 %v752_v31 }
  0x1f   :  { %539 = vmatpush1.bf16.msra.mxu0 %v739_v28 }
  0x20   :  { %540 = vmatprep.subr.bf16.mxu0 %v743_v29 }
  0x21   :  { %498 = vmatpush1.bf16.msra.mxu1 %v754_v34 }
  0x22   :  { %499 = vmatprep.subr.bf16.mxu1 %v758_v35 }
  0x23   :  { %541 = vmatpush1.bf16.msra.mxu0 %v745_v32 }
  0x24   :  { %542 = vmatprep.subr.bf16.mxu0 %v749_v33 }
  0x25   :  { %500 = vmatpush1.bf16.msra.mxu1 %v760_v38 }
  0x26   :  { %501 = vmatprep.subr.bf16.mxu1 %v764_v39 }
  0x27   :  { %543 = vmatpush1.bf16.msra.mxu0 %v751_v36 }
  0x28   :  { %544 = vmatprep.subr.bf16.mxu0 %v755_v37 }
  0x29   :  { %502 = vmatpush1.bf16.msra.mxu1 %v766_v42 }
  0x2a   :  { %503 = vmatprep.subr.bf16.mxu1 %v770_v43 }
  0x2b   :  { %545 = vmatpush1.bf16.msra.mxu0 %v757_v40 }
  0x2c   :  { %546 = vmatprep.subr.bf16.mxu0 %v761_v41 }
  0x2d   :  { %504 = vmatpush1.bf16.msra.mxu1 %v772_v47 }
  0x2e   :  { %505 = vmatprep.subr.bf16.mxu1 %v776_v49 }
  0x2f   :  { %547 = vmatpush1.bf16.msra.mxu0 %v763_v46 }
  0x30   :  { %548 = vmatprep.subr.bf16.mxu0 %v767_v48 }
  0x31   :  { %506 = vmatpush1.bf16.msra.mxu1 %v778_v52 }
  0x32   :  { %507 = vmatprep.subr.bf16.mxu1 %v782_v54 }
  0x33   :  { %549 = vmatpush1.bf16.msra.mxu0 %v769_v50 }
  0x34   :  { %550 = vmatprep.subr.bf16.mxu0 %v773_v51 }
  0x35   :  { %508 = vmatpush1.bf16.msra.mxu1 %v784_v57 }
  0x36   :  { %509 = vmatprep.subr.bf16.mxu1 %v788_v59 }
  0x37   :  { %551 = vmatpush1.bf16.msra.mxu0 %v775_v56 }
  0x38   :  { %552 = vmatprep.subr.bf16.mxu0 %v779_v58 }
  0x39   :  { %510 = vmatpush1.bf16.msra.mxu1 %v790_v61 }
  0x3a   :  { %511 = vmatprep.subr.bf16.mxu1 %v797_v63 }
  0x3b   :  { %553 = vmatpush1.bf16.msra.mxu0 %v781_v60 }
  0x3c   :  { %554 = vmatprep.subr.bf16.mxu0 %v785_v62 }
  0x3d   :  { %512 = vmatpush1.bf16.msra.mxu1 %v799_v1 }
  0x3e   :  { %513 = vmatprep.subr.bf16.mxu1 %v803_v3 }
  0x3f   :  { %555 = vmatpush1.bf16.msra.mxu0 %v787_v0 }
  0x40   :  { %565 = vmatprep.subr.bf16.mxu0 %v796_v2 }
  0x41   :  { %514 = vmatpush1.bf16.msra.mxu1 %v805_v6 }
  0x42   :  { %557 = vmatmul.mubr.bf16.vlgmr.msra.gmra.mrb[0].mxu0 %v616_v4 }
  0x43   :  { %566 = vmatpush1.bf16.msra.mxu0 %v794_v5  ;;  %597 = vmatprep.mubr.bf16.mxu0 %v814_v11 }
  0x44   :  { %567 = vmatprep.subr.bf16.mxu0 %v802_v7  ;;  %516 = vmatmul.mubr.bf16.vlgmr.msra.gmra.mrb[0].mxu1 %v614_v8 }
  0x47   :  { %568 = vmatpush1.bf16.msra.mxu0 %v800_v9 }
  0x48   :  { %569 = vmatprep.subr.bf16.mxu0 %v808_v10 }
  0x4b   :  { %570 = vmatpush1.bf16.msra.mxu0 %v806_v12 }
  0x4c   :  { %571 = vmatprep.subr.bf16.mxu0 %v813_v13 }
  0x4f   :  { %572 = vmatpush1.bf16.msra.mxu0 %v811_v14 }
  0x52   :  { %691 = vmatmul.mubr.msk.bf16.vlgmr.msra.gmra.mrb[0].mxu0 %vm479_vm0, %v793_v15 }
 0x117   :  { %v517_v18 = vpop.f32.mrb[0].mxu1 }
 0x118   :  { %v519_v20 = vpop.f32.mrb[1].mxu1  ;;  %v518_v27 = vadd.f32 %v517_v18, %v95_v25 }
 0x119   :  { %v521_v23 = vpop.f32.mrb[2].mxu1  ;;  %v520_v28 = vadd.f32 %v519_v20, %v99_v26 }
 0x11a   :  { %v522_v24 = vpop.f32.mrb[3].mxu1 }
 0x125   :  { %v599_v29 = vpop.f32.mrb[0].mxu0 }
 0x126   :  { %v693_v30 = vadd.f32 %v599_v29, %v518_v27  ;;  %v601_v31 = vpop.f32.mrb[1].mxu0 }
 0x127   :  { %v695_v32 = vadd.f32 %v601_v31, %v520_v28  ;;  %v603_v33 = vpop.f32.mrb[2].mxu0 }
 0x128   :  { %v606_v34 = vmax.f32 %v693_v30, 0.0  ;;  %v604_v35 = vpop.f32.mrb[3].mxu0 }
 0x129   :  { %v607_v36 = vmax.f32 %v695_v32, 0.0 }
 0x12a   :  { %608 = vst [vmem:[%s1072_s3] sm:$0xff] %v606_v34 }
 0x12b   :  { %609 = vst [vmem:[%s1072_s3 + $0x8] sm:$0xff] %v607_v36 }

// kernel: tile.23
= control target key start
LH: loop header
LB: loop body
LE: loop exit
PB: predicated region body
PF: predicated region fallthrough
CT: control target
= control target key end

     0   :  { %s22_s0 = inlined_call_operand.vmem [shape: f32[32], index: 0, kind: input, shape index: {}]   ;;  %s23_s1 = inlined_call_operand.vmem [shape: f32[4,32], index: 1, kind: output, shape index: {}]  }
   0x1   :  { %v4_v0 = vld [vmem:[%s22_s0] ss:$0 sm:$0xff] }
   0x2   :  { %5 = vst [vmem:[%s23_s1] sm:$0xf] %v4_v0 }

// kernel: tile.24
= control target key start
LH: loop header
LB: loop body
LE: loop exit
PB: predicated region body
PF: predicated region fallthrough
CT: control target
= control target key end

     0   :  { %vm7_vm0 = vcmask 261120   ;;  %s37_s8 = smov 32   ;;  %s38_s9 = smov 64   ;;  %vm13_vm1 = vcmask 1048320   ;;  %vm19_vm2 = vcmask 785920   ;;  %vm25_vm3 = vcmask 523520   ;;  %s55_s0 = inlined_call_operand.vmem [shape: f32[4,32], index: 0, kind: input, shape index: {}]   ;;  %s56_s1 = inlined_call_operand.vmem [shape: f32[1,128], index: 1, kind: output, shape index: {}]  }
   0x1   :  { %v4_v0 = vld [vmem:[%s55_s0] sm:$0xf]  ;;  %s36_s0 = smov 96  }
   0x2   :  { %5 = vst [vmem:[#allocation1] sm:$0xf] %v4_v0 }
   0x9   :  { %v10_v1 = vld [vmem:[#allocation1 + $0x3] sm:$0x1]   ;;  %v22_v2 = vld [vmem:[#allocation1 + $0x1] sm:$0x1]   ;;  %v6_v3 = vld [vmem:[#allocation1] sm:$0x1]  }
   0xa   :  { %11 = vrot.lane.b32.xlu0 %v10_v1, %s36_s0  ;;  %23 = vrot.lane.b32.xlu1 %v22_v2, %s37_s8  ;;  %v16_v4 = vld [vmem:[#allocation1 + $0x2] sm:$0x1]   ;;  %8 = vst.msk [vmem:[#allocation0] sm:$0x1] %vm7_vm0, %v6_v3  }
   0xe   :  { %17 = vrot.lane.b32.xlu0 %v16_v4, %s38_s9 }
  0x7c   :  { %v12_v5 = vpop.permute.xlu0 %11   ;;  %v24_v6 = vpop.permute.xlu1 %23  }
  0x7d   :  { %14 = vst.msk [vmem:[#allocation0] sm:$0x1] %vm13_vm1, %v12_v5  }
  0x80   :  { %v18_v7 = vpop.permute.xlu0 %17  }
  0x81   :  { %20 = vst.msk [vmem:[#allocation0] sm:$0x1] %vm19_vm2, %v18_v7  }
  0x82   :  { %26 = vst.msk [vmem:[#allocation0] sm:$0x1] %vm25_vm3, %v24_v6  }
  0x89   :  { %v30_v8 = vld [vmem:[#allocation0] sm:$0x1] }
  0x8a   :  { %32 = vst [vmem:[%s56_s1] sm:$0x1] %v30_v8 }

// kernel: vqvae_forward.18
= control target key start
LH: loop header
LB: loop body
LE: loop exit
PB: predicated region body
PF: predicated region fallthrough
CT: control target
= control target key end

     0   :  { %vm372_vm0 = vcmask 523264   ;;  %s884_s1 = inlined_call_operand.vmem [shape: bf16[576,128], index: 1, kind: input, shape index: {}]   ;;  %s885_s0 = inlined_call_operand.vmem [shape: bf16[32,576], index: 0, kind: input, shape index: {}]   ;;  %s886_s2 = inlined_call_operand.vmem [shape: f32[1,128], index: 2, kind: input, shape index: {}]   ;;  %s887_s3 = inlined_call_operand.vmem [shape: f32[32,128], index: 3, kind: output, shape index: {}]  }
   0x1   :  { %v661_v0 = vld [vmem:[%s884_s1 + $0x40] sm:$0xff]   ;;  %v665_v4 = vld [vmem:[%s884_s1 + $0x48] sm:$0xff]   ;;  %v669_v8 = vld [vmem:[%s884_s1 + $0x50] sm:$0xff]  }
   0x2   :  { %v662_v1 = vld [vmem:[%s884_s1] sm:$0xff]   ;;  %587 = vmatprep.subr.bf16.mxu0 %v661_v0  ;;  %v666_v5 = vld [vmem:[%s884_s1 + $0x8] sm:$0xff]   ;;  %v670_v9 = vld [vmem:[%s884_s1 + $0x10] sm:$0xff]  }
   0x3   :  { %v663_v2 = vld [vmem:[%s884_s1 + $0xc0] sm:$0xff]   ;;  %588 = vmatpush3.bf16.msra.mxu0 %v662_v1  ;;  %v667_v6 = vld [vmem:[%s884_s1 + $0xc8] sm:$0xff]   ;;  %v671_v10 = vld [vmem:[%s884_s1 + $0xd0] sm:$0xff]  }
   0x4   :  { %v664_v3 = vld [vmem:[%s884_s1 + $0x80] sm:$0xff]   ;;  %615 = vmatprep.subr.bf16.mxu1 %v663_v2  ;;  %589 = vmatprep.subr.bf16.mxu0 %v665_v4  ;;  %v668_v7 = vld [vmem:[%s884_s1 + $0x88] sm:$0xff]   ;;  %v672_v11 = vld [vmem:[%s884_s1 + $0x90] sm:$0xff]  }
   0x5   :  { %616 = vmatpush3.bf16.msra.mxu1 %v664_v3  ;;  %v673_v12 = vld [vmem:[%s884_s1 + $0x58] sm:$0xff]   ;;  %v677_v16 = vld [vmem:[%s884_s1 + $0x60] sm:$0xff]   ;;  %v681_v20 = vld [vmem:[%s884_s1 + $0x68] sm:$0xff]  }
   0x6   :  { %617 = vmatprep.subr.bf16.mxu1 %v667_v6  ;;  %v674_v13 = vld [vmem:[%s884_s1 + $0x18] sm:$0xff]   ;;  %v678_v17 = vld [vmem:[%s884_s1 + $0x20] sm:$0xff]   ;;  %v682_v21 = vld [vmem:[%s884_s1 + $0x28] sm:$0xff]  }
   0x7   :  { %590 = vmatpush3.bf16.msra.mxu0 %v666_v5  ;;  %v675_v14 = vld [vmem:[%s884_s1 + $0xd8] sm:$0xff]   ;;  %v679_v18 = vld [vmem:[%s884_s1 + $0xe0] sm:$0xff]   ;;  %v683_v22 = vld [vmem:[%s884_s1 + $0xe8] sm:$0xff]  }
   0x8   :  { %591 = vmatprep.subr.bf16.mxu0 %v669_v8  ;;  %v676_v15 = vld [vmem:[%s884_s1 + $0x98] sm:$0xff]   ;;  %v680_v19 = vld [vmem:[%s884_s1 + $0xa0] sm:$0xff]   ;;  %v684_v23 = vld [vmem:[%s884_s1 + $0xa8] sm:$0xff]  }
   0x9   :  { %618 = vmatpush3.bf16.msra.mxu1 %v668_v7  ;;  %v685_v24 = vld [vmem:[%s884_s1 + $0x70] sm:$0xff]   ;;  %v689_v28 = vld [vmem:[%s884_s1 + $0x78] sm:$0xff]   ;;  %v696_v34 = vld [vmem:[%s884_s1 + $0x100] sm:$0xff]  }
   0xa   :  { %619 = vmatprep.subr.bf16.mxu1 %v671_v10  ;;  %v686_v25 = vld [vmem:[%s884_s1 + $0x30] sm:$0xff]   ;;  %v690_v29 = vld [vmem:[%s884_s1 + $0x38] sm:$0xff]   ;;  %v699_v36 = vld [vmem:[%s885_s0 + $0xc] ss:$20 sps:$4 sm:$0xff]  }
   0xb   :  { %592 = vmatpush3.bf16.msra.mxu0 %v670_v9  ;;  %v687_v26 = vld [vmem:[%s884_s1 + $0xf0] sm:$0xff]   ;;  %v691_v30 = vld [vmem:[%s884_s1 + $0xf8] sm:$0xff]   ;;  %v700_v37 = vld [vmem:[%s884_s1 + $0x108] sm:$0xff]   ;;  %460 = vmatprep.mubr.bf16.mxu1 %v699_v36 }
   0xc   :  { %593 = vmatprep.subr.bf16.mxu0 %v673_v12  ;;  %v688_v27 = vld [vmem:[%s884_s1 + $0xb0] sm:$0xff]   ;;  %v694_v32 = vld [vmem:[%s885_s0 + $0x4] ss:$20 sps:$4 sm:$0xff]   ;;  %v697_v35 = vld [vmem:[%s885_s0 + $0x8] ss:$20 sps:$4 sm:$0xff]  }
   0xd   :  { %620 = vmatpush3.bf16.msra.mxu1 %v672_v11  ;;  %v692_v31 = vld [vmem:[%s885_s0] ss:$20 sps:$4 sm:$0xff]   ;;  %v695_v33 = vld [vmem:[%s884_s1 + $0xb8] sm:$0xff]   ;;  %411 = vmatprep.mubr.bf16.mxu0 %v694_v32  ;;  %v707_v42 = vld [vmem:[%s885_s0 + $0x30] ss:$20 sps:$4 sm:$0xff]  }
   0xe   :  { %621 = vmatprep.subr.bf16.mxu1 %v675_v14  ;;  %v701_v38 = vld [vmem:[%s885_s0 + $0x2c] ss:$20 sps:$4 sm:$0xff]   ;;  %v703_v39 = vld [vmem:[%s885_s0 + $0x28] ss:$20 sps:$4 sm:$0xff]   ;;  %v704_v40 = vld [vmem:[%s884_s1 + $0x110] sm:$0xff]  }
   0xf   :  { %594 = vmatpush3.bf16.msra.mxu0 %v674_v13  ;;  %v705_v41 = vld [vmem:[%s885_s0 + $0x34] ss:$20 sps:$4 sm:$0xff]   ;;  %v708_v43 = vld [vmem:[%s884_s1 + $0x118] sm:$0xff]   ;;  %v709_v44 = vld [vmem:[%s885_s0 + $0x10] ss:$20 sps:$4 sm:$0xff]  }
  0x10   :  { %595 = vmatprep.subr.bf16.mxu0 %v677_v16  ;;  %v710_v45 = vld [vmem:[%s885_s0 + $0x38] ss:$20 sps:$4 sm:$0xff]   ;;  %v538_v47 = vld [vmem:[%s886_s2] ss:$0 sm:$0xff] }
  0x11   :  { %622 = vmatpush3.bf16.msra.mxu1 %v676_v15 }
  0x12   :  { %623 = vmatprep.subr.bf16.mxu1 %v679_v18 }
  0x13   :  { %596 = vmatpush3.bf16.msra.mxu0 %v678_v17 }
  0x14   :  { %597 = vmatprep.subr.bf16.mxu0 %v681_v20 }
  0x15   :  { %624 = vmatpush3.bf16.msra.mxu1 %v680_v19 }
  0x16   :  { %625 = vmatprep.subr.bf16.mxu1 %v683_v22 }
  0x17   :  { %598 = vmatpush3.bf16.msra.mxu0 %v682_v21 }
  0x18   :  { %599 = vmatprep.subr.bf16.mxu0 %v685_v24 }
  0x19   :  { %626 = vmatpush3.bf16.msra.mxu1 %v684_v23 }
  0x1a   :  { %627 = vmatprep.subr.bf16.mxu1 %v687_v26 }
  0x1b   :  { %600 = vmatpush3.bf16.msra.mxu0 %v686_v25 }
  0x1c   :  { %601 = vmatprep.subr.bf16.mxu0 %v689_v28 }
  0x1d   :  { %628 = vmatpush3.bf16.msra.mxu1 %v688_v27 }
  0x1e   :  { %629 = vmatprep.subr.bf16.mxu1 %v691_v30 }
  0x1f   :  { %602 = vmatpush3.bf16.msra.mxu0 %v690_v29 }
  0x20   :  { %649 = vmatprep.subr.bf16.mxu0 %v696_v34 }
  0x21   :  { %630 = vmatpush3.bf16.msra.mxu1 %v695_v33 }
  0x22   :  { %412 = vmatmul.mubr.bf16.vlgmr.msra.gmra.mrb[0].mxu0 %v692_v31 }
  0x23   :  { %650 = vmatpush3.bf16.msra.mxu0 %v696_v34  ;;  %419 = vmatprep.mubr.bf16.mxu0 %v701_v38 }
  0x24   :  { %461 = vmatmul.mubr.bf16.vlgmr.msra.gmra.mrb[0].mxu1 %v697_v35  ;;  %651 = vmatprep.subr.bf16.mxu0 %v700_v37 }
  0x25   :  { %468 = vmatprep.mubr.bf16.mxu1 %v705_v41 }
  0x27   :  { %652 = vmatpush3.bf16.msra.mxu0 %v700_v37 }
  0x28   :  { %653 = vmatprep.subr.bf16.mxu0 %v704_v40 }
  0x2a   :  { %420 = vmatmul.mubr.bf16.gmra.mrb[4].mxu0 %v703_v39 }
  0x2b   :  { %657 = vmatprep.mubr.msk.bf16.mxu0 %vm372_vm0, %v709_v44  ;;  %654 = vmatpush3.bf16.msra.mxu0 %v704_v40 }
  0x2c   :  { %469 = vmatmul.mubr.bf16.gmra.mrb[4].mxu1 %v707_v42  ;;  %655 = vmatprep.subr.bf16.mxu0 %v708_v43 }
  0x2f   :  { %656 = vmatpush3.bf16.msra.mxu0 %v708_v43 }
  0x32   :  { %658 = vmatmul.mubr.msk.bf16.vlgmr.msra.gmra.mrb[8].mxu0 %vm372_vm0, %v710_v45 }
  0xf5   :  { %v603_v46 = vpop.f32.mrb[0].mxu0 }
  0xf6   :  { %v604_v48 = vpop.f32.mrb[1].mxu0 }
  0xf7   :  { %v605_v49 = vadd.f32 %v604_v48, %v603_v46  ;;  %v606_v50 = vpop.f32.mrb[2].mxu0  ;;  %v631_v51 = vpop.f32.mrb[0].mxu1 }
  0xf8   :  { %v607_v52 = vpop.f32.mrb[3].mxu0  ;;  %v632_v55 = vpop.f32.mrb[1].mxu1 }
  0xf9   :  { %v414_v53 = vadd.f32 %v605_v49, %v538_v47  ;;  %v608_v54 = vadd.f32 %v607_v52, %v606_v50  ;;  %v633_v56 = vadd.f32 %v632_v55, %v631_v51  ;;  %v634_v57 = vpop.f32.mrb[2].mxu1 }
  0xfa   :  { %v635_v59 = vpop.f32.mrb[3].mxu1 }
  0xfb   :  { %v417_v58 = vadd.f32 %v608_v54, %v538_v47  ;;  %v636_v60 = vadd.f32 %v635_v59, %v634_v57  ;;  %v463_v61 = vadd.f32 %v633_v56, %v414_v53 }
  0xfd   :  { %v609_v62 = vpop.f32.mrb[4].mxu0  ;;  %v466_v0 = vadd.f32 %v636_v60, %v417_v58 }
  0xfe   :  { %v610_v63 = vpop.f32.mrb[5].mxu0 }
  0xff   :  { %v611_v1 = vadd.f32 %v610_v63, %v609_v62  ;;  %v612_v2 = vpop.f32.mrb[6].mxu0  ;;  %v637_v3 = vpop.f32.mrb[4].mxu1 }
 0x100   :  { %v613_v4 = vpop.f32.mrb[7].mxu0  ;;  %v638_v7 = vpop.f32.mrb[5].mxu1 }
 0x101   :  { %v422_v5 = vadd.f32 %v611_v1, %v538_v47  ;;  %v614_v6 = vadd.f32 %v613_v4, %v612_v2  ;;  %v639_v8 = vadd.f32 %v638_v7, %v637_v3  ;;  %v640_v9 = vpop.f32.mrb[6].mxu1 }
 0x102   :  { %v641_v11 = vpop.f32.mrb[7].mxu1 }
 0x103   :  { %v425_v10 = vadd.f32 %v614_v6, %v538_v47  ;;  %v642_v12 = vadd.f32 %v641_v11, %v640_v9  ;;  %v471_v13 = vadd.f32 %v639_v8, %v422_v5 }
 0x105   :  { %v659_v14 = vpop.f32.mrb[8].mxu0  ;;  %v474_v15 = vadd.f32 %v642_v12, %v425_v10 }
 0x106   :  { %v520_v16 = vadd.f32 %v659_v14, %v471_v13  ;;  %v511_v17 = vpop.f32.mrb[9].mxu0 }
 0x107   :  { %v512_v18 = vadd.f32 %v511_v17, %v463_v61  ;;  %v660_v19 = vpop.f32.mrb[10].mxu0 }
 0x108   :  { %v528_v20 = vmax.f32 %v520_v16, 0.0  ;;  %v523_v21 = vadd.f32 %v660_v19, %v474_v15  ;;  %v514_v22 = vpop.f32.mrb[11].mxu0 }
 0x109   :  { %v526_v23 = vmax.f32 %v512_v18, 0.0  ;;  %v515_v24 = vadd.f32 %v514_v22, %v466_v0 }
 0x10a   :  { %532 = vst [vmem:[%s887_s3 + $0x10] sm:$0xff] %v528_v20  ;;  %v529_v25 = vmax.f32 %v523_v21, 0.0 }
 0x10b   :  { %530 = vst [vmem:[%s887_s3] sm:$0xff] %v526_v23  ;;  %v527_v26 = vmax.f32 %v515_v24, 0.0 }
 0x10c   :  { %533 = vst [vmem:[%s887_s3 + $0x18] sm:$0xff] %v529_v25 }
 0x10d   :  { %531 = vst [vmem:[%s887_s3 + $0x8] sm:$0xff] %v527_v26 }

// kernel: vqvae_forward.19
= control target key start
LH: loop header
LB: loop body
LE: loop exit
PB: predicated region body
PF: predicated region fallthrough
CT: control target
= control target key end

     0   :  { %vm318_vm0 = vcmask 261120   ;;  %s1051_s1 = inlined_call_operand.vmem [shape: bf16[288,128], index: 1, kind: input, shape index: {}]   ;;  %s1052_s0 = inlined_call_operand.vmem [shape: bf16[128,288], index: 0, kind: input, shape index: {}]   ;;  %s1053_s2 = inlined_call_operand.vmem [shape: f32[1,128], index: 2, kind: input, shape index: {}]   ;;  %s1054_s3 = inlined_call_operand.vmem [shape: f32[128,128], index: 3, kind: output, shape index: {}]  }
   0x1   :  { %v734_v0 = vld [vmem:[%s1051_s1 + $0x40] sm:$0xff]   ;;  %v736_v2 = vld [vmem:[%s1051_s1 + $0x48] sm:$0xff]   ;;  %v738_v4 = vld [vmem:[%s1051_s1 + $0x50] sm:$0xff]  }
   0x2   :  { %v735_v1 = vld [vmem:[%s1051_s1] sm:$0xff]   ;;  %624 = vmatprep.subr.bf16.mxu0 %v734_v0  ;;  %718 = vmatprep.subr.bf16.mxu1 %v734_v0  ;;  %v737_v3 = vld [vmem:[%s1051_s1 + $0x8] sm:$0xff]   ;;  %v739_v5 = vld [vmem:[%s1051_s1 + $0x10] sm:$0xff]  }
   0x3   :  { %625 = vmatpush3.bf16.msra.mxu0 %v735_v1  ;;  %726 = vmatpush3.bf16.msra.mxu1 %v735_v1  ;;  %v740_v6 = vld [vmem:[%s1051_s1 + $0x58] sm:$0xff]   ;;  %v742_v8 = vld [vmem:[%s1051_s1 + $0x60] sm:$0xff]   ;;  %v744_v10 = vld [vmem:[%s1051_s1 + $0x68] sm:$0xff]  }
   0x4   :  { %626 = vmatprep.subr.bf16.mxu0 %v736_v2  ;;  %719 = vmatprep.subr.bf16.mxu1 %v736_v2  ;;  %v741_v7 = vld [vmem:[%s1051_s1 + $0x18] sm:$0xff]   ;;  %v743_v9 = vld [vmem:[%s1051_s1 + $0x20] sm:$0xff]   ;;  %v745_v13 = vld [vmem:[%s1051_s1 + $0x28] sm:$0xff]  }
   0x5   :  { %v752_v11 = vld [vmem:[%s1052_s0 + $0x4] ss:$12 sps:$4 sm:$0xff]   ;;  %v755_v12 = vld [vmem:[%s1052_s0 + $0x94] ss:$12 sps:$4 sm:$0xff]   ;;  %v748_v16 = vld [vmem:[%s1051_s1 + $0x78] sm:$0xff]  }
   0x6   :  { %v746_v14 = vld [vmem:[%s1051_s1 + $0x70] sm:$0xff]   ;;  %375 = vmatprep.mubr.bf16.mxu0 %v752_v11  ;;  %423 = vmatprep.mubr.bf16.mxu1 %v755_v12  ;;  %v749_v17 = vld [vmem:[%s1051_s1 + $0x38] sm:$0xff]   ;;  %v750_v18 = vld [vmem:[%s1052_s0] ss:$12 sps:$4 sm:$0xff]  }
   0x7   :  { %627 = vmatpush3.bf16.msra.mxu0 %v737_v3  ;;  %727 = vmatpush3.bf16.msra.mxu1 %v737_v3  ;;  %v747_v15 = vld [vmem:[%s1051_s1 + $0x30] sm:$0xff]   ;;  %v756_v19 = vld [vmem:[%s1051_s1 + $0x80] sm:$0xff]   ;;  %v757_v21 = vld [vmem:[%s1052_s0 + $0x1c] ss:$12 sps:$4 sm:$0xff]  }
   0x8   :  { %628 = vmatprep.subr.bf16.mxu0 %v738_v4  ;;  %720 = vmatprep.subr.bf16.mxu1 %v738_v4  ;;  %v753_v20 = vld [vmem:[%s1052_s0 + $0x90] ss:$12 sps:$4 sm:$0xff]   ;;  %v759_v22 = vld [vmem:[%s1052_s0 + $0xac] ss:$12 sps:$4 sm:$0xff]   ;;  %v762_v25 = vld [vmem:[%s1052_s0 + $0xa8] ss:$12 sps:$4 sm:$0xff]  }
   0x9   :  { %v763_v23 = vld [vmem:[%s1051_s1 + $0x88] sm:$0xff]   ;;  %v761_v24 = vld [vmem:[%s1052_s0 + $0x18] ss:$12 sps:$4 sm:$0xff]   ;;  %v764_v26 = vld [vmem:[%s1052_s0 + $0x34] ss:$12 sps:$4 sm:$0xff]  }
   0xa   :  { %v766_v27 = vld [vmem:[%s1052_s0 + $0x8] ss:$12 sps:$4 sm:$0xff]   ;;  %v767_v28 = vld [vmem:[%s1052_s0 + $0x30] ss:$12 sps:$4 sm:$0xff]   ;;  %v768_v29 = vld [vmem:[%s1052_s0 + $0x20] ss:$12 sps:$4 sm:$0xff]  }
   0xb   :  { %629 = vmatpush3.bf16.msra.mxu0 %v739_v5  ;;  %728 = vmatpush3.bf16.msra.mxu1 %v739_v5  ;;  %v769_v30 = vld [vmem:[%s1052_s0 + $0x4c] ss:$12 sps:$4 sm:$0xff]   ;;  %v772_v32 = vld [vmem:[%s1052_s0 + $0x48] ss:$12 sps:$4 sm:$0xff]   ;;  %v773_v33 = vld [vmem:[%s1052_s0 + $0x50] ss:$12 sps:$4 sm:$0xff]  }
   0xc   :  { %630 = vmatprep.subr.bf16.mxu0 %v740_v6  ;;  %721 = vmatprep.subr.bf16.mxu1 %v740_v6  ;;  %v771_v31 = vld [vmem:[%s1052_s0 + $0x38] ss:$12 sps:$4 sm:$0xff]   ;;  %v776_v35 = vld [vmem:[%s1052_s0 + $0x68] ss:$12 sps:$4 sm:$0xff]   ;;  %v777_v36 = vld [vmem:[%s1052_s0 + $0x60] ss:$12 sps:$4 sm:$0xff]  }
   0xd   :  { %v774_v34 = vld [vmem:[%s1052_s0 + $0x64] ss:$12 sps:$4 sm:$0xff]   ;;  %v778_v37 = vld [vmem:[%s1052_s0 + $0x80] ss:$12 sps:$4 sm:$0xff]   ;;  %v779_v38 = vld [vmem:[%s1052_s0 + $0x7c] ss:$12 sps:$4 sm:$0xff]  }
   0xe   :  { %v781_v39 = vld [vmem:[%s1052_s0 + $0x98] ss:$12 sps:$4 sm:$0xff]   ;;  %v783_v41 = vld [vmem:[%s1052_s0 + $0xb0] ss:$12 sps:$4 sm:$0xff]   ;;  %v981_v2 = vld [vmem:[%s1053_s2] ss:$0 sm:$0xff] }
   0xf   :  { %631 = vmatpush3.bf16.msra.mxu0 %v741_v7  ;;  %729 = vmatpush3.bf16.msra.mxu1 %v741_v7  ;;  %v782_v40 = vld [vmem:[%s1052_s0 + $0x78] ss:$12 sps:$4 sm:$0xff]  }
  0x10   :  { %632 = vmatprep.subr.bf16.mxu0 %v742_v8  ;;  %722 = vmatprep.subr.bf16.mxu1 %v742_v8 }
  0x13   :  { %633 = vmatpush3.bf16.msra.mxu0 %v743_v9  ;;  %730 = vmatpush3.bf16.msra.mxu1 %v743_v9 }
  0x14   :  { %634 = vmatprep.subr.bf16.mxu0 %v744_v10  ;;  %723 = vmatprep.subr.bf16.mxu1 %v744_v10 }
  0x17   :  { %635 = vmatpush3.bf16.msra.mxu0 %v745_v13  ;;  %731 = vmatpush3.bf16.msra.mxu1 %v745_v13 }
  0x18   :  { %636 = vmatprep.subr.bf16.mxu0 %v746_v14  ;;  %724 = vmatprep.subr.bf16.mxu1 %v746_v14 }
  0x1b   :  { %637 = vmatpush3.bf16.msra.mxu0 %v747_v15  ;;  %732 = vmatpush3.bf16.msra.mxu1 %v747_v15 }
  0x1c   :  { %638 = vmatprep.subr.bf16.mxu0 %v748_v16  ;;  %725 = vmatprep.subr.bf16.mxu1 %v748_v16 }
  0x1f   :  { %639 = vmatpush3.bf16.msra.mxu0 %v749_v17  ;;  %733 = vmatpush3.bf16.msra.mxu1 %v749_v17 }
  0x20   :  { %698 = vmatprep.subr.bf16.mxu1 %v756_v19 }
  0x22   :  { %376 = vmatmul.mubr.bf16.vlgmr.msra.gmra.mrb[0].mxu0 %v750_v18  ;;  %424 = vmatmul.mubr.bf16.vlgmr.msra.gmra.mrb[0].mxu1 %v753_v20 }
  0x23   :  { %699 = vmatpush3.bf16.msra.mxu1 %v756_v19  ;;  %383 = vmatprep.mubr.bf16.mxu0 %v757_v21 }
  0x24   :  { %431 = vmatprep.mubr.bf16.mxu1 %v759_v22  ;;  %700 = vmatprep.subr.bf16.mxu1 %v763_v23 }
  0x27   :  { %701 = vmatpush3.bf16.msra.mxu1 %v763_v23 }
  0x2a   :  { %384 = vmatmul.mubr.bf16.gmra.mrb[4].mxu0 %v761_v24  ;;  %432 = vmatmul.mubr.bf16.gmra.mrb[4].mxu1 %v762_v25 }
  0x2b   :  { %391 = vmatprep.mubr.bf16.mxu0 %v764_v26  ;;  %702 = vmatprep.mubr.msk.bf16.mxu1 %vm318_vm0, %v766_v27 }
  0x32   :  { %392 = vmatmul.mubr.bf16.gmra.mrb[8].mxu0 %v767_v28  ;;  %703 = vmatmul.mubr.msk.bf16.vlgmr.msra.gmra.mrb[8].mxu1 %vm318_vm0, %v768_v29 }
  0x33   :  { %399 = vmatprep.mubr.bf16.mxu0 %v769_v30  ;;  %706 = vmatprep.mubr.msk.bf16.mxu1 %vm318_vm0, %v771_v31 }
  0x3a   :  { %400 = vmatmul.mubr.bf16.gmra.mrb[12].mxu0 %v772_v32  ;;  %707 = vmatmul.mubr.msk.bf16.gmra.mrb[12].mxu1 %vm318_vm0, %v773_v33 }
  0x3b   :  { %407 = vmatprep.mubr.bf16.mxu0 %v774_v34  ;;  %710 = vmatprep.mubr.msk.bf16.mxu1 %vm318_vm0, %v776_v35 }
  0x42   :  { %408 = vmatmul.mubr.bf16.gmra.mrb[16].mxu0 %v777_v36  ;;  %711 = vmatmul.mubr.msk.bf16.gmra.mrb[16].mxu1 %vm318_vm0, %v778_v37 }
  0x43   :  { %415 = vmatprep.mubr.bf16.mxu0 %v779_v38  ;;  %714 = vmatprep.mubr.msk.bf16.mxu1 %vm318_vm0, %v781_v39 }
  0x4a   :  { %416 = vmatmul.mubr.bf16.gmra.mrb[20].mxu0 %v782_v40  ;;  %715 = vmatmul.mubr.msk.bf16.gmra.mrb[20].mxu1 %vm318_vm0, %v783_v41 }
  0xf5   :  { %v640_v42 = vpop.f32.mrb[0].mxu0  ;;  %v676_v43 = vpop.f32.mrb[0].mxu1 }
  0xf6   :  { %v641_v44 = vpop.f32.mrb[1].mxu0  ;;  %v677_v45 = vpop.f32.mrb[1].mxu1 }
  0xf7   :  { %v642_v46 = vadd.f32 %v641_v44, %v640_v42  ;;  %v643_v47 = vpop.f32.mrb[2].mxu0  ;;  %v970_v48 = vadd.f32 %v677_v45, %v676_v43  ;;  %v679_v49 = vpop.f32.mrb[2].mxu1 }
  0xf8   :  { %v644_v50 = vpop.f32.mrb[3].mxu0  ;;  %v680_v51 = vpop.f32.mrb[3].mxu1 }
  0xf9   :  { %v645_v52 = vadd.f32 %v644_v50, %v643_v47  ;;  %v972_v53 = vadd.f32 %v680_v51, %v679_v49  ;;  %v378_v6 = vadd.f32 %v642_v46, %v981_v2 }
  0xfb   :  { %v381_v15 = vadd.f32 %v645_v52, %v981_v2 }
  0xfd   :  { %v646_v54 = vpop.f32.mrb[4].mxu0  ;;  %v682_v55 = vpop.f32.mrb[4].mxu1 }
  0xfe   :  { %v647_v56 = vpop.f32.mrb[5].mxu0  ;;  %v683_v57 = vpop.f32.mrb[5].mxu1 }
  0xff   :  { %v648_v58 = vadd.f32 %v647_v56, %v646_v54  ;;  %v649_v59 = vpop.f32.mrb[6].mxu0  ;;  %v974_v60 = vadd.f32 %v683_v57, %v682_v55  ;;  %v685_v61 = vpop.f32.mrb[6].mxu1 }
 0x100   :  { %v650_v62 = vpop.f32.mrb[7].mxu0  ;;  %v686_v63 = vpop.f32.mrb[7].mxu1 }
 0x101   :  { %v651_v0 = vadd.f32 %v650_v62, %v649_v59  ;;  %v976_v1 = vadd.f32 %v686_v63, %v685_v61  ;;  %v386_v3 = vadd.f32 %v648_v58, %v981_v2  ;;  %v434_v59 = vadd.f32 %v974_v60, %v981_v2 }
 0x103   :  { %v389_v10 = vadd.f32 %v651_v0, %v981_v2 }
 0x105   :  { %v652_v4 = vpop.f32.mrb[8].mxu0  ;;  %v704_v5 = vpop.f32.mrb[8].mxu1 }
 0x106   :  { %v483_v7 = vadd.f32 %v704_v5, %v386_v3  ;;  %v653_v8 = vpop.f32.mrb[9].mxu0  ;;  %v474_v9 = vpop.f32.mrb[9].mxu1  ;;  %v426_v3 = vadd.f32 %v970_v48, %v981_v2 }
 0x107   :  { %v654_v11 = vadd.f32 %v653_v8, %v652_v4  ;;  %v475_v12 = vadd.f32 %v474_v9, %v378_v6  ;;  %v655_v13 = vpop.f32.mrb[10].mxu0  ;;  %v705_v14 = vpop.f32.mrb[10].mxu1 }
 0x108   :  { %784 = vtanh.f32 %v483_v7  ;;  %v486_v16 = vadd.f32 %v705_v14, %v389_v10  ;;  %v656_v17 = vpop.f32.mrb[11].mxu0  ;;  %v477_v18 = vpop.f32.mrb[11].mxu1  ;;  %v437_v7 = vadd.f32 %v976_v1, %v981_v2 }
 0x109   :  { %786 = vtanh.f32 %v475_v12  ;;  %v657_v19 = vadd.f32 %v656_v17, %v655_v13  ;;  %v478_v20 = vadd.f32 %v477_v18, %v381_v15  ;;  %v394_v23 = vadd.f32 %v654_v11, %v981_v2 }
 0x10a   :  { %788 = vtanh.f32 %v486_v16  ;;  %v429_v12 = vadd.f32 %v972_v53, %v981_v2 }
 0x10b   :  { %790 = vtanh.f32 %v478_v20  ;;  %v397_v30 = vadd.f32 %v657_v19, %v981_v2 }
 0x10d   :  { %v658_v21 = vpop.f32.mrb[12].mxu0  ;;  %v708_v22 = vpop.f32.mrb[12].mxu1 }
 0x10e   :  { %v659_v24 = vpop.f32.mrb[13].mxu0  ;;  %v490_v25 = vpop.f32.mrb[13].mxu1 }
 0x10f   :  { %v660_v26 = vadd.f32 %v659_v24, %v658_v21  ;;  %v491_v27 = vadd.f32 %v490_v25, %v394_v23  ;;  %v661_v28 = vpop.f32.mrb[14].mxu0  ;;  %v709_v29 = vpop.f32.mrb[14].mxu1 }
 0x110   :  { %v662_v31 = vpop.f32.mrb[15].mxu0  ;;  %v493_v32 = vpop.f32.mrb[15].mxu1 }
 0x111   :  { %v402_v33 = vadd.f32 %v660_v26, %v981_v2  ;;  %792 = vtanh.f32 %v491_v27  ;;  %v663_v34 = vadd.f32 %v662_v31, %v661_v28  ;;  %v494_v35 = vadd.f32 %v493_v32, %v397_v30 }
 0x112   :  { %v785_v36 = vpop.eup %784 }
 0x113   :  { %v787_v37 = vpop.eup %786  ;;  %555 = vst [vmem:[%s1054_s3 + $0x10] sm:$0xff] %v785_v36  ;;  %v499_v38 = vadd.f32 %v708_v22, %v402_v33  ;;  %v405_v39 = vadd.f32 %v663_v34, %v981_v2  ;;  %794 = vtanh.f32 %v494_v35 }
 0x114   :  { %v789_v40 = vpop.eup %788  ;;  %553 = vst [vmem:[%s1054_s3] sm:$0xff] %v787_v37 }
 0x115   :  { %v791_v41 = vpop.eup %790  ;;  %556 = vst [vmem:[%s1054_s3 + $0x18] sm:$0xff] %v789_v40  ;;  %796 = vtanh.f32 %v499_v38  ;;  %v502_v42 = vadd.f32 %v709_v29, %v405_v39  ;;  %v664_v43 = vpop.f32.mrb[16].mxu0 }
 0x116   :  { %v712_v44 = vpop.f32.mrb[16].mxu1  ;;  %554 = vst [vmem:[%s1054_s3 + $0x8] sm:$0xff] %v791_v41  ;;  %v665_v45 = vpop.f32.mrb[17].mxu0 }
 0x117   :  { %v506_v46 = vpop.f32.mrb[17].mxu1  ;;  %798 = vtanh.f32 %v502_v42  ;;  %v666_v47 = vadd.f32 %v665_v45, %v664_v43  ;;  %v667_v49 = vpop.f32.mrb[18].mxu0 }
 0x118   :  { %v713_v50 = vpop.f32.mrb[18].mxu1  ;;  %v668_v51 = vpop.f32.mrb[19].mxu0 }
 0x119   :  { %v509_v52 = vpop.f32.mrb[19].mxu1  ;;  %v410_v54 = vadd.f32 %v666_v47, %v981_v2  ;;  %v669_v55 = vadd.f32 %v668_v51, %v667_v49 }
 0x11b   :  { %v793_v56 = vpop.eup %792  ;;  %v507_v57 = vadd.f32 %v506_v46, %v410_v54  ;;  %v413_v58 = vadd.f32 %v669_v55, %v981_v2 }
 0x11c   :  { %557 = vst [vmem:[%s1054_s3 + $0x20] sm:$0xff] %v793_v56 }
 0x11d   :  { %v795_v61 = vpop.eup %794  ;;  %800 = vtanh.f32 %v507_v57  ;;  %v510_v62 = vadd.f32 %v509_v52, %v413_v58  ;;  %v670_v63 = vpop.f32.mrb[20].mxu0 }
 0x11e   :  { %v716_v0 = vpop.f32.mrb[20].mxu1  ;;  %558 = vst [vmem:[%s1054_s3 + $0x28] sm:$0xff] %v795_v61  ;;  %v671_v5 = vpop.f32.mrb[21].mxu0 }
 0x11f   :  { %v531_v4 = vadd.f32 %v716_v0, %v434_v59  ;;  %v522_v6 = vpop.f32.mrb[21].mxu1  ;;  %v797_v8 = vpop.eup %796  ;;  %802 = vtanh.f32 %v510_v62  ;;  %v672_v60 = vadd.f32 %v671_v5, %v670_v63 }
 0x120   :  { %v523_v9 = vadd.f32 %v522_v6, %v426_v3  ;;  %v673_v10 = vpop.f32.mrb[22].mxu0  ;;  %v717_v11 = vpop.f32.mrb[22].mxu1  ;;  %559 = vst [vmem:[%s1054_s3 + $0x30] sm:$0xff] %v797_v8 }
 0x121   :  { %804 = vtanh.f32 %v531_v4  ;;  %v534_v48 = vadd.f32 %v717_v11, %v437_v7  ;;  %v674_v13 = vpop.f32.mrb[23].mxu0  ;;  %v525_v14 = vpop.f32.mrb[23].mxu1  ;;  %v418_v1 = vadd.f32 %v672_v60, %v981_v2 }
 0x122   :  { %v799_v15 = vpop.eup %798  ;;  %806 = vtanh.f32 %v523_v9  ;;  %v675_v16 = vadd.f32 %v674_v13, %v673_v10  ;;  %v526_v17 = vadd.f32 %v525_v14, %v429_v12 }
 0x123   :  { %560 = vst [vmem:[%s1054_s3 + $0x38] sm:$0xff] %v799_v15  ;;  %808 = vtanh.f32 %v534_v48  ;;  %v515_v53 = vadd.f32 %v712_v44, %v418_v1 }
 0x124   :  { %v421_v18 = vadd.f32 %v675_v16, %v981_v2  ;;  %810 = vtanh.f32 %v526_v17 }
 0x125   :  { %812 = vtanh.f32 %v515_v53 }
 0x126   :  { %v518_v19 = vadd.f32 %v713_v50, %v421_v18 }
 0x127   :  { %v801_v20 = vpop.eup %800 }
 0x128   :  { %814 = vtanh.f32 %v518_v19  ;;  %561 = vst [vmem:[%s1054_s3 + $0x40] sm:$0xff] %v801_v20 }
 0x129   :  { %v803_v21 = vpop.eup %802 }
 0x12a   :  { %562 = vst [vmem:[%s1054_s3 + $0x48] sm:$0xff] %v803_v21 }
 0x12b   :  { %v805_v22 = vpop.eup %804 }
 0x12c   :  { %v807_v23 = vpop.eup %806  ;;  %567 = vst [vmem:[%s1054_s3 + $0x70] sm:$0xff] %v805_v22 }
 0x12d   :  { %v809_v2 = vpop.eup %808  ;;  %565 = vst [vmem:[%s1054_s3 + $0x60] sm:$0xff] %v807_v23 }
 0x12e   :  { %v811_v24 = vpop.eup %810  ;;  %568 = vst [vmem:[%s1054_s3 + $0x78] sm:$0xff] %v809_v2 }
 0x12f   :  { %566 = vst [vmem:[%s1054_s3 + $0x68] sm:$0xff] %v811_v24  ;;  %v813_v25 = vpop.eup %812 }
 0x130   :  { %563 = vst [vmem:[%s1054_s3 + $0x50] sm:$0xff] %v813_v25 }
 0x132   :  { %v815_v26 = vpop.eup %814 }
 0x133   :  { %564 = vst [vmem:[%s1054_s3 + $0x58] sm:$0xff] %v815_v26 }

</bundles_post_ra>
